<compile_context>
chip_gen: v7x
topology: tpu7x:2x2x1
jax: 0.10.0
libtpu: 0.0.40
codegen_flags: <defaults>
</compile_context>

<pallas_src>
import functools

import jax
import jax.numpy as jnp
import numpy as np
from jax.experimental import pallas as pl
from jax.experimental.pallas import tpu as pltpu

GAMMA = -0.1
ZETA = 1.1
LANE = 128


def _round_up(x, m):
    return ((x + m - 1) // m) * m


def _vmem_limit_bytes():
    """Generation-aware scoped-VMEM cap: ~3/4 of physical, <= 100 MiB.

    v5e/v6e (128 MiB physical) -> ~96 MiB; v7x (64 MiB) -> 48 MiB.
    """
    try:
        cap = int(pltpu.get_tpu_info().vmem_capacity_bytes)
        return min(cap * 3 // 4, 100 * 1024 * 1024)
    except Exception:  # conservative fallback, safe on every generation
        return 48 * 1024 * 1024


# ---------------------------------------------------------------------------
# 1) One-shot L0 gate: mask = hard_sigmoid(sigmoid(loc)*(zeta-gamma)+gamma),
#    masked weight = weight * mask.  Hoisted out of the conv grid so the
#    EUP/VALU gate math and the `loc` DMA run exactly once per forward.
# ---------------------------------------------------------------------------
def _l0_gate_kernel(w_ref, loc_ref, wm_ref):
    s = jax.nn.sigmoid(loc_ref[...]) * (ZETA - GAMMA) + GAMMA   # f32 gate math
    mask = jnp.minimum(jnp.maximum(s, 0.0), 1.0)                # hard_sigmoid
    wm_ref[...] = (w_ref[...] * mask).astype(wm_ref.dtype)


def _masked_weight(w2d, loc2d, compute_dtype):
    """(K, Cout_pad) f32 weight/loc -> masked weight in the compute dtype.

    Tiled over Cout lanes so the one-shot kernel also fits v5e's small
    default scoped VMEM for production-size layers.
    """
    k, cout_pad = w2d.shape
    return pl.pallas_call(
        _l0_gate_kernel,
        out_shape=jax.ShapeDtypeStruct((k, cout_pad), compute_dtype),
        grid_spec=pltpu.PrefetchScalarGridSpec(
            num_scalar_prefetch=0,
            grid=(cout_pad // LANE,),
            in_specs=[pl.BlockSpec((k, LANE), lambda j: (0, j)),
                      pl.BlockSpec((k, LANE), lambda j: (0, j))],
            out_specs=pl.BlockSpec((k, LANE), lambda j: (0, j)),
        ),
        compiler_params=pltpu.CompilerParams(
            dimension_semantics=("parallel",),
            vmem_limit_bytes=_vmem_limit_bytes()),
    )(w2d, loc2d)


# ---------------------------------------------------------------------------
# 2a) Fused im2col + GEMM (stride == 1): one padded NHWC image per grid step.
#     KH*KW shifted (OH, OW, Cin) windows are read straight from the VMEM
#     block and accumulated in f32 on the MXU; the kernel emits (Cout, OH*OW)
#     so the output is already NCHW after a free reshape.
# ---------------------------------------------------------------------------
def _fused_conv_kernel(x_ref, w_ref, b_ref, o_ref, *, kh, kw, dil, oh, ow,
                       cout):
    cin = x_ref.shape[3]
    cout_pad = w_ref.shape[2]
    m = oh * ow
    acc = jnp.zeros((m, cout_pad), dtype=jnp.float32)
    for i in range(kh):                        # static unroll over the taps
        for j in range(kw):
            slab = x_ref[0, i * dil:i * dil + oh, j * dil:j * dil + ow, :]
            slab = slab.reshape(m, cin)        # OW is sublane-aligned (gated)
            acc = acc + jnp.dot(slab, w_ref[i * kw + j],
                                preferred_element_type=jnp.float32)
    acc = acc + b_ref[...]                     # f32 bias
    acc_t = acc.T                              # (Cout_pad, OH*OW), lane-dense
    o_ref[0] = acc_t[:cout, :].astype(o_ref.dtype)


def _conv_fused_stride1(x, w_masked2d, bias, *, kh, kw, padding, dilation,
                        oh, ow, cout, cout_pad, compute_dtype):
    n, cin, h, w = x.shape
    # NHWC + spatial zero-pad; cast to the compute dtype BEFORE padding so the
    # dominant activation stream into the kernel is already bf16.
    xp = jnp.pad(jnp.transpose(x, (0, 2, 3, 1)).astype(compute_dtype),
                 ((0, 0), (padding, padding), (padding, padding), (0, 0)))
    hp, wp = h + 2 * padding, w + 2 * padding
    wm = w_masked2d.reshape(kh * kw, cin, cout_pad)      # free split of K
    bias2d = jnp.pad(bias.reshape(1, cout).astype(jnp.float32),
                     ((0, 0), (0, cout_pad - cout)))

    kernel = functools.partial(_fused_conv_kernel, kh=kh, kw=kw, dil=dilation,
                               oh=oh, ow=ow, cout=cout)
    out = pl.pallas_call(
        kernel,
        out_shape=jax.ShapeDtypeStruct((n, cout, oh * ow), x.dtype),
        grid_spec=pltpu.PrefetchScalarGridSpec(
            num_scalar_prefetch=0,
            grid=(n,),                 # N >= 2 keeps both v7x TCs busy
            in_specs=[
                pl.BlockSpec((1, hp, wp, cin), lambda b: (b, 0, 0, 0)),
                # TODO(synk): pipeline_mode=pl.Buffered(1) on the two
                # grid-invariant operands below to single-buffer them (v7x
                # VMEM), and K/Cout grid axes + VMEM accumulator for
                # production-size layers / very large images.
                pl.BlockSpec((kh * kw, cin, cout_pad), lambda b: (0, 0, 0)),
                pl.BlockSpec((1, cout_pad), lambda b: (0, 0)),
            ],
            out_specs=pl.BlockSpec((1, cout, oh * ow), lambda b: (b, 0, 0)),
        ),
        compiler_params=pltpu.CompilerParams(
            dimension_semantics=("parallel",),
            vmem_limit_bytes=_vmem_limit_bytes()),
    )(xp, wm, bias2d)
    # (N, Cout, OH*OW) -> (N, Cout, OH, OW): free reshape, already NCHW.
    return out.reshape(n, cout, oh, ow)


# ---------------------------------------------------------------------------
# 2b) General-stride fallback: XLA im2col + tiled GEMM kernel.
#     TODO(synk): fuse im2col for stride > 1 as well (manual halo DMA).
# ---------------------------------------------------------------------------
def _gemm_bias_kernel(p_ref, wm_ref, b_ref, o_ref):
    acc = jnp.dot(p_ref[...], wm_ref[...], preferred_element_type=jnp.float32)
    o_ref[...] = (acc + b_ref[...]).astype(o_ref.dtype)


def _im2col(x, kh, kw, stride, padding, dilation):
    """(N,C,H,W) -> (N*OH*OW, KH*KW*C); columns ordered (kh, kw, c)."""
    n, c, h, w = x.shape
    xp = jnp.pad(x, ((0, 0), (0, 0), (padding, padding), (padding, padding)))
    oh = (h + 2 * padding - dilation * (kh - 1) - 1) // stride + 1
    ow = (w + 2 * padding - dilation * (kw - 1) - 1) // stride + 1
    cols = []
    for i in range(kh):
        for j in range(kw):
            hs, ws = i * dilation, j * dilation
            sl = xp[:, :, hs:hs + (oh - 1) * stride + 1:stride,
                          ws:ws + (ow - 1) * stride + 1:stride]   # (N,C,OH,OW)
            cols.append(jnp.transpose(sl, (0, 2, 3, 1)))          # (N,OH,OW,C)
    patches = jnp.concatenate(cols, axis=-1)                # (N,OH,OW,KH*KW*C)
    return patches.reshape(n * oh * ow, kh * kw * c), oh, ow


def _conv_gemm_fallback(x, w_masked2d, bias, *, kh, kw, stride, padding,
                        dilation, oh, ow, cout, cout_pad, compute_dtype):
    n = x.shape[0]
    k = w_masked2d.shape[0]
    patches, _, _ = _im2col(x.astype(compute_dtype), kh, kw, stride, padding,
                            dilation)
    m = patches.shape[0]
    k_pad = _round_up(k, LANE)
    # At least 2 grid steps (both v7x TensorCores), sublane-aligned M tile.
    block_m = max(8, min(512, _round_up(pl.cdiv(m, 2), 8)))
    m_pad = _round_up(m, block_m)
    patches_p = jnp.pad(patches, ((0, m_pad - m), (0, k_pad - k)))
    wm = jnp.pad(w_masked2d, ((0, k_pad - k), (0, 0)))
    bias2d = jnp.pad(bias.reshape(1, cout).astype(jnp.float32),
                     ((0, 0), (0, cout_pad - cout)))
    out2d = pl.pallas_call(
        _gemm_bias_kernel,
        out_shape=jax.ShapeDtypeStruct((m_pad, cout_pad), x.dtype),
        grid_spec=pltpu.PrefetchScalarGridSpec(
            num_scalar_prefetch=0,
            grid=(m_pad // block_m,),
            in_specs=[
                pl.BlockSpec((block_m, k_pad), lambda i: (i, 0)),
                pl.BlockSpec((k_pad, cout_pad), lambda i: (0, 0)),
                pl.BlockSpec((1, cout_pad), lambda i: (0, 0)),
            ],
            out_specs=pl.BlockSpec((block_m, cout_pad), lambda i: (i, 0)),
        ),
        compiler_params=pltpu.CompilerParams(
            dimension_semantics=("parallel",),
            vmem_limit_bytes=_vmem_limit_bytes()),
    )(patches_p, wm, bias2d)
    out2d = out2d[:m, :cout]
    return out2d.reshape(n, oh, ow, cout).transpose(0, 3, 1, 2)


# ---------------------------------------------------------------------------
# Public entry point (eval-mode L0Conv2d forward).
# ---------------------------------------------------------------------------
@functools.partial(jax.jit,
                   static_argnames=("stride", "padding", "dilation", "groups",
                                    "compute_dtype"))
def l0_conv2d_eval(x, weight, bias, loc, *, stride=1, padding=0, dilation=1,
                   groups=1, compute_dtype=jnp.bfloat16):
    """Eval-mode L0Conv2d forward.  Returns (conv in NCHW, penalty=0.0).

    compute_dtype is the MXU input dtype (bf16 default: native MXU path,
    halves the activation/weight DMA bytes); gate math, bias and the GEMM
    accumulation stay f32.
    """
    if groups != 1:
        # TODO(synk): grouped convolution is not implemented.
        raise NotImplementedError("groups != 1 is not supported")
    n, cin, h, w = x.shape
    cout = weight.shape[0]
    kh, kw = weight.shape[2], weight.shape[3]
    k = cin * kh * kw
    oh = (h + 2 * padding - dilation * (kh - 1) - 1) // stride + 1
    ow = (w + 2 * padding - dilation * (kw - 1) - 1) // stride + 1
    cout_pad = _round_up(cout, LANE)
    # TODO(synk): pad Cout / tile N to 256 on v6e/v7x once MXU-bound.
    if bias is None:
        bias = jnp.zeros((cout,), jnp.float32)

    # Weight/loc in (K, Cout_pad) GEMM layout, K ordered (kh, kw, c).
    w2d = jnp.transpose(weight, (2, 3, 1, 0)).reshape(k, cout)
    loc2d = jnp.transpose(loc, (2, 3, 1, 0)).reshape(k, cout)
    w2d = jnp.pad(w2d.astype(jnp.float32), ((0, 0), (0, cout_pad - cout)))
    loc2d = jnp.pad(loc2d.astype(jnp.float32), ((0, 0), (0, cout_pad - cout)))
    w_masked2d = _masked_weight(w2d, loc2d, compute_dtype)

    # Fused path needs stride 1 and a sublane-aligned OW so the in-kernel
    # (OH, OW, Cin) -> (OH*OW, Cin) reshape is layout-preserving.
    itemsize = np.dtype(compute_dtype).itemsize
    sub = max(8, 8 * (4 // max(1, itemsize)))
    if stride == 1 and ow % sub == 0:
        conv = _conv_fused_stride1(
            x, w_masked2d, bias, kh=kh, kw=kw, padding=padding,
            dilation=dilation, oh=oh, ow=ow, cout=cout, cout_pad=cout_pad,
            compute_dtype=compute_dtype)
    else:
        conv = _conv_gemm_fallback(
            x, w_masked2d, bias, kh=kh, kw=kw, stride=stride, padding=padding,
            dilation=dilation, oh=oh, ow=ow, cout=cout, cout_pad=cout_pad,
            compute_dtype=compute_dtype)

    # TODO(synk): training-mode stochastic gate (uniform-noise concrete
    # relaxation via pltpu.prng_*) and the L0 penalty are not implemented.
    penalty = jnp.float32(0.0)
    return conv, penalty


def _reference(x, weight, bias, loc, *, stride, padding, dilation):
    s = jax.nn.sigmoid(loc) * (ZETA - GAMMA) + GAMMA
    mask = jnp.clip(s, 0.0, 1.0)
    wm = weight * mask
    out = jax.lax.conv_general_dilated(
        x, wm, window_strides=(stride, stride),
        padding=[(padding, padding), (padding, padding)],
        rhs_dilation=(dilation, dilation),
        dimension_numbers=("NCHW", "OIHW", "NCHW"))
    return out + bias.reshape(1, -1, 1, 1)


if __name__ == "__main__":
    key = jax.random.PRNGKey(0)
    k_x, k_w, k_b, k_loc = jax.random.split(key, 4)

    # Small shapes consistent with nn.Conv2d(in=4, out=8, kernel=3, pad=1).
    N, Cin, H, W = 2, 4, 16, 16
    Cout, KH, KW = 8, 3, 3

    x = jax.random.normal(k_x, (N, Cin, H, W), dtype=jnp.float32)
    fan_in = Cin * KH * KW
    bound = 1.0 / (fan_in ** 0.5)
    weight = jax.random.uniform(k_w, (Cout, Cin, KH, KW), jnp.float32,
                                minval=-bound, maxval=bound)
    bias = jax.random.uniform(k_b, (Cout,), jnp.float32,
                              minval=-bound, maxval=bound)
    # loc ~ Normal(loc_mean=0, loc_sdev=0.01)
    loc = 0.01 * jax.random.normal(k_loc, (Cout, Cin, KH, KW), jnp.float32)

    # 1) Fused stride-1 path with the default bf16 MXU compute.
    conv, penalty = l0_conv2d_eval(x, weight, bias, loc,
                                   stride=1, padding=1, dilation=1)
    conv = jax.block_until_ready(conv)
    ref = _reference(x, weight, bias, loc, stride=1, padding=1, dilation=1)
    assert conv.shape == (N, Cout, H, W)
    # bf16 inputs to the MXU -> looser tolerance vs the f32 reference.
    assert jnp.allclose(conv, ref, atol=5e-2, rtol=5e-2), \
        float(jnp.max(jnp.abs(conv - ref)))
    assert float(penalty) == 0.0

    # 2) Fused path with f32 compute: tight check against the reference.
    conv32, _ = l0_conv2d_eval(x, weight, bias, loc, stride=1, padding=1,
                               dilation=1, compute_dtype=jnp.float32)
    conv32 = jax.block_until_ready(conv32)
    assert jnp.allclose(conv32, ref, atol=2e-4, rtol=2e-4), \
        float(jnp.max(jnp.abs(conv32 - ref)))

    # 3) General-stride fallback (im2col + GEMM), f32 compute.
    conv_s2, _ = l0_conv2d_eval(x, weight, bias, loc, stride=2, padding=0,
                                dilation=1, compute_dtype=jnp.float32)
    conv_s2 = jax.block_until_ready(conv_s2)
    ref_s2 = _reference(x, weight, bias, loc, stride=2, padding=0, dilation=1)
    assert conv_s2.shape == ref_s2.shape
    assert jnp.allclose(conv_s2, ref_s2, atol=2e-4, rtol=2e-4), \
        float(jnp.max(jnp.abs(conv_s2 - ref_s2)))

    print("KERNEL_OK")
</pallas_src>

<mosaic_0001>
module attributes {stable_mosaic.version = 11 : i64} {
  func.func @_l0_gate_kernel(%arg0: i32, %arg1: memref<36x128xf32, #tpu.memory_space<vmem>>, %arg2: memref<36x128xf32, #tpu.memory_space<vmem>>, %arg3: memref<36x128xbf16, #tpu.memory_space<vmem>>) attributes {dimension_semantics = [#tpu.dimension_semantics<parallel>], iteration_bounds = array<i64: 1>, scalar_prefetch = 0 : i64, scratch_operands = 0 : i64, tpu.core_type = #tpu.core_type<tc>, window_params = [{transform_indices = @transform_0, window_bounds = array<i64: 36, 128>}, {transform_indices = @transform_1, window_bounds = array<i64: 36, 128>}, {transform_indices = @transform_2, window_bounds = array<i64: 36, 128>}]} {
    %c0 = arith.constant 0 : index
    %c0_0 = arith.constant 0 : index
    %0 = vector.load %arg2[%c0, %c0_0] : memref<36x128xf32, #tpu.memory_space<vmem>>, vector<36x128xf32>
    %1 = arith.negf %0 : vector<36x128xf32>
    %2 = math.exp %1 : vector<36x128xf32>
    %cst = arith.constant 1.000000e+00 : f32
    %3 = vector.broadcast %cst : f32 to vector<36x128xf32>
    %4 = arith.addf %3, %2 : vector<36x128xf32>
    %5 = arith.divf %3, %4 : vector<36x128xf32>
    %cst_1 = arith.constant 1.200000e+00 : f32
    %6 = vector.broadcast %cst_1 : f32 to vector<36x128xf32>
    %7 = arith.mulf %5, %6 : vector<36x128xf32>
    %cst_2 = arith.constant -1.000000e-01 : f32
    %8 = vector.broadcast %cst_2 : f32 to vector<36x128xf32>
    %9 = arith.addf %7, %8 : vector<36x128xf32>
    %cst_3 = arith.constant 0.000000e+00 : f32
    %10 = vector.broadcast %cst_3 : f32 to vector<36x128xf32>
    %11 = arith.maximumf %9, %10 : vector<36x128xf32>
    %cst_4 = arith.constant 1.000000e+00 : f32
    %12 = vector.broadcast %cst_4 : f32 to vector<36x128xf32>
    %13 = arith.minimumf %11, %12 : vector<36x128xf32>
    %c0_5 = arith.constant 0 : index
    %c0_6 = arith.constant 0 : index
    %14 = vector.load %arg1[%c0_5, %c0_6] : memref<36x128xf32, #tpu.memory_space<vmem>>, vector<36x128xf32>
    %15 = arith.mulf %14, %13 : vector<36x128xf32>
    %16 = arith.truncf %15 : vector<36x128xf32> to vector<36x128xbf16>
    %c0_7 = arith.constant 0 : index
    %c0_8 = arith.constant 0 : index
    %17 = vector.load %arg3[%c0_7, %c0_8] : memref<36x128xbf16, #tpu.memory_space<vmem>>, vector<36x128xbf16>
    tpu.vector_store %arg3[%c0_7, %c0_8], %16 {strides = array<i32>} : memref<36x128xbf16, #tpu.memory_space<vmem>>, vector<36x128xbf16>,
    return
  }
  func.func @transform_0(%arg0: i32) -> (i32, i32) {
    %c0_i32 = arith.constant 0 : i32
    %c0_i32_0 = arith.constant 0 : i32
    return %c0_i32, %arg0 : i32, i32
  }
  func.func @transform_1(%arg0: i32) -> (i32, i32) {
    %c0_i32 = arith.constant 0 : i32
    %c0_i32_0 = arith.constant 0 : i32
    return %c0_i32, %arg0 : i32, i32
  }
  func.func @transform_2(%arg0: i32) -> (i32, i32) {
    %c0_i32 = arith.constant 0 : i32
    %c0_i32_0 = arith.constant 0 : i32
    return %c0_i32, %arg0 : i32, i32
  }
}

module attributes {stable_mosaic.version = 11 : i64} {
  func.func @_fused_conv_kernel(%arg0: i32, %arg1: memref<1x18x18x4xbf16, #tpu.memory_space<vmem>>, %arg2: memref<9x4x128xbf16, #tpu.memory_space<vmem>>, %arg3: memref<1x128xf32, #tpu.memory_space<vmem>>, %arg4: memref<1x8x256xf32, #tpu.memory_space<vmem>>) attributes {dimension_semantics = [#tpu.dimension_semantics<parallel>], iteration_bounds = array<i64: 2>, scalar_prefetch = 0 : i64, scratch_operands = 0 : i64, tpu.core_type = #tpu.core_type<tc>, window_params = [{transform_indices = @transform_0, window_bounds = array<i64: 1, 18, 18, 4>}, {pipeline_mode = #tpu.pipeline_mode<synchronous>, transform_indices = @transform_1, window_bounds = array<i64: 9, 4, 128>}, {pipeline_mode = #tpu.pipeline_mode<synchronous>, transform_indices = @transform_2, window_bounds = array<i64: 1, 128>}, {transform_indices = @transform_3, window_bounds = array<i64: 1, 8, 256>}]} {
    %cst = arith.constant 0.000000e+00 : f32
    %0 = vector.broadcast %cst : f32 to vector<256x128xf32>
    %c0 = arith.constant 0 : index
    %c0_0 = arith.constant 0 : index
    %c0_1 = arith.constant 0 : index
    %c0_2 = arith.constant 0 : index
    %1 = vector.load %arg1[%c0, %c0_0, %c0_1, %c0_2] : memref<1x18x18x4xbf16, #tpu.memory_space<vmem>>, vector<1x16x16x4xbf16>
    %2 = vector.shape_cast %1 : vector<1x16x16x4xbf16> to vector<16x16x4xbf16>
    %3 = vector.shape_cast %2 : vector<16x16x4xbf16> to vector<256x4xbf16>
    %c0_3 = arith.constant 0 : index
    %c0_4 = arith.constant 0 : index
    %c0_5 = arith.constant 0 : index
    %4 = vector.load %arg2[%c0_3, %c0_4, %c0_5] : memref<9x4x128xbf16, #tpu.memory_space<vmem>>, vector<1x4x128xbf16>
    %5 = vector.shape_cast %4 : vector<1x4x128xbf16> to vector<4x128xbf16>
    %cst_6 = arith.constant dense<0.000000e+00> : vector<256x128xf32>
    %6 = tpu.matmul %3, %5, %cst_6 {dimension_numbers = #tpu.dot_dimension_numbers<[1], [0], [0], [1], [0, 0, 1, 1], [], []>} : vector<256x4xbf16>, vector<4x128xbf16>, vector<256x128xf32> -> vector<256x128xf32>
    %7 = arith.addf %0, %6 : vector<256x128xf32>
    %c0_7 = arith.constant 0 : index
    %c0_8 = arith.constant 0 : index
    %c1 = arith.constant 1 : index
    %c0_9 = arith.constant 0 : index
    %8 = vector.load %arg1[%c0_7, %c0_8, %c1, %c0_9] : memref<1x18x18x4xbf16, #tpu.memory_space<vmem>>, vector<1x16x16x4xbf16>
    %9 = vector.shape_cast %8 : vector<1x16x16x4xbf16> to vector<16x16x4xbf16>
    %10 = vector.shape_cast %9 : vector<16x16x4xbf16> to vector<256x4xbf16>
    %c1_10 = arith.constant 1 : index
    %c0_11 = arith.constant 0 : index
    %c0_12 = arith.constant 0 : index
    %11 = vector.load %arg2[%c1_10, %c0_11, %c0_12] : memref<9x4x128xbf16, #tpu.memory_space<vmem>>, vector<1x4x128xbf16>
    %12 = vector.shape_cast %11 : vector<1x4x128xbf16> to vector<4x128xbf16>
    %cst_13 = arith.constant dense<0.000000e+00> : vector<256x128xf32>
    %13 = tpu.matmul %10, %12, %cst_13 {dimension_numbers = #tpu.dot_dimension_numbers<[1], [0], [0], [1], [0, 0, 1, 1], [], []>} : vector<256x4xbf16>, vector<4x128xbf16>, vector<256x128xf32> -> vector<256x128xf32>
    %14 = arith.addf %7, %13 : vector<256x128xf32>
    %c0_14 = arith.constant 0 : index
    %c0_15 = arith.constant 0 : index
    %c2 = arith.constant 2 : index
    %c0_16 = arith.constant 0 : index
    %15 = vector.load %arg1[%c0_14, %c0_15, %c2, %c0_16] : memref<1x18x18x4xbf16, #tpu.memory_space<vmem>>, vector<1x16x16x4xbf16>
    %16 = vector.shape_cast %15 : vector<1x16x16x4xbf16> to vector<16x16x4xbf16>
    %17 = vector.shape_cast %16 : vector<16x16x4xbf16> to vector<256x4xbf16>
    %c2_17 = arith.constant 2 : index
    %c0_18 = arith.constant 0 : index
    %c0_19 = arith.constant 0 : index
    %18 = vector.load %arg2[%c2_17, %c0_18, %c0_19] : memref<9x4x128xbf16, #tpu.memory_space<vmem>>, vector<1x4x128xbf16>
    %19 = vector.shape_cast %18 : vector<1x4x128xbf16> to vector<4x128xbf16>
    %cst_20 = arith.constant dense<0.000000e+00> : vector<256x128xf32>
    %20 = tpu.matmul %17, %19, %cst_20 {dimension_numbers = #tpu.dot_dimension_numbers<[1], [0], [0], [1], [0, 0, 1, 1], [], []>} : vector<256x4xbf16>, vector<4x128xbf16>, vector<256x128xf32> -> vector<256x128xf32>
    %21 = arith.addf %14, %20 : vector<256x128xf32>
    %c0_21 = arith.constant 0 : index
    %c1_22 = arith.constant 1 : index
    %c0_23 = arith.constant 0 : index
    %c0_24 = arith.constant 0 : index
    %22 = vector.load %arg1[%c0_21, %c1_22, %c0_23, %c0_24] : memref<1x18x18x4xbf16, #tpu.memory_space<vmem>>, vector<1x16x16x4xbf16>
    %23 = vector.shape_cast %22 : vector<1x16x16x4xbf16> to vector<16x16x4xbf16>
    %24 = vector.shape_cast %23 : vector<16x16x4xbf16> to vector<256x4xbf16>
    %c3 = arith.constant 3 : index
    %c0_25 = arith.constant 0 : index
    %c0_26 = arith.constant 0 : index
    %25 = vector.load %arg2[%c3, %c0_25, %c0_26] : memref<9x4x128xbf16, #tpu.memory_space<vmem>>, vector<1x4x128xbf16>
    %26 = vector.shape_cast %25 : vector<1x4x128xbf16> to vector<4x128xbf16>
    %cst_27 = arith.constant dense<0.000000e+00> : vector<256x128xf32>
    %27 = tpu.matmul %24, %26, %cst_27 {dimension_numbers = #tpu.dot_dimension_numbers<[1], [0], [0], [1], [0, 0, 1, 1], [], []>} : vector<256x4xbf16>, vector<4x128xbf16>, vector<256x128xf32> -> vector<256x128xf32>
    %28 = arith.addf %21, %27 : vector<256x128xf32>
    %c0_28 = arith.constant 0 : index
    %c1_29 = arith.constant 1 : index
    %c1_30 = arith.constant 1 : index
    %c0_31 = arith.constant 0 : index
    %29 = vector.load %arg1[%c0_28, %c1_29, %c1_30, %c0_31] : memref<1x18x18x4xbf16, #tpu.memory_space<vmem>>, vector<1x16x16x4xbf16>
    %30 = vector.shape_cast %29 : vector<1x16x16x4xbf16> to vector<16x16x4xbf16>
    %31 = vector.shape_cast %30 : vector<16x16x4xbf16> to vector<256x4xbf16>
    %c4 = arith.constant 4 : index
    %c0_32 = arith.constant 0 : index
    %c0_33 = arith.constant 0 : index
    %32 = vector.load %arg2[%c4, %c0_32, %c0_33] : memref<9x4x128xbf16, #tpu.memory_space<vmem>>, vector<1x4x128xbf16>
    %33 = vector.shape_cast %32 : vector<1x4x128xbf16> to vector<4x128xbf16>
    %cst_34 = arith.constant dense<0.000000e+00> : vector<256x128xf32>
    %34 = tpu.matmul %31, %33, %cst_34 {dimension_numbers = #tpu.dot_dimension_numbers<[1], [0], [0], [1], [0, 0, 1, 1], [], []>} : vector<256x4xbf16>, vector<4x128xbf16>, vector<256x128xf32> -> vector<256x128xf32>
    %35 = arith.addf %28, %34 : vector<256x128xf32>
    %c0_35 = arith.constant 0 : index
    %c1_36 = arith.constant 1 : index
    %c2_37 = arith.constant 2 : index
    %c0_38 = arith.constant 0 : index
    %36 = vector.load %arg1[%c0_35, %c1_36, %c2_37, %c0_38] : memref<1x18x18x4xbf16, #tpu.memory_space<vmem>>, vector<1x16x16x4xbf16>
    %37 = vector.shape_cast %36 : vector<1x16x16x4xbf16> to vector<16x16x4xbf16>
    %38 = vector.shape_cast %37 : vector<16x16x4xbf16> to vector<256x4xbf16>
    %c5 = arith.constant 5 : index
    %c0_39 = arith.constant 0 : index
    %c0_40 = arith.constant 0 : index
    %39 = vector.load %arg2[%c5, %c0_39, %c0_40] : memref<9x4x128xbf16, #tpu.memory_space<vmem>>, vector<1x4x128xbf16>
    %40 = vector.shape_cast %39 : vector<1x4x128xbf16> to vector<4x128xbf16>
    %cst_41 = arith.constant dense<0.000000e+00> : vector<256x128xf32>
    %41 = tpu.matmul %38, %40, %cst_41 {dimension_numbers = #tpu.dot_dimension_numbers<[1], [0], [0], [1], [0, 0, 1, 1], [], []>} : vector<256x4xbf16>, vector<4x128xbf16>, vector<256x128xf32> -> vector<256x128xf32>
    %42 = arith.addf %35, %41 : vector<256x128xf32>
    %c0_42 = arith.constant 0 : index
    %c2_43 = arith.constant 2 : index
    %c0_44 = arith.constant 0 : index
    %c0_45 = arith.constant 0 : index
    %43 = vector.load %arg1[%c0_42, %c2_43, %c0_44, %c0_45] : memref<1x18x18x4xbf16, #tpu.memory_space<vmem>>, vector<1x16x16x4xbf16>
    %44 = vector.shape_cast %43 : vector<1x16x16x4xbf16> to vector<16x16x4xbf16>
    %45 = vector.shape_cast %44 : vector<16x16x4xbf16> to vector<256x4xbf16>
    %c6 = arith.constant 6 : index
    %c0_46 = arith.constant 0 : index
    %c0_47 = arith.constant 0 : index
    %46 = vector.load %arg2[%c6, %c0_46, %c0_47] : memref<9x4x128xbf16, #tpu.memory_space<vmem>>, vector<1x4x128xbf16>
    %47 = vector.shape_cast %46 : vector<1x4x128xbf16> to vector<4x128xbf16>
    %cst_48 = arith.constant dense<0.000000e+00> : vector<256x128xf32>
    %48 = tpu.matmul %45, %47, %cst_48 {dimension_numbers = #tpu.dot_dimension_numbers<[1], [0], [0], [1], [0, 0, 1, 1], [], []>} : vector<256x4xbf16>, vector<4x128xbf16>, vector<256x128xf32> -> vector<256x128xf32>
    %49 = arith.addf %42, %48 : vector<256x128xf32>
    %c0_49 = arith.constant 0 : index
    %c2_50 = arith.constant 2 : index
    %c1_51 = arith.constant 1 : index
    %c0_52 = arith.constant 0 : index
    %50 = vector.load %arg1[%c0_49, %c2_50, %c1_51, %c0_52] : memref<1x18x18x4xbf16, #tpu.memory_space<vmem>>, vector<1x16x16x4xbf16>
    %51 = vector.shape_cast %50 : vector<1x16x16x4xbf16> to vector<16x16x4xbf16>
    %52 = vector.shape_cast %51 : vector<16x16x4xbf16> to vector<256x4xbf16>
    %c7 = arith.constant 7 : index
    %c0_53 = arith.constant 0 : index
    %c0_54 = arith.constant 0 : index
    %53 = vector.load %arg2[%c7, %c0_53, %c0_54] : memref<9x4x128xbf16, #tpu.memory_space<vmem>>, vector<1x4x128xbf16>
    %54 = vector.shape_cast %53 : vector<1x4x128xbf16> to vector<4x128xbf16>
    %cst_55 = arith.constant dense<0.000000e+00> : vector<256x128xf32>
    %55 = tpu.matmul %52, %54, %cst_55 {dimension_numbers = #tpu.dot_dimension_numbers<[1], [0], [0], [1], [0, 0, 1, 1], [], []>} : vector<256x4xbf16>, vector<4x128xbf16>, vector<256x128xf32> -> vector<256x128xf32>
    %56 = arith.addf %49, %55 : vector<256x128xf32>
    %c0_56 = arith.constant 0 : index
    %c2_57 = arith.constant 2 : index
    %c2_58 = arith.constant 2 : index
    %c0_59 = arith.constant 0 : index
    %57 = vector.load %arg1[%c0_56, %c2_57, %c2_58, %c0_59] : memref<1x18x18x4xbf16, #tpu.memory_space<vmem>>, vector<1x16x16x4xbf16>
    %58 = vector.shape_cast %57 : vector<1x16x16x4xbf16> to vector<16x16x4xbf16>
    %59 = vector.shape_cast %58 : vector<16x16x4xbf16> to vector<256x4xbf16>
    %c8 = arith.constant 8 : index
    %c0_60 = arith.constant 0 : index
    %c0_61 = arith.constant 0 : index
    %60 = vector.load %arg2[%c8, %c0_60, %c0_61] : memref<9x4x128xbf16, #tpu.memory_space<vmem>>, vector<1x4x128xbf16>
    %61 = vector.shape_cast %60 : vector<1x4x128xbf16> to vector<4x128xbf16>
    %cst_62 = arith.constant dense<0.000000e+00> : vector<256x128xf32>
    %62 = tpu.matmul %59, %61, %cst_62 {dimension_numbers = #tpu.dot_dimension_numbers<[1], [0], [0], [1], [0, 0, 1, 1], [], []>} : vector<256x4xbf16>, vector<4x128xbf16>, vector<256x128xf32> -> vector<256x128xf32>
    %63 = arith.addf %56, %62 : vector<256x128xf32>
    %c0_63 = arith.constant 0 : index
    %c0_64 = arith.constant 0 : index
    %64 = vector.load %arg3[%c0_63, %c0_64] : memref<1x128xf32, #tpu.memory_space<vmem>>, vector<1x128xf32>
    %65 = vector.broadcast %64 : vector<1x128xf32> to vector<256x128xf32>
    %66 = arith.addf %63, %65 : vector<256x128xf32>
    %67 = tpu.transpose %66, [1, 0] : vector<256x128xf32> -> vector<128x256xf32>
    %68 = vector.extract_strided_slice %67 {offsets = [0, 0], sizes = [8, 256], strides = [1, 1]} : vector<128x256xf32> to vector<8x256xf32>
    %c0_65 = arith.constant 0 : index
    %c0_66 = arith.constant 0 : index
    %c0_67 = arith.constant 0 : index
    %69 = vector.load %arg4[%c0_65, %c0_66, %c0_67] : memref<1x8x256xf32, #tpu.memory_space<vmem>>, vector<1x8x256xf32>
    %70 = vector.shape_cast %69 : vector<1x8x256xf32> to vector<8x256xf32>
    %71 = vector.shape_cast %68 : vector<8x256xf32> to vector<1x8x256xf32>
    tpu.vector_store %arg4[%c0_65, %c0_66, %c0_67], %71 {strides = array<i32>} : memref<1x8x256xf32, #tpu.memory_space<vmem>>, vector<1x8x256xf32>,
    return
  }
  func.func @transform_0(%arg0: i32) -> (i32, i32, i32, i32) {
    %c0_i32 = arith.constant 0 : i32
    %c0_i32_0 = arith.constant 0 : i32
    %c0_i32_1 = arith.constant 0 : i32
    %c0_i32_2 = arith.constant 0 : i32
    return %arg0, %c0_i32, %c0_i32_0, %c0_i32_1 : i32, i32, i32, i32
  }
  func.func @transform_1(%arg0: i32) -> (i32, i32, i32) {
    %c0_i32 = arith.constant 0 : i32
    %c0_i32_0 = arith.constant 0 : i32
    %c0_i32_1 = arith.constant 0 : i32
    %c0_i32_2 = arith.constant 0 : i32
    return %c0_i32, %c0_i32_0, %c0_i32_1 : i32, i32, i32
  }
  func.func @transform_2(%arg0: i32) -> (i32, i32) {
    %c0_i32 = arith.constant 0 : i32
    %c0_i32_0 = arith.constant 0 : i32
    %c0_i32_1 = arith.constant 0 : i32
    return %c0_i32, %c0_i32_0 : i32, i32
  }
  func.func @transform_3(%arg0: i32) -> (i32, i32, i32) {
    %c0_i32 = arith.constant 0 : i32
    %c0_i32_0 = arith.constant 0 : i32
    %c0_i32_1 = arith.constant 0 : i32
    return %arg0, %c0_i32, %c0_i32_0 : i32, i32, i32
  }
}

</mosaic_0001>

<bundles_post_ra>
// kernel: l0_conv2d_eval.2
= control target key start
LH: loop header
LB: loop body
LE: loop exit
PB: predicated region body
PF: predicated region fallthrough
CT: control target
= control target key end

     0   :  { %s206_s1 = inlined_call_operand.vmem [shape: f32[36,128], index: 1, kind: input, shape index: {}]   ;;  %s207_s0 = inlined_call_operand.vmem [shape: f32[36,128], index: 0, kind: input, shape index: {}]   ;;  %s208_s2 = inlined_call_operand.vmem [shape: bf16[36,128], index: 2, kind: output, shape index: {}]  }
   0x1   :  { %v11_v0 = vld [vmem:[%s206_s1] sm:$0xff]  ;;  %v12_v1 = vld [vmem:[%s206_s1 + $0x8] sm:$0xff]  ;;  %v13_v4 = vld [vmem:[%s206_s1 + $0x10] sm:$0xff] }
   0x2   :  { %v106_v2 = vmul.f32 -1.442695, %v11_v0  ;;  %v107_v3 = vmul.f32 -1.442695, %v12_v1  ;;  %v14_v5 = vld [vmem:[%s206_s1 + $0x18] sm:$0xff]  ;;  %v66_v35 = vld [vmem:[%s207_s0] sm:$0xff] }
   0x3   :  { %v108_v6 = vmul.f32 -1.442695, %v13_v4  ;;  %v109_v7 = vmul.f32 -1.442695, %v14_v5  ;;  %v15_v8 = vld [vmem:[%s206_s1 + $0x20] sm:$0xf] }
   0x4   :  { %132 = vpow2.f32 %v106_v2  ;;  %v110_v9 = vmul.f32 -1.442695, %v15_v8  ;;  %v67_v38 = vld [vmem:[%s207_s0 + $0x8] sm:$0xff]  ;;  %v68_v43 = vld [vmem:[%s207_s0 + $0x10] sm:$0xff]  ;;  %v69_v46 = vld [vmem:[%s207_s0 + $0x18] sm:$0xff] }
   0x5   :  { %134 = vpow2.f32 %v107_v3  ;;  %v70_v50 = vld [vmem:[%s207_s0 + $0x20] sm:$0xf] }
   0x6   :  { %136 = vpow2.f32 %v108_v6 }
   0x7   :  { %138 = vpow2.f32 %v109_v7 }
   0x8   :  { %140 = vpow2.f32 %v110_v9 }
   0xe   :  { %v133_v10 = vpop.eup %132 }
   0xf   :  { %v135_v11 = vpop.eup %134  ;;  %v31_v12 = vadd.f32 1.0, %v133_v10 }
  0x10   :  { %v137_v13 = vpop.eup %136  ;;  %v32_v14 = vadd.f32 1.0, %v135_v11 }
  0x11   :  { %v139_v15 = vpop.eup %138  ;;  %142 = vrcp.f32 %v31_v12  ;;  %v33_v16 = vadd.f32 1.0, %v137_v13 }
  0x12   :  { %v141_v17 = vpop.eup %140  ;;  %144 = vrcp.f32 %v32_v14  ;;  %v34_v18 = vadd.f32 1.0, %v139_v15 }
  0x13   :  { %146 = vrcp.f32 %v33_v16  ;;  %v35_v19 = vadd.f32 1.0, %v141_v17 }
  0x14   :  { %148 = vrcp.f32 %v34_v18 }
  0x15   :  { %150 = vrcp.f32 %v35_v19 }
  0x1b   :  { %v143_v20 = vpop.eup %142 }
  0x1c   :  { %v145_v21 = vpop.eup %144  ;;  %v46_v22 = vmul.f32 1.2, %v143_v20 }
  0x1d   :  { %v147_v23 = vpop.eup %146  ;;  %v47_v24 = vmul.f32 1.2, %v145_v21 }
  0x1e   :  { %v149_v25 = vpop.eup %148  ;;  %v51_v26 = vadd.f32 -0.1, %v46_v22  ;;  %v48_v27 = vmul.f32 1.2, %v147_v23 }
  0x1f   :  { %v151_v28 = vpop.eup %150  ;;  %v52_v29 = vadd.f32 -0.1, %v47_v24  ;;  %v49_v30 = vmul.f32 1.2, %v149_v25 }
  0x20   :  { %v56_v31 = vmax.f32 %v51_v26, 0.0  ;;  %v53_v32 = vadd.f32 -0.1, %v48_v27  ;;  %v50_v33 = vmul.f32 1.2, %v151_v28 }
  0x21   :  { %v57_v34 = vmax.f32 %v52_v29, 0.0  ;;  %v54_v36 = vadd.f32 -0.1, %v49_v30 }
  0x22   :  { %v61_v37 = vmin.f32 %v56_v31, 1.0  ;;  %v58_v39 = vmax.f32 %v53_v32, 0.0  ;;  %v55_v40 = vadd.f32 -0.1, %v50_v33 }
  0x23   :  { %v62_v41 = vmin.f32 %v57_v34, 1.0  ;;  %v59_v42 = vmax.f32 %v54_v36, 0.0 }
  0x24   :  { %v71_v44 = vmul.f32 %v66_v35, %v61_v37  ;;  %v63_v45 = vmin.f32 %v58_v39, 1.0  ;;  %v60_v47 = vmax.f32 %v55_v40, 0.0 }
  0x25   :  { %v72_v48 = vmul.f32 %v67_v38, %v62_v41  ;;  %v64_v49 = vmin.f32 %v59_v42, 1.0 }
  0x26   :  { %v73_v51 = vmul.f32 %v68_v43, %v63_v45  ;;  %v65_v52 = vmin.f32 %v60_v47, 1.0 }
  0x27   :  { %v124_v53 = vpack.c.bf16 %v72_v48, %v71_v44  ;;  %v74_v54 = vmul.f32 %v69_v46, %v64_v49 }
  0x28   :  { %v75_v55 = vmul.f32 %v70_v50, %v65_v52 }
  0x29   :  { %125 = vst [vmem:[%s208_s2] sm:$0xff] %v124_v53   ;;  %v129_v56 = vpack.c.bf16 %v74_v54, %v73_v51 }
  0x2a   :  { %v120_v57 = vpack.c.bf16 %v75_v55, %v75_v55 }
  0x2b   :  { %131 = vst [vmem:[%s208_s2 + $0x8] sm:$0xff] %v129_v56  }
  0x2c   :  { %101 = vst [vmem:[%s208_s2 + $0x10] sm:$0x3] %v120_v57 }

// kernel: l0_conv2d_eval.3
= control target key start
LH: loop header
LB: loop body
LE: loop exit
PB: predicated region body
PF: predicated region fallthrough
CT: control target
= control target key end

     0   :  { %s6308_s12 = smov 0   ;;  %s8072_s0 = inlined_call_operand.vmem [shape: bf16[2,18,18,4], index: 0, kind: input, shape index: {}]   ;;  %s8073_s1 = inlined_call_operand.vmem [shape: bf16[9,4,128], index: 1, kind: input, shape index: {}]   ;;  %s8074_s2 = inlined_call_operand.vmem [shape: f32[1,128], index: 2, kind: input, shape index: {}]   ;;  %s8075_s3 = inlined_call_operand.vmem [shape: f32[2,8,256], index: 3, kind: output, shape index: {}]  }
   0x1 LB: > { %s4891_s13 = sadd.s32 4294967295, %s6286_s12   ;;  %p4895_p0 = scmp.ge.s32.totalorder %s6286_s12, 1  ;;  %s6286_s12 = sphi %s6308_s12, %s13_s12  }
   0x2   : > { %p137_p1 = scmp.lt.s32.totalorder %s6286_s12, 3 }
   0x4   : > { %p138_p2 = pnand %p4895_p0, %p137_p1 }
   0x6   : > { %141 = sbr.rel (%p138_p2) target bundleno = 688 (0x2b0), region = 32 }
   0xd   : > { %v4899_v0 = vld [vmem:[%s8073_s1 + $0x2] sm:$0x3]  ;;  %vm707_vm0 = vcmask 1041408   ;;  %v5126_v1 = vld [vmem:[%s8073_s1 + $0x8] sm:$0x3]  ;;  %p161_p3 = scmp.lt.s32.totalorder %s4891_s13, 1 }
   0xe   : > { %6156 = vmatprep.subr.msk.bf16.mxu1 %vm707_vm0, %v4899_v0  ;;  %6160 = vmatprep.subr.msk.bf16.mxu0 %vm707_vm0, %v5126_v1  ;;  %v709_v2 = vsel %vm707_vm0, %v4899_v0, 0  ;;  %v6326_v3 = vsel %vm707_vm0, %v5126_v1, 0  ;;  %v204_v4 = vld [vmem:[%s8073_s1] sm:$0x3]  ;;  %v5191_v5 = vld [vmem:[%s8073_s1 + $0xa] sm:$0x3] }
   0xf   : > { %8089 = vst [vmem:[#allocation2_spill] sm:$0xff] %v6326_v3  ;;  %5593 = vmatpush3.bf16.msra.mxu1 %v709_v2  ;;  %5729 = vmatpush3.bf16.msra.mxu0 %v6326_v3  ;;  %s8144_s13 = smov (!%p161_p3, %s4891_s13), 1  ;;  %vm221_vm1 = vsmask.f32 3328  ;;  %vm222_vm2 = vsmask.f32 7440 }
  0x10   : > { %6157 = vmatprep.subr.msk.bf16.mxu1 %vm707_vm0, %v204_v4  ;;  %6162 = vmatprep.subr.msk.bf16.mxu0 %vm707_vm0, %v5191_v5  ;;  %s6166_s22 = smul.u32 216, %s8144_s13  ;;  %vm658_vm3 = vcmask 31744   ;;  %v6356_v17 = vsel %vm707_vm0, %v204_v4, 0  ;;  %v6362_v26 = vld [vmem:[%s8073_s1 + $0xc] sm:$0x3]  ;;  %vm6369_vm4 = vmor %vm221_vm1, %vm222_vm2  ;;  %v6375_v37 = vsel %vm707_vm0, %v5191_v5, 0 }
  0x11   : > { %v6379_v41 = vsel %vm707_vm0, %v6362_v26, 0  ;;  %vm1212_vm5 = vcmask 1042432   ;;  %vm1213_vm6 = vcmask 1046532   ;;  %s5438_s17 = sshll.u32 %s8144_s13, 4 }
  0x12   : > { %s6343_s25 = scalar_lea.vmem %s8072_s0, %s6166_s22  ;;  %vm6595_vm7 = vmor %vm1212_vm5, %vm1213_vm6  ;;  %s170_s20 = scalar_lea.vmem %s8075_s3, %s5438_s17 }
  0x13   : > { %v172_v6 = vld [vmem:[%s6343_s25] sm:$0xf]  ;;  %v173_v7 = vld [vmem:[%s6343_s25 + $0x4] sm:$0xf]  ;;  %v205_v8 = vld [vmem:[%s6343_s25 + $0x8] sm:$0x1] }
  0x14   : > { %v225_v9 = vshrl.u32 %v172_v6, 16  ;;  %v228_v10 = vshll.u32 %v172_v6, 16  ;;  %v234_v11 = vshll.u32 %v173_v7, 16  ;;  %v238_v12 = vshrl.u32 %v173_v7, 16  ;;  %v5078_v13 = vld [vmem:[%s6343_s25 + $0xc] sm:$0xf] }
  0x15   : > { %v244_v14 = vshll.u32 %v205_v8, 16  ;;  %v6350_v15 = vld [vmem:[%s6343_s25 + $0x10] sm:$0xf]  ;;  %v6353_v16 = vld [vmem:[%s6343_s25 + $0x14] sm:$0x1]  ;;  %v2029_v23 = vshrl.u32 %v5078_v13, 16 }
  0x16   : > { %v227_v18 = vrot.slane %v225_v9, 4  ;;  %v230_v19 = vrot.slane %v228_v10, 5  ;;  %v236_v20 = vrot.slane %v234_v11, 5  ;;  %v240_v21 = vrot.slane %v238_v12, 4  ;;  %v174_v31 = vld [vmem:[%s6343_s25 + $0xc] sm:$0xf] }
  0x17   : > { %v246_v22 = vrot.slane %v244_v14, 5  ;;  %v2032_v24 = vshll.u32 %v5078_v13, 16  ;;  %v2038_v25 = vshll.u32 %v6350_v15, 16  ;;  %v2042_v29 = vshrl.u32 %v6350_v15, 16  ;;  %v175_v36 = vld [vmem:[%s6343_s25 + $0x10] sm:$0xf] }
  0x18   : > { %v231_v27 = vor.u32 %v230_v19, %v227_v18  ;;  %v241_v28 = vor.u32 %v240_v21, %v236_v20  ;;  %v2048_v30 = vshll.u32 %v6353_v16, 16  ;;  %v2031_v33 = vrot.slane %v2029_v23, 4  ;;  %v206_v44 = vld [vmem:[%s6343_s25 + $0x14] sm:$0x1]  ;;  %v5081_v55 = vld [vmem:[%s6343_s25 + $0x18] sm:$0xf] }
  0x19   : > { %v2034_v34 = vrot.slane %v2032_v24, 5  ;;  %v2040_v35 = vrot.slane %v2038_v25, 5  ;;  %v2044_v40 = vrot.slane %v2042_v29, 4  ;;  %v249_v45 = vshrl.u32 %v174_v31, 16  ;;  %v6388_v60 = vld [vmem:[%s6343_s25 + $0x1c] sm:$0xf] }
  0x1a   : > { %v232_v38 = vrot.slane %v231_v27, 4  ;;  %v242_v39 = vrot.slane %v241_v28, 4  ;;  %v2050_v43 = vrot.slane %v2048_v30, 5  ;;  %v252_v46 = vshll.u32 %v174_v31, 16  ;;  %v6396_v1 = vld [vmem:[%s6343_s25 + $0x20] sm:$0x1] }
  0x1b   : > { %v2035_v42 = vor.u32 %v2034_v34, %v2031_v33  ;;  %v2045_v49 = vor.u32 %v2044_v40, %v2040_v35  ;;  %v258_v50 = vshll.u32 %v175_v36, 16  ;;  %v251_v53 = vrot.slane %v249_v45, 4  ;;  %v176_v18 = vld [vmem:[%s6343_s25 + $0x18] sm:$0xf]  ;;  %v177_v23 = vld [vmem:[%s6343_s25 + $0x1c] sm:$0xf] }
  0x1c   : > { %v237_v47 = vsel %vm6369_vm4, %v232_v38, %v236_v20  ;;  %v247_v48 = vsel %vm6369_vm4, %v242_v39, %v246_v22  ;;  %v254_v54 = vrot.slane %v252_v46, 5  ;;  %v262_v58 = vshrl.u32 %v175_v36, 16  ;;  %v207_v31 = vld [vmem:[%s6343_s25 + $0x20] sm:$0x1]  ;;  %v5084_v40 = vld [vmem:[%s6343_s25 + $0x24] sm:$0xf] }
  0x1d   : > { %v4900_v51 = vcombine.low %v237_v47, %v247_v48  ;;  %v2036_v52 = vrot.slane %v2035_v42, 4  ;;  %v2046_v56 = vrot.slane %v2045_v49, 4  ;;  %v260_v57 = vrot.slane %v258_v50, 5  ;;  %v6419_v46 = vld [vmem:[%s6343_s25 + $0x28] sm:$0xf] }
  0x1e   : > { %v268_v59 = vshll.u32 %v206_v44, 16  ;;  %v2772_v62 = vrot.slane %v6350_v15, 5  ;;  %v2775_v63 = vrot.slane %v6353_v16, 5  ;;  %v255_v0 = vor.u32 %v254_v54, %v251_v53  ;;  %v6428_v54 = vld [vmem:[%s6343_s25 + $0x2c] sm:$0x1] }
  0x1f   : > { %5594 = vmatprep.mubr.msk.bf16.mxu1 %vm658_vm3, %v4900_v51  ;;  %v2041_v61 = vsel %vm6369_vm4, %v2036_v52, %v2040_v35  ;;  %v2051_v2 = vsel %vm6369_vm4, %v2046_v56, %v2050_v43  ;;  %v264_v4 = vrot.slane %v262_v58, 4  ;;  %v2053_v6 = vshrl.u32 %v5081_v55, 16  ;;  %v4980_v51 = vld [vmem:[%s8073_s1 + $0x4] sm:$0x3]  ;;  %v6628_v16 = vld [vmem:[%s6343_s25 + $0x7c] sm:$0xf] }
  0x20   : > { %v270_v5 = vrot.slane %v268_v59, 5  ;;  %v5127_v7 = vcombine.low %v2041_v61, %v2051_v2  ;;  %v256_v8 = vrot.slane %v255_v0, 4  ;;  %v2056_v9 = vshll.u32 %v5081_v55, 16  ;;  %v178_v0 = vld [vmem:[%s6343_s25 + $0x24] sm:$0xf] }
  0x21   : > { %v2062_v10 = vshll.u32 %v6388_v60, 16  ;;  %v265_v11 = vor.u32 %v264_v4, %v260_v57  ;;  %v2055_v12 = vrot.slane %v2053_v6, 4  ;;  %v2066_v13 = vshrl.u32 %v6388_v60, 16 }
  0x22   : > { %v2072_v14 = vshll.u32 %v6396_v1, 16  ;;  %5730 = vmatprep.mubr.msk.bf16.mxu0 %vm658_vm3, %v5127_v7  ;;  %v261_v19 = vsel %vm6369_vm4, %v256_v8, %v260_v57  ;;  %v2058_v20 = vrot.slane %v2056_v9, 5  ;;  %v2779_v22 = vrot.slane %v6388_v60, 5  ;;  %v179_v7 = vld [vmem:[%s6343_s25 + $0x28] sm:$0xf] }
  0x23   : > { %v2064_v21 = vrot.slane %v2062_v10, 5  ;;  %v266_v24 = vrot.slane %v265_v11, 4  ;;  %v2068_v25 = vrot.slane %v2066_v13, 4  ;;  %v2782_v28 = vrot.slane %v6396_v1, 5  ;;  %v208_v13 = vld [vmem:[%s6343_s25 + $0x2c] sm:$0x1] }
  0x24   : > { %v2074_v27 = vrot.slane %v2072_v14, 5  ;;  %v2059_v29 = vor.u32 %v2058_v20, %v2055_v12  ;;  %v6412_v30 = vrot.slane %v2779_v22, 4  ;;  %v273_v33 = vshrl.u32 %v176_v18, 16 }
  0x25   : > { %v276_v34 = vshll.u32 %v176_v18, 16  ;;  %v271_v35 = vsel %vm6369_vm4, %v266_v24, %v270_v5  ;;  %v2069_v36 = vor.u32 %v2068_v25, %v2064_v21  ;;  %v282_v38 = vshll.u32 %v177_v23, 16  ;;  %v5087_v24 = vld [vmem:[%s6343_s25 + $0x30] sm:$0xf] }
  0x26   : > { %v286_v39 = vshrl.u32 %v177_v23, 16  ;;  %v4901_v42 = vcombine.low %v261_v19, %v271_v35  ;;  %v2060_v43 = vrot.slane %v2059_v29, 4  ;;  %v275_v44 = vrot.slane %v273_v33, 4  ;;  %v6448_v33 = vld [vmem:[%s6343_s25 + $0x34] sm:$0xf] }
  0x27   : > { %v278_v45 = vrot.slane %v276_v34, 5  ;;  %v2070_v47 = vrot.slane %v2069_v36, 4  ;;  %v284_v48 = vrot.slane %v282_v38, 5  ;;  %v292_v50 = vshll.u32 %v207_v31, 16 }
  0x28   : > { %v288_v49 = vrot.slane %v286_v39, 4  ;;  %5595 = vmatmul.mubr.msk.bf16.vlgmr.msra.gmra.mrb[0].mxu1 %vm658_vm3, %v4901_v42  ;;  %v2065_v52 = vsel %vm6369_vm4, %v2060_v43, %v2064_v21  ;;  %v2077_v55 = vshrl.u32 %v5084_v40, 16  ;;  %v2080_v56 = vshll.u32 %v5084_v40, 16  ;;  %v6456_v40 = vld [vmem:[%s6343_s25 + $0x38] sm:$0x1] }
  0x29   : > { %v279_v53 = vor.u32 %v278_v45, %v275_v44  ;;  %5627 = vmatpush3.bf16.msra.mxu1 %v6356_v17  ;;  %v2075_v57 = vsel %vm6369_vm4, %v2070_v47, %v2074_v27  ;;  %v294_v59 = vrot.slane %v292_v50, 5  ;;  %v2086_v61 = vshll.u32 %v6419_v46, 16 }
  0x2a   : > { %v289_v58 = vor.u32 %v288_v49, %v284_v48  ;;  %v5128_v2 = vcombine.low %v2065_v52, %v2075_v57  ;;  %v2079_v5 = vrot.slane %v2077_v55, 4  ;;  %v2082_v6 = vrot.slane %v2080_v56, 5  ;;  %6158 = vmatprep.subr.msk.bf16.mxu1 %vm707_vm0, %v4980_v51  ;;  %v180_v52 = vld [vmem:[%s6343_s25 + $0x30] sm:$0xf] }
  0x2b   : > { %v280_v4 = vrot.slane %v279_v53, 4  ;;  %v2088_v9 = vrot.slane %v2086_v61, 5  ;;  %v2090_v17 = vshrl.u32 %v6419_v46, 16  ;;  %v2096_v10 = vshll.u32 %v6428_v54, 16 }
  0x2c   : > { %v290_v8 = vrot.slane %v289_v58, 4  ;;  %5731 = vmatmul.mubr.msk.bf16.vlgmr.msra.gmra.mrb[0].mxu0 %vm658_vm3, %v5128_v2  ;;  %v2083_v12 = vor.u32 %v2082_v6, %v2079_v5  ;;  %v297_v14 = vshrl.u32 %v178_v0, 16  ;;  %v300_v18 = vshll.u32 %v178_v0, 16  ;;  %v181_v58 = vld [vmem:[%s6343_s25 + $0x34] sm:$0xf] }
  0x2d   : > { %v285_v11 = vsel %vm6369_vm4, %v280_v4, %v284_v48  ;;  %5763 = vmatpush3.bf16.msra.mxu0 %v6375_v37  ;;  %v2092_v20 = vrot.slane %v2090_v17, 4  ;;  %v2098_v21 = vrot.slane %v2096_v10, 5  ;;  %v306_v23 = vshll.u32 %v179_v7, 16  ;;  %v209_v4 = vld [vmem:[%s6343_s25 + $0x38] sm:$0x1] }
  0x2e   : > { %v295_v19 = vsel %vm6369_vm4, %v290_v8, %v294_v59  ;;  %v2084_v27 = vrot.slane %v2083_v12, 4  ;;  %v299_v29 = vrot.slane %v297_v14, 4  ;;  %v302_v31 = vrot.slane %v300_v18, 5  ;;  %6163 = vmatprep.subr.msk.bf16.mxu0 %vm707_vm0, %v6362_v26  ;;  %v5090_v12 = vld [vmem:[%s6343_s25 + $0x3c] sm:$0xf] }
  0x2f   : > { %v4902_v25 = vcombine.low %v285_v11, %v295_v19  ;;  %v2093_v34 = vor.u32 %v2092_v20, %v2088_v9  ;;  %v308_v35 = vrot.slane %v306_v23, 5  ;;  %v310_v37 = vshrl.u32 %v179_v7, 16  ;;  %v6473_v20 = vld [vmem:[%s6343_s25 + $0x40] sm:$0xf] }
  0x30   : > { %v316_v36 = vshll.u32 %v208_v13, 16  ;;  %v2089_v38 = vsel %vm6369_vm4, %v2084_v27, %v2088_v9  ;;  %v303_v39 = vor.u32 %v302_v31, %v299_v29  ;;  %v2101_v42 = vshrl.u32 %v5087_v24, 16 }
  0x31   : > { %5598 = vmatprep.mubr.msk.bf16.mxu1 %vm658_vm3, %v4902_v25  ;;  %v2104_v43 = vshll.u32 %v5087_v24, 16  ;;  %v2094_v44 = vrot.slane %v2093_v34, 4  ;;  %v312_v45 = vrot.slane %v310_v37, 4  ;;  %v2110_v26 = vshll.u32 %v6448_v33, 16  ;;  %v6478_v34 = vld [vmem:[%s6343_s25 + $0x44] sm:$0x1] }
  0x32   : > { %v318_v47 = vrot.slane %v316_v36, 5  ;;  %v304_v48 = vrot.slane %v303_v39, 4  ;;  %v2103_v49 = vrot.slane %v2101_v42, 4  ;;  %v2114_v51 = vshrl.u32 %v6448_v33, 16  ;;  %v182_v42 = vld [vmem:[%s6343_s25 + $0x3c] sm:$0xf] }
  0x33   : > { %v2106_v50 = vrot.slane %v2104_v43, 5  ;;  %v2099_v53 = vsel %vm6369_vm4, %v2094_v44, %v2098_v21  ;;  %v313_v55 = vor.u32 %v312_v45, %v308_v35  ;;  %v2112_v56 = vrot.slane %v2110_v26, 5  ;;  %v183_v26 = vld [vmem:[%s6343_s25 + $0x40] sm:$0xf] }
  0x34   : > { %v2120_v57 = vshll.u32 %v6456_v40, 16  ;;  %v5129_v59 = vcombine.low %v2089_v38, %v2099_v53  ;;  %v309_v61 = vsel %vm6369_vm4, %v304_v48, %v308_v35  ;;  %v2116_v2 = vrot.slane %v2114_v51, 4 }
  0x35   : > { %v2107_v0 = vor.u32 %v2106_v50, %v2103_v49  ;;  %v314_v5 = vrot.slane %v313_v55, 4  ;;  %v321_v7 = vshrl.u32 %v180_v52, 16  ;;  %v324_v8 = vshll.u32 %v180_v52, 16 }
  0x36   : > { %v2122_v6 = vrot.slane %v2120_v57, 5  ;;  %5734 = vmatprep.mubr.msk.bf16.mxu0 %vm658_vm3, %v5129_v59  ;;  %v2117_v17 = vor.u32 %v2116_v2, %v2112_v56  ;;  %v330_v10 = vshll.u32 %v181_v58, 16  ;;  %v334_v11 = vshrl.u32 %v181_v58, 16  ;;  %v5093_v2 = vld [vmem:[%s6343_s25 + $0x48] sm:$0xf] }
  0x37   : > { %v2108_v9 = vrot.slane %v2107_v0, 4  ;;  %v319_v13 = vsel %vm6369_vm4, %v314_v5, %v318_v47  ;;  %v323_v14 = vrot.slane %v321_v7, 4  ;;  %v326_v18 = vrot.slane %v324_v8, 5  ;;  %v6496_v8 = vld [vmem:[%s6343_s25 + $0x4c] sm:$0xf] }
  0x38   : > { %v340_v19 = vshll.u32 %v209_v4, 16  ;;  %v4903_v21 = vcombine.low %v309_v61, %v319_v13  ;;  %v2118_v24 = vrot.slane %v2117_v17, 4  ;;  %v332_v25 = vrot.slane %v330_v10, 5  ;;  %v210_v61 = vld [vmem:[%s6343_s25 + $0x44] sm:$0x1] }
  0x39   : > { %v2113_v23 = vsel %vm6369_vm4, %v2108_v9, %v2112_v56  ;;  %v327_v27 = vor.u32 %v326_v18, %v323_v14  ;;  %v336_v29 = vrot.slane %v334_v11, 4  ;;  %v2125_v35 = vshrl.u32 %v5090_v12, 16 }
  0x3a   : > { %v342_v31 = vrot.slane %v340_v19, 5  ;;  %5599 = vmatmul.mubr.msk.bf16.gmra.mrb[4].mxu1 %vm658_vm3, %v4903_v21  ;;  %v2123_v37 = vsel %vm6369_vm4, %v2118_v24, %v2122_v6  ;;  %v2128_v36 = vshll.u32 %v5090_v12, 16  ;;  %v2134_v38 = vshll.u32 %v6473_v20, 16 }
  0x3b   : > { %v2138_v39 = vshrl.u32 %v6473_v20, 16  ;;  %v5130_v43 = vcombine.low %v2113_v23, %v2123_v37  ;;  %v328_v44 = vrot.slane %v327_v27, 4  ;;  %v337_v45 = vor.u32 %v336_v29, %v332_v25  ;;  %v6504_v23 = vld [vmem:[%s6343_s25 + $0x50] sm:$0x1]  ;;  %v6508_v27 = vld [vmem:[%s6343_s25 + $0x48] sm:$0xf] }
  0x3c   : > { %v2127_v47 = vrot.slane %v2125_v35, 4  ;;  %v2130_v48 = vrot.slane %v2128_v36, 5  ;;  %v2136_v49 = vrot.slane %v2134_v38, 5  ;;  %v2144_v51 = vshll.u32 %v6478_v34, 16  ;;  %v6511_v36 = vld [vmem:[%s6343_s25 + $0x4c] sm:$0xf] }
  0x3d   : > { %v2140_v50 = vrot.slane %v2138_v39, 4  ;;  %5735 = vmatmul.mubr.msk.bf16.gmra.mrb[4].mxu0 %vm658_vm3, %v5130_v43  ;;  %v333_v52 = vsel %vm6369_vm4, %v328_v44, %v332_v25  ;;  %v338_v53 = vrot.slane %v337_v45, 4  ;;  %v345_v55 = vshrl.u32 %v182_v42, 16 }
  0x3e   : > { %v348_v56 = vshll.u32 %v182_v42, 16  ;;  %v2131_v57 = vor.u32 %v2130_v48, %v2127_v47  ;;  %v2146_v59 = vrot.slane %v2144_v51, 5  ;;  %v354_v0 = vshll.u32 %v183_v26, 16 }
  0x3f   : > { %v2141_v58 = vor.u32 %v2140_v50, %v2136_v49  ;;  %v343_v4 = vsel %vm6369_vm4, %v338_v53, %v342_v31  ;;  %v347_v5 = vrot.slane %v345_v55, 4  ;;  %v358_v7 = vshrl.u32 %v183_v26, 16  ;;  %v211_v26 = vld [vmem:[%s6343_s25 + $0x50] sm:$0x1]  ;;  %v5096_v53 = vld [vmem:[%s6343_s25 + $0x54] sm:$0xf] }
  0x40   : > { %v350_v6 = vrot.slane %v348_v56, 5  ;;  %v4904_v9 = vcombine.low %v333_v52, %v343_v4  ;;  %v2132_v17 = vrot.slane %v2131_v57, 4  ;;  %v356_v11 = vrot.slane %v354_v0, 5  ;;  %v6527_v4 = vld [vmem:[%s6343_s25 + $0x58] sm:$0xf] }
  0x41   : > { %v2142_v10 = vrot.slane %v2141_v58, 4  ;;  %v360_v13 = vrot.slane %v358_v7, 4  ;;  %v364_v14 = vshll.u32 %v210_v61, 16  ;;  %v2149_v18 = vshrl.u32 %v5093_v2, 16 }
  0x42   : > { %v351_v12 = vor.u32 %v350_v6, %v347_v5  ;;  %5602 = vmatprep.mubr.msk.bf16.mxu1 %vm658_vm3, %v4904_v9  ;;  %v2137_v19 = vsel %vm6369_vm4, %v2132_v17, %v2136_v49  ;;  %v2152_v24 = vshll.u32 %v5093_v2, 16  ;;  %v2158_v25 = vshll.u32 %v6496_v8, 16 }
  0x43   : > { %v2147_v21 = vsel %vm6369_vm4, %v2142_v10, %v2146_v59  ;;  %v361_v35 = vor.u32 %v360_v13, %v356_v11  ;;  %v366_v37 = vrot.slane %v364_v14, 5  ;;  %v2151_v38 = vrot.slane %v2149_v18, 4 }
  0x44   : > { %v5131_v29 = vcombine.low %v2137_v19, %v2147_v21  ;;  %v352_v31 = vrot.slane %v351_v12, 4  ;;  %v2154_v39 = vrot.slane %v2152_v24, 5  ;;  %v2160_v42 = vrot.slane %v2158_v25, 5  ;;  %v6533_v12 = vld [vmem:[%s6343_s25 + $0x5c] sm:$0x1] }
  0x45   : > { %v2162_v43 = vshrl.u32 %v6496_v8, 16  ;;  %v362_v45 = vrot.slane %v361_v35, 4  ;;  %v2168_v47 = vshll.u32 %v6504_v23, 16  ;;  %v369_v48 = vshrl.u32 %v6508_v27, 16  ;;  %v6537_v24 = vld [vmem:[%s6343_s25 + $0x54] sm:$0xf] }
  0x46   : > { %5738 = vmatprep.mubr.msk.bf16.mxu0 %vm658_vm3, %v5131_v29  ;;  %v357_v44 = vsel %vm6369_vm4, %v352_v31, %v356_v11  ;;  %v2155_v49 = vor.u32 %v2154_v39, %v2151_v38  ;;  %v372_v51 = vshll.u32 %v6508_v27, 16  ;;  %v378_v52 = vshll.u32 %v6511_v36, 16 }
  0x47   : > { %v2164_v50 = vrot.slane %v2162_v43, 4  ;;  %v367_v55 = vsel %vm6369_vm4, %v362_v45, %v366_v37  ;;  %v2170_v56 = vrot.slane %v2168_v47, 5  ;;  %v371_v57 = vrot.slane %v369_v48, 4  ;;  %v6543_v37 = vld [vmem:[%s6343_s25 + $0x58] sm:$0xf] }
  0x48   : > { %v382_v58 = vshrl.u32 %v6511_v36, 16  ;;  %v4905_v59 = vcombine.low %v357_v44, %v367_v55  ;;  %v2156_v61 = vrot.slane %v2155_v49, 4  ;;  %v374_v2 = vrot.slane %v372_v51, 5 }
  0x49   : > { %v2165_v0 = vor.u32 %v2164_v50, %v2160_v42  ;;  %v380_v5 = vrot.slane %v378_v52, 5  ;;  %v388_v7 = vshll.u32 %v211_v26, 16  ;;  %v2173_v9 = vshrl.u32 %v5096_v53, 16  ;;  %v212_v26 = vld [vmem:[%s6343_s25 + $0x5c] sm:$0x1] }
  0x4a   : > { %v384_v6 = vrot.slane %v382_v58, 4  ;;  %5603 = vmatmul.mubr.msk.bf16.gmra.mrb[8].mxu1 %vm658_vm3, %v4905_v59  ;;  %v2161_v17 = vsel %vm6369_vm4, %v2156_v61, %v2160_v42  ;;  %v375_v11 = vor.u32 %v374_v2, %v371_v57  ;;  %v2176_v13 = vshll.u32 %v5096_v53, 16  ;;  %v5099_v53 = vld [vmem:[%s6343_s25 + $0x60] sm:$0xf]  ;;  %v6557_v59 = vld [vmem:[%s6343_s25 + $0x64] sm:$0xf] }
  0x4b   : > { %v2166_v10 = vrot.slane %v2165_v0, 4  ;;  %v390_v18 = vrot.slane %v388_v7, 5  ;;  %v2175_v19 = vrot.slane %v2173_v9, 4  ;;  %v2182_v21 = vshll.u32 %v6527_v4, 16  ;;  %v6564_v9 = vld [vmem:[%s6343_s25 + $0x68] sm:$0x1] }
  0x4c   : > { %v385_v14 = vor.u32 %v384_v6, %v380_v5  ;;  %v376_v29 = vrot.slane %v375_v11, 4  ;;  %v2178_v31 = vrot.slane %v2176_v13, 5  ;;  %v2186_v35 = vshrl.u32 %v6527_v4, 16 }
  0x4d   : > { %v2171_v25 = vsel %vm6369_vm4, %v2166_v10, %v2170_v56  ;;  %v2184_v42 = vrot.slane %v2182_v21, 5  ;;  %v2192_v43 = vshll.u32 %v6533_v12, 16  ;;  %v393_v48 = vshrl.u32 %v6537_v24, 16 }
  0x4e   : > { %v5132_v38 = vcombine.low %v2161_v17, %v2171_v25  ;;  %v386_v39 = vrot.slane %v385_v14, 4  ;;  %v381_v44 = vsel %vm6369_vm4, %v376_v29, %v380_v5  ;;  %v2179_v45 = vor.u32 %v2178_v31, %v2175_v19  ;;  %v6568_v19 = vld [vmem:[%s6343_s25 + $0x60] sm:$0xf] }
  0x4f   : > { %v2188_v47 = vrot.slane %v2186_v35, 4  ;;  %v2194_v50 = vrot.slane %v2192_v43, 5  ;;  %v396_v51 = vshll.u32 %v6537_v24, 16  ;;  %v402_v52 = vshll.u32 %v6543_v37, 16  ;;  %v6574_v35 = vld [vmem:[%s6343_s25 + $0x64] sm:$0xf] }
  0x50   : > { %5739 = vmatmul.mubr.msk.bf16.gmra.mrb[8].mxu0 %vm658_vm3, %v5132_v38  ;;  %v391_v49 = vsel %vm6369_vm4, %v386_v39, %v390_v18  ;;  %v2180_v56 = vrot.slane %v2179_v45, 4  ;;  %v395_v58 = vrot.slane %v393_v48, 4  ;;  %v406_v2 = vshrl.u32 %v6543_v37, 16 }
  0x51   : > { %v4906_v55 = vcombine.low %v381_v44, %v391_v49  ;;  %v2189_v57 = vor.u32 %v2188_v47, %v2184_v42  ;;  %v398_v61 = vrot.slane %v396_v51, 5  ;;  %v404_v0 = vrot.slane %v402_v52, 5 }
  0x52   : > { %v412_v5 = vshll.u32 %v212_v26, 16  ;;  %v2185_v6 = vsel %vm6369_vm4, %v2180_v56, %v2184_v42  ;;  %v2197_v17 = vshrl.u32 %v5099_v53, 16  ;;  %v2200_v10 = vshll.u32 %v5099_v53, 16 }
  0x53   : > { %5606 = vmatprep.mubr.msk.bf16.mxu1 %vm658_vm3, %v4906_v55  ;;  %v2190_v7 = vrot.slane %v2189_v57, 4  ;;  %v399_v11 = vor.u32 %v398_v61, %v395_v58  ;;  %v408_v13 = vrot.slane %v406_v2, 4  ;;  %v2206_v18 = vshll.u32 %v6557_v59, 16  ;;  %v5159_v58 = vld [vmem:[%s6343_s25 + $0xc] sm:$0xe] }
  0x54   : > { %v414_v14 = vrot.slane %v412_v5, 5  ;;  %v2199_v25 = vrot.slane %v2197_v17, 4  ;;  %v2202_v29 = vrot.slane %v2200_v10, 5  ;;  %v2210_v31 = vshrl.u32 %v6557_v59, 16 }
  0x55   : > { %v2195_v21 = vsel %vm6369_vm4, %v2190_v7, %v2194_v50  ;;  %v400_v39 = vrot.slane %v399_v11, 4  ;;  %v409_v42 = vor.u32 %v408_v13, %v404_v0  ;;  %v2208_v43 = vrot.slane %v2206_v18, 5  ;;  %v213_v50 = vld [vmem:[%s6343_s25 + $0x68] sm:$0x1] }
  0x56   : > { %v5133_v38 = vcombine.low %v2185_v6, %v2195_v21  ;;  %v2203_v44 = vor.u32 %v2202_v29, %v2199_v25  ;;  %v2212_v45 = vrot.slane %v2210_v31, 4  ;;  %v2216_v47 = vshll.u32 %v6564_v9, 16  ;;  %v6602_v29 = vld [vmem:[%s6343_s25 + $0x70] sm:$0xf] }
  0x57   : > { %v417_v26 = vshrl.u32 %v6568_v19, 16  ;;  %v405_v48 = vsel %vm6369_vm4, %v400_v39, %v404_v0  ;;  %v410_v49 = vrot.slane %v409_v42, 4  ;;  %v420_v51 = vshll.u32 %v6568_v19, 16  ;;  %v6589_v0 = vld [vmem:[%s6343_s25 + $0x6c] sm:$0xf] }
  0x58   : > { %5742 = vmatprep.mubr.msk.bf16.mxu0 %vm658_vm3, %v5133_v38  ;;  %v426_v52 = vshll.u32 %v6574_v35, 16  ;;  %v2204_v53 = vrot.slane %v2203_v44, 4  ;;  %v2213_v55 = vor.u32 %v2212_v45, %v2208_v43  ;;  %v2218_v56 = vrot.slane %v2216_v47, 5 }
  0x59   : > { %v419_v57 = vrot.slane %v417_v26, 4  ;;  %v415_v61 = vsel %vm6369_vm4, %v410_v49, %v414_v14  ;;  %v422_v2 = vrot.slane %v420_v51, 5  ;;  %v430_v6 = vshrl.u32 %v6574_v35, 16  ;;  %v214_v26 = vld [vmem:[%s6343_s25 + $0x74] sm:$0x1] }
  0x5a   : > { %v428_v5 = vrot.slane %v426_v52, 5  ;;  %v4907_v7 = vcombine.low %v405_v48, %v415_v61  ;;  %v2209_v17 = vsel %vm6369_vm4, %v2204_v53, %v2208_v43  ;;  %v2214_v10 = vrot.slane %v2213_v55, 4  ;;  %v5160_v48 = vld [vmem:[%s6343_s25 + $0x18] sm:$0xe] }
  0x5b   : > { %v436_v11 = vshll.u32 %v213_v50, 16  ;;  %v423_v14 = vor.u32 %v422_v2, %v419_v57  ;;  %v432_v18 = vrot.slane %v430_v6, 4  ;;  %v5175_v21 = vrot.slane %v5159_v58, 9  ;;  %v6621_v53 = vld [vmem:[%s6343_s25 + $0x78] sm:$0xf] }
  0x5c   : > { %v2774_v25 = vrot.slane %v2772_v62, 4  ;;  %5607 = vmatmul.mubr.msk.bf16.gmra.mrb[12].mxu1 %vm658_vm3, %v4907_v7  ;;  %v2219_v31 = vsel %vm6369_vm4, %v2214_v10, %v2218_v56  ;;  %v441_v39 = vshrl.u32 %v6589_v0, 16  ;;  %v444_v42 = vshll.u32 %v6589_v0, 16  ;;  %v215_v57 = vld [vmem:[%s6343_s25 + $0x80] sm:$0x1] }
  0x5d   : > { %v438_v38 = vrot.slane %v436_v11, 5  ;;  %v5134_v43 = vcombine.low %v2209_v17, %v2219_v31  ;;  %v424_v44 = vrot.slane %v423_v14, 4  ;;  %v433_v45 = vor.u32 %v432_v18, %v428_v5  ;;  %v5161_v10 = vld [vmem:[%s6343_s25 + $0x24] sm:$0xe] }
  0x5e   : > { %v2773_v47 = vsel %vm6595_vm7, %v5175_v21, %v2772_v62  ;;  %v2776_v49 = vsel %vm6595_vm7, %v2774_v25, %v2775_v63  ;;  %v443_v50 = vrot.slane %v441_v39, 4  ;;  %v446_v51 = vrot.slane %v444_v42, 5  ;;  %v6647_v39 = vld [vmem:[%s6343_s25 + $0x84] sm:$0xf] }
  0x5f   : > { %v450_v52 = vshll.u32 %v6602_v29, 16  ;;  %5743 = vmatmul.mubr.msk.bf16.gmra.mrb[12].mxu0 %vm658_vm3, %v5134_v43  ;;  %v429_v15 = vsel %vm6369_vm4, %v424_v44, %v428_v5  ;;  %v434_v62 = vrot.slane %v433_v45, 4  ;;  %v5192_v55 = vcombine.low %v2773_v47, %v2776_v49  ;;  %v6655_v43 = vld [vmem:[%s6343_s25 + $0x88] sm:$0xf] }
  0x60   : > { %v454_v56 = vshrl.u32 %v6602_v29, 16  ;;  %v447_v63 = vor.u32 %v446_v51, %v443_v50  ;;  %v460_v61 = vshll.u32 %v214_v26, 16  ;;  %v5176_v2 = vrot.slane %v5160_v48, 9 }
  0x61   : > { %v452_v58 = vrot.slane %v450_v52, 5  ;;  %v439_v6 = vsel %vm6369_vm4, %v434_v62, %v438_v38  ;;  %5764 = vmatprep.mubr.msk.bf16.mxu0 %vm658_vm3, %v5192_v55  ;;  %v2783_v5 = vsel %vm6595_vm7, %v6412_v30, %v2782_v28  ;;  %v465_v17 = vshrl.u32 %v6621_v53, 16  ;;  %v216_v52 = vld [vmem:[%s6343_s25 + $0x8c] sm:$0x1] }
  0x62   : > { %v456_v7 = vrot.slane %v454_v56, 4  ;;  %v4908_v11 = vcombine.low %v429_v15, %v439_v6  ;;  %v448_v14 = vrot.slane %v447_v63, 4  ;;  %v462_v18 = vrot.slane %v460_v61, 5 }
  0x63   : > { %v2780_v21 = vsel %vm6595_vm7, %v5176_v2, %v2779_v22  ;;  %v467_v38 = vrot.slane %v465_v17, 4  ;;  %v468_v1 = vshll.u32 %v6621_v53, 16  ;;  %v474_v30 = vshll.u32 %v6628_v16, 16  ;;  %v6660_v22 = vld [vmem:[%s8073_s1 + $0xe] sm:$0x3] }
  0x64   : > { %v457_v25 = vor.u32 %v456_v7, %v452_v58  ;;  %v5193_v31 = vcombine.low %v2780_v21, %v2783_v5  ;;  %5610 = vmatprep.mubr.msk.bf16.mxu1 %vm658_vm3, %v4908_v11  ;;  %v453_v28 = vsel %vm6369_vm4, %v448_v14, %v452_v58  ;;  %v478_v60 = vshrl.u32 %v6628_v16, 16  ;;  %v6679_v5 = vld [vmem:[%s6343_s25 + $0x90] sm:$0xf] }
  0x65   : > { %v484_v42 = vshll.u32 %v215_v57, 16  ;;  %v470_v45 = vrot.slane %v468_v1, 5  ;;  %v5177_v47 = vrot.slane %v5161_v10, 9  ;;  %v2786_v26 = vrot.slane %v6419_v46, 5  ;;  %v5162_v57 = vld [vmem:[%s6343_s25 + $0x30] sm:$0xe] }
  0x66   : > { %v458_v44 = vrot.slane %v457_v25, 4  ;;  %v476_v48 = vrot.slane %v474_v30, 5  ;;  %v480_v49 = vrot.slane %v478_v60, 4  ;;  %v2789_v51 = vrot.slane %v6428_v54, 5  ;;  %v6691_v30 = vld [vmem:[%s6343_s25 + $0x94] sm:$0xf] }
  0x67   : > { %v486_v50 = vrot.slane %v484_v42, 5  ;;  %5765 = vmatmul.mubr.msk.bf16.vlgmr.msra.gmra.mrb[0].mxu0 %vm658_vm3, %v5193_v31  ;;  %v471_v62 = vor.u32 %v470_v45, %v467_v38  ;;  %v2787_v55 = vsel %vm6595_vm7, %v5177_v47, %v2786_v26  ;;  %v2788_v56 = vrot.slane %v2786_v26, 4  ;;  %v217_v60 = vld [vmem:[%s6343_s25 + $0x98] sm:$0x1]  ;;  %v5163_v26 = vld [vmem:[%s6343_s25 + $0x3c] sm:$0xe] }
  0x68   : > { %v463_v15 = vsel %vm6369_vm4, %v458_v44, %v462_v18  ;;  %5797 = vmatpush3.bf16.msra.mxu0 %v6379_v41  ;;  %v481_v46 = vor.u32 %v480_v49, %v476_v48  ;;  %v489_v58 = vshrl.u32 %v6647_v39, 16  ;;  %v492_v54 = vshll.u32 %v6647_v39, 16 }
  0x69   : > { %v4909_v63 = vcombine.low %v453_v28, %v463_v15  ;;  %v472_v61 = vrot.slane %v471_v62, 4  ;;  %v2790_v2 = vsel %vm6595_vm7, %v2788_v56, %v2789_v51  ;;  %v498_v6 = vshll.u32 %v6655_v43, 16  ;;  %6164 = vmatprep.subr.msk.bf16.mxu0 %vm707_vm0, %v6660_v22 }
  0x6a   : > { %v502_v7 = vshrl.u32 %v6655_v43, 16  ;;  %v482_v41 = vrot.slane %v481_v46, 4  ;;  %v5194_v17 = vcombine.low %v2787_v55, %v2790_v2  ;;  %v491_v10 = vrot.slane %v489_v58, 4  ;;  %v6711_v46 = vld [vmem:[%s6343_s25 + $0xa0] sm:$0xf] }
  0x6b   : > { %5611 = vmatmul.mubr.msk.bf16.gmra.mrb[16].mxu1 %vm658_vm3, %v4909_v63  ;;  %v494_v11 = vrot.slane %v492_v54, 5  ;;  %v477_v14 = vsel %vm6369_vm4, %v472_v61, %v476_v48  ;;  %v500_v18 = vrot.slane %v498_v6, 5  ;;  %v508_v25 = vshll.u32 %v216_v52, 16  ;;  %v6700_v52 = vld [vmem:[%s6343_s25 + $0x9c] sm:$0xf] }
  0x6c   : > { %v504_v21 = vrot.slane %v502_v7, 4  ;;  %v487_v31 = vsel %vm6369_vm4, %v482_v41, %v486_v50  ;;  %5768 = vmatprep.mubr.msk.bf16.mxu0 %vm658_vm3, %v5194_v17  ;;  %v5178_v1 = vrot.slane %v5162_v57, 9  ;;  %v2793_v28 = vrot.slane %v6448_v33, 5 }
  0x6d   : > { %v495_v38 = vor.u32 %v494_v11, %v491_v10  ;;  %v4910_v42 = vcombine.low %v477_v14, %v487_v31  ;;  %v510_v45 = vrot.slane %v508_v25, 5  ;;  %v2796_v47 = vrot.slane %v6456_v40, 5  ;;  %v218_v10 = vld [vmem:[%s6343_s25 + $0xa4] sm:$0x1]  ;;  %v5164_v11 = vld [vmem:[%s6343_s25 + $0x48] sm:$0xe] }
  0x6e   : > { %v505_v44 = vor.u32 %v504_v21, %v500_v18  ;;  %v2794_v49 = vsel %vm6595_vm7, %v5178_v1, %v2793_v28  ;;  %v2795_v50 = vrot.slane %v2793_v28, 4  ;;  %v513_v51 = vshrl.u32 %v6679_v5, 16 }
  0x6f   : > { %v496_v48 = vrot.slane %v495_v38, 4  ;;  %5614 = vmatprep.mubr.msk.bf16.mxu1 %vm658_vm3, %v4910_v42  ;;  %v516_v15 = vshll.u32 %v6679_v5, 16  ;;  %v522_v62 = vshll.u32 %v6691_v30, 16  ;;  %v526_v40 = vshrl.u32 %v6691_v30, 16 }
  0x70   : > { %v506_v33 = vrot.slane %v505_v44, 4  ;;  %v2797_v56 = vsel %vm6595_vm7, %v2795_v50, %v2796_v47  ;;  %v515_v57 = vrot.slane %v513_v51, 4  ;;  %v532_v63 = vshll.u32 %v217_v60, 16 }
  0x71   : > { %v501_v55 = vsel %vm6369_vm4, %v496_v48, %v500_v18  ;;  %v5195_v54 = vcombine.low %v2794_v49, %v2797_v56  ;;  %v518_v61 = vrot.slane %v516_v15, 5  ;;  %v524_v2 = vrot.slane %v522_v62, 5  ;;  %v6737_v56 = vld [vmem:[%s6343_s25 + $0xac] sm:$0xf] }
  0x72   : > { %v511_v58 = vsel %vm6369_vm4, %v506_v33, %v510_v45  ;;  %v528_v7 = vrot.slane %v526_v40, 4  ;;  %v534_v41 = vrot.slane %v532_v63, 5  ;;  %v5179_v17 = vrot.slane %v5163_v26, 9  ;;  %v6732_v33 = vld [vmem:[%s6343_s25 + $0xa8] sm:$0xf] }
  0x73   : > { %v4911_v6 = vcombine.low %v501_v55, %v511_v58  ;;  %5769 = vmatmul.mubr.msk.bf16.gmra.mrb[4].mxu0 %vm658_vm3, %v5195_v54  ;;  %v519_v14 = vor.u32 %v518_v61, %v515_v57  ;;  %v2800_v18 = vrot.slane %v6473_v20, 5  ;;  %v2803_v21 = vrot.slane %v6478_v34, 5  ;;  %v219_v61 = vld [vmem:[%s6343_s25 + $0xb0] sm:$0x1] }
  0x74   : > { %v537_v25 = vshrl.u32 %v6700_v52, 16  ;;  %v529_v31 = vor.u32 %v528_v7, %v524_v2  ;;  %v540_v38 = vshll.u32 %v6700_v52, 16  ;;  %v546_v1 = vshll.u32 %v6711_v46, 16 }
  0x75   : > { %5615 = vmatmul.mubr.msk.bf16.gmra.mrb[20].mxu1 %vm658_vm3, %v4911_v6  ;;  %v550_v28 = vshrl.u32 %v6711_v46, 16  ;;  %v520_v60 = vrot.slane %v519_v14, 4  ;;  %v2801_v42 = vsel %vm6595_vm7, %v5179_v17, %v2800_v18  ;;  %v2802_v20 = vrot.slane %v2800_v18, 4  ;;  %v6752_v14 = vld [vmem:[%s6343_s25 + $0xb4] sm:$0xf] }
  0x76   : > { %v539_v44 = vrot.slane %v537_v25, 4  ;;  %v530_v34 = vrot.slane %v529_v31, 4  ;;  %v542_v45 = vrot.slane %v540_v38, 5  ;;  %v548_v47 = vrot.slane %v546_v1, 5 }
  0x77   : > { %v552_v26 = vrot.slane %v550_v28, 4  ;;  %v525_v48 = vsel %vm6369_vm4, %v520_v60, %v524_v2  ;;  %v2804_v49 = vsel %vm6595_vm7, %v2802_v20, %v2803_v21  ;;  %v556_v50 = vshll.u32 %v218_v10, 16  ;;  %v5165_v2 = vld [vmem:[%s6343_s25 + $0x54] sm:$0xe] }
  0x78   : > { %v5180_v51 = vrot.slane %v5164_v11, 9  ;;  %v535_v15 = vsel %vm6369_vm4, %v530_v34, %v534_v41  ;;  %v5196_v62 = vcombine.low %v2801_v42, %v2804_v49  ;;  %v543_v40 = vor.u32 %v542_v45, %v539_v44  ;;  %v6761_v42 = vld [vmem:[%s6343_s25 + $0xb8] sm:$0xf]  ;;  %v220_v49 = vld [vmem:[%s6343_s25 + $0xbc] sm:$0x1] }
  0x79   : > { %v553_v55 = vor.u32 %v552_v26, %v548_v47  ;;  %v4912_v57 = vcombine.low %v525_v48, %v535_v15  ;;  %v558_v63 = vrot.slane %v556_v50, 5  ;;  %v2807_v58 = vrot.slane %v6496_v8, 5 }
  0x7a   : > { %v2810_v54 = vrot.slane %v6504_v23, 5  ;;  %5772 = vmatprep.mubr.msk.bf16.mxu0 %vm658_vm3, %v5196_v62  ;;  %v544_v6 = vrot.slane %v543_v40, 4  ;;  %v561_v41 = vshrl.u32 %v6732_v33, 16  ;;  %v564_v17 = vshll.u32 %v6732_v33, 16 }
  0x7b   : > { %v554_v7 = vrot.slane %v553_v55, 4  ;;  %5618 = vmatprep.mubr.msk.bf16.mxu1 %vm658_vm3, %v4912_v57  ;;  %v2808_v10 = vsel %vm6595_vm7, %v5180_v51, %v2807_v58  ;;  %v2809_v11 = vrot.slane %v2807_v58, 4  ;;  %v570_v8 = vshll.u32 %v6737_v56, 16  ;;  %v5166_v55 = vld [vmem:[%s6343_s25 + $0x60] sm:$0xe] }
  0x7c   : > { %v574_v23 = vshrl.u32 %v6737_v56, 16  ;;  %v549_v18 = vsel %vm6369_vm4, %v544_v6, %v548_v47  ;;  %v563_v25 = vrot.slane %v561_v41, 4  ;;  %v566_v31 = vrot.slane %v564_v17, 5  ;;  %v5167_v6 = vld [vmem:[%s6343_s25 + $0x6c] sm:$0xe] }
  0x7d   : > { %v559_v21 = vsel %vm6369_vm4, %v554_v7, %v558_v63  ;;  %v2811_v1 = vsel %vm6595_vm7, %v2809_v11, %v2810_v54  ;;  %v572_v28 = vrot.slane %v570_v8, 5  ;;  %v580_v34 = vshll.u32 %v219_v61, 16  ;;  %v5103_v11 = vld [vmem:[%s6343_s25 + $0x70] sm:$0xf]  ;;  %v5104_v8 = vld [vmem:[%s6343_s25 + $0x74] sm:$0x1] }
  0x7e   : > { %v4913_v38 = vcombine.low %v549_v18, %v559_v21  ;;  %v576_v60 = vrot.slane %v574_v23, 4  ;;  %v5197_v20 = vcombine.low %v2808_v10, %v2811_v1  ;;  %v567_v44 = vor.u32 %v566_v31, %v563_v25 }
  0x7f   : > { %v5181_v45 = vrot.slane %v5165_v2, 9  ;;  %v2814_v26 = vrot.slane %v6527_v4, 5  ;;  %v2817_v48 = vrot.slane %v6533_v12, 5  ;;  %v585_v50 = vshrl.u32 %v6752_v14, 16 }
  0x80   : > { %5619 = vmatmul.mubr.msk.bf16.gmra.mrb[24].mxu1 %vm658_vm3, %v4913_v38  ;;  %v577_v47 = vor.u32 %v576_v60, %v572_v28  ;;  %5773 = vmatmul.mubr.msk.bf16.gmra.mrb[8].mxu0 %vm658_vm3, %v5197_v20  ;;  %v568_v51 = vrot.slane %v567_v44, 4  ;;  %v582_v15 = vrot.slane %v580_v34, 5  ;;  %v588_v62 = vshll.u32 %v6752_v14, 16 }
  0x81   : > { %v594_v40 = vshll.u32 %v6761_v42, 16  ;;  %v2815_v4 = vsel %vm6595_vm7, %v5181_v45, %v2814_v26  ;;  %v2816_v12 = vrot.slane %v2814_v26, 4  ;;  %v587_v63 = vrot.slane %v585_v50, 4 }
  0x82   : > { %v578_v57 = vrot.slane %v577_v47, 4  ;;  %v573_v58 = vsel %vm6369_vm4, %v568_v51, %v572_v28  ;;  %v590_v54 = vrot.slane %v588_v62, 5  ;;  %v598_v2 = vshrl.u32 %v6761_v42, 16  ;;  %v5168_v47 = vld [vmem:[%s6343_s25 + $0x78] sm:$0xe] }
  0x83   : > { %v596_v61 = vrot.slane %v594_v40, 5  ;;  %v2818_v41 = vsel %vm6595_vm7, %v2816_v12, %v2817_v48  ;;  %v604_v17 = vshll.u32 %v220_v49, 16  ;;  %v5182_v10 = vrot.slane %v5166_v55, 9  ;;  %v6223_v51 = vld [vmem:[%s6343_s25] sm:$0xf] }
  0x84   : > { %v583_v7 = vsel %vm6369_vm4, %v578_v57, %v582_v15  ;;  %v5198_v18 = vcombine.low %v2815_v4, %v2818_v41  ;;  %v591_v21 = vor.u32 %v590_v54, %v587_v63  ;;  %v600_v25 = vrot.slane %v598_v2, 4  ;;  %v6799_v15 = vld [vmem:[%s6343_s25 + $0x4] sm:$0xf]  ;;  %v6803_v40 = vld [vmem:[%s6343_s25 + $0x7c] sm:$0xf] }
  0x85   : > { %v4914_v23 = vcombine.low %v573_v58, %v583_v7  ;;  %v606_v31 = vrot.slane %v604_v17, 5  ;;  %v2821_v38 = vrot.slane %v6557_v59, 5  ;;  %v2824_v1 = vrot.slane %v6564_v9, 5  ;;  %v6806_v55 = vld [vmem:[%s6343_s25 + $0x80] sm:$0x1] }
  0x86   : > { %v5183_v28 = vrot.slane %v5167_v6, 9  ;;  %5776 = vmatprep.mubr.msk.bf16.mxu0 %vm658_vm3, %v5198_v18  ;;  %v592_v60 = vrot.slane %v591_v21, 4  ;;  %v601_v20 = vor.u32 %v600_v25, %v596_v61  ;;  %v2828_v44 = vrot.slane %v5103_v11, 5  ;;  %v5109_v57 = vld [vmem:[%s6343_s25 + $0x88] sm:$0xf] }
  0x87   : > { %5622 = vmatprep.mubr.msk.bf16.mxu1 %vm658_vm3, %v4914_v23  ;;  %v2831_v34 = vrot.slane %v5104_v8, 5  ;;  %v2822_v45 = vsel %vm6595_vm7, %v5182_v10, %v2821_v38  ;;  %v2823_v59 = vrot.slane %v2821_v38, 4  ;;  %v4932_v62 = vcombine.low %v6223_v51, %v6799_v15  ;;  %v5110_v54 = vld [vmem:[%s6343_s25 + $0x8c] sm:$0x1]  ;;  %v5112_v17 = vld [vmem:[%s6343_s25 + $0x94] sm:$0xf] }
  0x88   : > { %v597_v9 = vsel %vm6369_vm4, %v592_v60, %v596_v61  ;;  %v602_v26 = vrot.slane %v601_v20, 4  ;;  %v2829_v48 = vsel %vm6595_vm7, %v5183_v28, %v2828_v44  ;;  %v2830_v49 = vrot.slane %v2828_v44, 4  ;;  %v5169_v61 = vld [vmem:[%s6343_s25 + $0x84] sm:$0xe]  ;;  %v5170_v23 = vld [vmem:[%s6343_s25 + $0x90] sm:$0xe] }
  0x89   : > { %v2825_v50 = vsel %vm6595_vm7, %v2823_v59, %v2824_v1  ;;  %v5184_v58 = vrot.slane %v5168_v47, 9  ;;  %v2835_v7 = vrot.slane %v6803_v40, 5  ;;  %v2838_v41 = vrot.slane %v6806_v55, 5  ;;  %v5113_v25 = vld [vmem:[%s6343_s25 + $0x98] sm:$0x1] }
  0x8a   : > { %v607_v4 = vsel %vm6369_vm4, %v602_v26, %v606_v31  ;;  %v5199_v12 = vcombine.low %v2822_v45, %v2825_v50  ;;  %v2832_v63 = vsel %vm6595_vm7, %v2830_v49, %v2831_v34  ;;  %v5185_v10 = vrot.slane %v5169_v61, 9  ;;  %v5115_v31 = vld [vmem:[%s6343_s25 + $0xa0] sm:$0xf]  ;;  %v5116_v60 = vld [vmem:[%s6343_s25 + $0xa4] sm:$0x1] }
  0x8b   : > { %v4915_v2 = vcombine.low %v597_v9, %v607_v4  ;;  %v5200_v6 = vcombine.low %v2829_v48, %v2832_v63  ;;  %v2842_v11 = vrot.slane %v5109_v57, 5  ;;  %v2845_v8 = vrot.slane %v5110_v54, 5  ;;  %v5171_v20 = vld [vmem:[%s6343_s25 + $0x9c] sm:$0xe]  ;;  %v6225_v44 = vld [vmem:[%s6343_s25 + $0xc] sm:$0xf] }
  0x8c   : > { %5777 = vmatmul.mubr.msk.bf16.gmra.mrb[12].mxu0 %vm658_vm3, %v5199_v12  ;;  %v2836_v18 = vsel %vm6595_vm7, %v5184_v58, %v2835_v7  ;;  %v2837_v21 = vrot.slane %v2835_v7, 4  ;;  %v2849_v28 = vrot.slane %v5112_v17, 5  ;;  %v6833_v34 = vld [vmem:[%s6343_s25 + $0x10] sm:$0xf]  ;;  %v6227_v47 = vld [vmem:[%s6343_s25 + $0x18] sm:$0xf] }
  0x8d   : > { %5623 = vmatmul.mubr.msk.bf16.gmra.mrb[28].mxu1 %vm658_vm3, %v4915_v2  ;;  %5780 = vmatprep.mubr.msk.bf16.mxu0 %vm658_vm3, %v5200_v6  ;;  %v2843_v38 = vsel %vm6595_vm7, %v5185_v10, %v2842_v11  ;;  %v2844_v1 = vrot.slane %v2842_v11, 4  ;;  %v4933_v45 = vcombine.low %v6225_v44, %v6833_v34  ;;  %v6840_v9 = vld [vmem:[%s6343_s25 + $0x1c] sm:$0xf]  ;;  %v5186_v48 = vrot.slane %v5170_v23, 9  ;;  %v5118_v57 = vld [vmem:[%s6343_s25 + $0xac] sm:$0xf] }
  0x8e   : > { %5628 = vmatprep.mubr.msk.bf16.mxu1 %vm658_vm3, %v4932_v62  ;;  %v2839_v59 = vsel %vm6595_vm7, %v2837_v21, %v2838_v41  ;;  %v4934_v26 = vcombine.low %v6227_v47, %v6840_v9  ;;  %v2851_v51 = vrot.slane %v2849_v28, 4  ;;  %v2852_v62 = vrot.slane %v5113_v25, 5  ;;  %v6229_v54 = vld [vmem:[%s8073_s1 + $0x4] sm:$0x3]  ;;  %v5121_v2 = vld [vmem:[%s6343_s25 + $0xb8] sm:$0xf] }
  0x8f   : > { %v5201_v49 = vcombine.low %v2836_v18, %v2839_v59  ;;  %v2846_v50 = vsel %vm6595_vm7, %v2844_v1, %v2845_v8  ;;  %v5187_v12 = vrot.slane %v5171_v20, 9  ;;  %v2856_v63 = vrot.slane %v5115_v31, 5  ;;  %v6855_v7 = vld [vmem:[%s8073_s1 + $0x6] sm:$0x3]  ;;  %v5119_v10 = vld [vmem:[%s6343_s25 + $0xb0] sm:$0x1] }
  0x90   : > { %v5202_v4 = vcombine.low %v2843_v38, %v2846_v50  ;;  %v2859_v58 = vrot.slane %v5116_v60, 5  ;;  %v1426_v61 = vsel %vm707_vm0, %v6229_v54, 0  ;;  %v2850_v41 = vsel %vm6595_vm7, %v5186_v48, %v2849_v28  ;;  %v5172_v11 = vld [vmem:[%s6343_s25 + $0xa8] sm:$0xe]  ;;  %v5122_v25 = vld [vmem:[%s6343_s25 + $0xbc] sm:$0x1] }
  0x91   : > { %v2858_v6 = vrot.slane %v2856_v63, 4  ;;  %v2853_v17 = vsel %vm6595_vm7, %v2851_v51, %v2852_v62  ;;  %v2863_v8 = vrot.slane %v5118_v57, 5  ;;  %v2857_v23 = vsel %vm6595_vm7, %v5187_v12, %v2856_v63  ;;  %v5173_v31 = vld [vmem:[%s6343_s25 + $0xb4] sm:$0xe]  ;;  %v6230_v38 = vld [vmem:[%s6343_s25 + $0x24] sm:$0xf] }
  0x92   : > { %v2870_v21 = vrot.slane %v5121_v2, 5  ;;  %v6876_v1 = vld [vmem:[%s6343_s25 + $0x28] sm:$0xf]  ;;  %v5203_v60 = vcombine.low %v2850_v41, %v2853_v17  ;;  %v5188_v44 = vrot.slane %v5172_v11, 9  ;;  %v2866_v59 = vrot.slane %v5119_v10, 5 }
  0x93   : > { %v2860_v18 = vsel %vm6595_vm7, %v2858_v6, %v2859_v58  ;;  %v4935_v28 = vcombine.low %v6230_v38, %v6876_v1  ;;  %v6232_v47 = vld [vmem:[%s6343_s25 + $0x30] sm:$0xf]  ;;  %v2873_v51 = vrot.slane %v5122_v25, 5  ;;  %v5124_v62 = vld [vmem:[%s6343_s25 + $0xc4] sm:$0xf]  ;;  %v2258_v25 = vshrl.u32 %v6803_v40, 16 }
  0x94   : > { %5781 = vmatmul.mubr.msk.bf16.gmra.mrb[16].mxu0 %vm658_vm3, %v5201_v49  ;;  %v5204_v20 = vcombine.low %v2857_v23, %v2860_v18  ;;  %v5189_v49 = vrot.slane %v5173_v31, 9  ;;  %v2872_v50 = vrot.slane %v2870_v21, 4  ;;  %v2864_v57 = vsel %vm6595_vm7, %v5188_v44, %v2863_v8  ;;  %v5174_v12 = vld [vmem:[%s6343_s25 + $0xc0] sm:$0xe]  ;;  %v6234_v41 = vld [vmem:[%s6343_s25 + $0x3c] sm:$0xf] }
  0x95   : > { %5629 = vmatmul.mubr.msk.bf16.vlgmr.msra.gmra.mrb[0].mxu1 %vm658_vm3, %v4933_v45  ;;  %5784 = vmatprep.mubr.msk.bf16.mxu0 %vm658_vm3, %v5202_v4  ;;  %v2865_v45 = vrot.slane %v2863_v8, 4  ;;  %v2877_v63 = vrot.slane %v5124_v62, 5  ;;  %v5190_v6 = vrot.slane %v5174_v12, 9  ;;  %v6901_v17 = vld [vmem:[%s6343_s25 + $0x40] sm:$0xf]  ;;  %v4938_v18 = vcombine.low %v6508_v27, %v6511_v36  ;;  %v6186_v62 = vld [vmem:[%s6343_s25 + $0x24] sm:$0xff]  }
  0x96   : > { %5661 = vmatpush3.bf16.msra.mxu1 %v1426_v61  ;;  %5632 = vmatprep.mubr.msk.bf16.mxu1 %vm658_vm3, %v4934_v26  ;;  %v6881_v26 = vld [vmem:[%s6343_s25 + $0x34] sm:$0xf]  ;;  %v2871_v58 = vsel %vm6595_vm7, %v5189_v49, %v2870_v21  ;;  %v2874_v54 = vsel %vm6595_vm7, %v2872_v50, %v2873_v51  ;;  %v5125_v61 = vld [vmem:[%s6343_s25 + $0xc8] sm:$0x1]  ;;  %v4937_v10 = vcombine.low %v6234_v41, %v6901_v17  ;;  %v2254_v21 = vshll.u32 %v6803_v40, 16 }
  0x97   : > { %6159 = vmatprep.subr.msk.bf16.mxu1 %vm707_vm0, %v6855_v7  ;;  %v4936_v48 = vcombine.low %v6232_v47, %v6881_v26  ;;  %v2867_v4 = vsel %vm6595_vm7, %v2865_v45, %v2866_v59  ;;  %v5206_v11 = vcombine.low %v2871_v58, %v2874_v54  ;;  %v2879_v8 = vrot.slane %v2877_v63, 4  ;;  %v1164_v45 = vld [vmem:[%s6343_s25] sm:$0xe]  ;;  %v1165_v59 = vld [vmem:[%s6343_s25 + $0xc] sm:$0xe] }
  0x98   : > { %v5205_v2 = vcombine.low %v2864_v57, %v2867_v4  ;;  %v2880_v23 = vrot.slane %v5125_v61, 5  ;;  %v2878_v31 = vsel %vm6595_vm7, %v5190_v6, %v2877_v63  ;;  %v6916_v27 = vrot.slane %v2254_v21, 5  ;;  %v1168_v41 = vld [vmem:[%s6343_s25 + $0x30] sm:$0xe] }
  0x99   : > { %v2260_v36 = vrot.slane %v2258_v25, 4  ;;  %v4940_v44 = vcombine.low %v6568_v19, %v6574_v35  ;;  %v2264_v47 = vshll.u32 %v6806_v55, 16  ;;  %v4964_v19 = vrot.slane %v1164_v45, 9 }
  0x9a   : > { %v2881_v38 = vsel %vm6595_vm7, %v2879_v8, %v2880_v23  ;;  %8094 = vst [vmem:[#allocation3_spill] sm:$0xff] %v6916_v27  ;;  %v4965_v35 = vrot.slane %v1165_v59, 9  ;;  %v1231_v4 = vrot.slane %v6840_v9, 5  ;;  %v1238_v12 = vrot.slane %v6876_v1, 5  ;;  %v1169_v8 = vld [vmem:[%s6343_s25 + $0x3c] sm:$0xe] }
  0x9b   : > { %v5207_v40 = vcombine.low %v2878_v31, %v2881_v38  ;;  %v2261_v49 = vor.u32 %v2260_v36, %v6916_v27  ;;  %v6936_v51 = vrot.slane %v2264_v47, 5  ;;  %v4941_v58 = vcombine.low %v6589_v0, %v6602_v29  ;;  %v1170_v31 = vld [vmem:[%s6343_s25 + $0x48] sm:$0xe]  ;;  %v6240_v59 = vld [vmem:[%s6343_s25 + $0x38] sm:$0x1] }
  0x9c   : > { %5785 = vmatmul.mubr.msk.bf16.gmra.mrb[20].mxu0 %vm658_vm3, %v5203_v60  ;;  %v4939_v60 = vcombine.low %v6537_v24, %v6543_v37  ;;  %v6237_v24 = vld [vmem:[%s6343_s25 + $0x14] sm:$0x1]  ;;  %v4066_v54 = vsel %vm707_vm0, %v6660_v22, 0  ;;  %v4942_v61 = vcombine.low %v6621_v53, %v6628_v16  ;;  %v4943_v6 = vcombine.low %v6647_v39, %v6655_v43  ;;  %v6238_v16 = vld [vmem:[%s6343_s25 + $0x20] sm:$0x1] }
  0x9d   : > { %5633 = vmatmul.mubr.msk.bf16.gmra.mrb[4].mxu1 %vm658_vm3, %v4935_v28  ;;  %5788 = vmatprep.mubr.msk.bf16.mxu0 %vm658_vm3, %v5204_v20  ;;  %v1224_v28 = vrot.slane %v6833_v34, 5  ;;  %v6184_v20 = vld [vmem:[%s6343_s25 + $0x18] sm:$0xff]   ;;  %v6236_v34 = vld [vmem:[%s6343_s25 + $0x8] sm:$0x1]  ;;  %v1227_v37 = vrot.slane %v6237_v24, 5  ;;  %8095 = vst [vmem:[#allocation4_spill] sm:$0xff] %v6936_v51  ;;  %v4944_v9 = vcombine.low %v6679_v5, %v6691_v30 }
  0x9e   : > { %5636 = vmatprep.mubr.msk.bf16.mxu1 %vm658_vm3, %v4936_v48  ;;  %v1217_v48 = vrot.slane %v6799_v15, 5  ;;  %v1220_v50 = vrot.slane %v6236_v34, 5  ;;  %v1166_v15 = vld [vmem:[%s6343_s25 + $0x18] sm:$0xe]  ;;  %v6941_v63 = vrot.slane %v2261_v49, 4  ;;  %v1234_v22 = vrot.slane %v6238_v16, 5 }
  0x9f   : > { %v1226_v55 = vrot.slane %v1224_v28, 4  ;;  %v4966_v1 = vrot.slane %v1166_v15, 9  ;;  %v6963_v29 = vsel %vm6595_vm7, %v4965_v35, %v1224_v28  ;;  %v1240_v25 = vrot.slane %v1238_v12, 4  ;;  %v5289_v24 = vld [vmem:[%s6343_s25 + $0x18] sm:$0xf] }
  0xa0   : > { %v1219_v57 = vrot.slane %v1217_v48, 4  ;;  %8096 = vst [vmem:[#allocation5_spill] sm:$0xff] %v6941_v63  ;;  %v6959_v0 = vsel %vm6595_vm7, %v4964_v19, %v1217_v48  ;;  %v1248_v47 = vrot.slane %v6240_v59, 5  ;;  %v7000_v49 = vsel %vm707_vm0, %v6855_v7, 0  ;;  %v5290_v7 = vld [vmem:[%s6343_s25 + $0x1c] sm:$0xf] }
  0xa1   : > { %v6967_v53 = vsel %vm6595_vm7, %v1226_v55, %v1227_v37  ;;  %v7004_v34 = vsel %vm6595_vm7, %v4966_v1, %v1231_v4  ;;  %v6190_v37 = vld [vmem:[%s6343_s25 + $0x3c] sm:$0xff]   ;;  %v4969_v35 = vrot.slane %v1169_v8, 9  ;;  %v6241_v55 = vld [vmem:[%s6343_s25 + $0x44] sm:$0x1]  ;;  %v3587_v8 = vshll.u32 %v5289_v24, 16 }
  0xa2   : > { %v6978_v23 = vsel %vm6595_vm7, %v1219_v57, %v1220_v50  ;;  %v1171_v50 = vld [vmem:[%s6343_s25 + $0x54] sm:$0xe]  ;;  %v1255_v15 = vrot.slane %v6241_v55, 5  ;;  %v5293_v39 = vld [vmem:[%s6343_s25 + $0x28] sm:$0xf] }
  0xa3   : > { %v6248_v5 = vld [vmem:[%s6343_s25 + $0x70] sm:$0xf] }
  0xa4   : > { %5789 = vmatmul.mubr.msk.bf16.gmra.mrb[24].mxu0 %vm658_vm3, %v5205_v2  ;;  %v1167_v2 = vld [vmem:[%s6343_s25 + $0x24] sm:$0xe]  ;;  %v1280_v30 = vrot.slane %v6248_v5, 5 }
  0xa5   : > { %5637 = vmatmul.mubr.msk.bf16.gmra.mrb[8].mxu1 %vm658_vm3, %v4937_v10  ;;  %5792 = vmatprep.mubr.msk.bf16.mxu0 %vm658_vm3, %v5206_v11  ;;  %v1245_v10 = vrot.slane %v6881_v26, 5  ;;  %v6188_v11 = vld [vmem:[%s6343_s25 + $0x30] sm:$0xff]   ;;  %v4967_v21 = vrot.slane %v1167_v2, 9 }
  0xa6   : > { %5640 = vmatprep.mubr.msk.bf16.mxu1 %vm658_vm3, %v4938_v18  ;;  %v6974_v26 = vld [vmem:[%s8073_s1 + $0x10] sm:$0x3]  ;;  %v1233_v18 = vrot.slane %v1231_v4, 4  ;;  %v1282_v48 = vrot.slane %v1280_v30, 4 }
  0xa7   : > { %v1247_v45 = vrot.slane %v1245_v10, 4  ;;  %v7011_v19 = vsel %vm6595_vm7, %v4967_v21, %v1238_v12  ;;  %v3597_v21 = vshrl.u32 %v5290_v7, 16 }
  0xa8   : > { %v7020_v4 = vsel %vm6595_vm7, %v1233_v18, %v1234_v22  ;;  %v3584_v22 = vshrl.u32 %v5289_v24, 16  ;;  %v3593_v18 = vshll.u32 %v5290_v7, 16  ;;  %v5292_v24 = vld [vmem:[%s6343_s25 + $0x24] sm:$0xf] }
  0xa9   : > { %v7033_v1 = vsel %vm6595_vm7, %v1247_v45, %v1248_v47 }
  0xaa   : > { %v3586_v43 = vrot.slane %v3584_v22, 4  ;;  %v7075_v7 = vrot.slane %v3593_v18, 5  ;;  %v3611_v22 = vshll.u32 %v5292_v24, 16  ;;  %v3621_v18 = vshrl.u32 %v5293_v39, 16 }
  0xac   : > { %5793 = vmatmul.mubr.msk.bf16.gmra.mrb[28].mxu0 %vm658_vm3, %v5207_v40  ;;  %v6239_v40 = vld [vmem:[%s6343_s25 + $0x2c] sm:$0x1]  ;;  %v3613_v27 = vrot.slane %v3611_v22, 5 }
  0xad   : > { %5641 = vmatmul.mubr.msk.bf16.gmra.mrb[12].mxu1 %vm658_vm3, %v4939_v60  ;;  %5798 = vmatprep.mubr.msk.bf16.mxu0 %vm658_vm3, %v6184_v20  ;;  %v1241_v28 = vrot.slane %v6239_v40, 5  ;;  %v1252_v60 = vrot.slane %v6901_v17, 5  ;;  %v6244_v40 = vld [vmem:[%s6343_s25 + $0x50] sm:$0x1]  ;;  %v6249_v17 = vld [vmem:[%s6343_s25 + $0x74] sm:$0x1] }
  0xae   : > { %5644 = vmatprep.mubr.msk.bf16.mxu1 %vm658_vm3, %v4940_v44  ;;  %v4968_v44 = vrot.slane %v1168_v41, 9  ;;  %v4971_v41 = vrot.slane %v1171_v50, 9  ;;  %v1172_v50 = vld [vmem:[%s6343_s25 + $0x60] sm:$0xe]  ;;  %v5294_v20 = vld [vmem:[%s6343_s25 + $0x2c] sm:$0x1] }
  0xaf   : > { %v1254_v12 = vrot.slane %v1252_v60, 4  ;;  %v7046_v45 = vsel %vm6595_vm7, %v4969_v35, %v1252_v60  ;;  %v6245_v35 = vld [vmem:[%s6343_s25 + $0x5c] sm:$0x1] }
  0xb0   : > { %v7029_v2 = vsel %vm6595_vm7, %v4968_v44, %v1245_v10  ;;  %v1269_v55 = vrot.slane %v6245_v35, 5  ;;  %v1173_v35 = vld [vmem:[%s6343_s25 + $0x6c] sm:$0xe] }
  0xb1   : > { %v7050_v59 = vsel %vm6595_vm7, %v1254_v12, %v1255_v15  ;;  %v6246_v15 = vld [vmem:[%s6343_s25 + $0x64] sm:$0xf]  ;;  %v3599_v12 = vrot.slane %v3597_v21, 4  ;;  %v4973_v5 = vrot.slane %v1173_v35, 9 }
  0xb2   : > { %v6196_v21 = vld [vmem:[%s6343_s25 + $0x60] sm:$0xff]  }
  0xb4   : > { %5799 = vmatmul.mubr.msk.bf16.vlgmr.msra.gmra.mrb[0].mxu0 %vm658_vm3, %v6186_v62  ;;  %v6242_v62 = vld [vmem:[%s6343_s25 + $0x4c] sm:$0xf] }
  0xb5   : > { %5645 = vmatmul.mubr.msk.bf16.gmra.mrb[16].mxu1 %vm658_vm3, %v4941_v58  ;;  %5831 = vmatpush3.bf16.msra.mxu0 %v4066_v54  ;;  %v1259_v57 = vrot.slane %v6242_v62, 5  ;;  %v7024_v58 = vsel %vm6595_vm7, %v1240_v25, %v1241_v28  ;;  %v4970_v54 = vrot.slane %v1170_v31, 9  ;;  %v1262_v28 = vrot.slane %v6244_v40, 5 }
  0xb6   : > { %5648 = vmatprep.mubr.msk.bf16.mxu1 %vm658_vm3, %v4942_v61  ;;  %5802 = vmatprep.mubr.msk.bf16.mxu0 %vm658_vm3, %v6188_v11  ;;  %v6192_v61 = vld [vmem:[%s6343_s25 + $0x48] sm:$0xff]   ;;  %v6243_v11 = vld [vmem:[%s6343_s25 + $0x58] sm:$0xf]  ;;  %v1273_v62 = vrot.slane %v6246_v15, 5  ;;  %v5296_v15 = vld [vmem:[%s6343_s25 + $0x34] sm:$0xf] }
  0xb7   : > { %6165 = vmatprep.subr.msk.bf16.mxu0 %vm707_vm0, %v6974_v26  ;;  %v1266_v16 = vrot.slane %v6243_v11, 5  ;;  %v1261_v31 = vrot.slane %v1259_v57, 4  ;;  %v7054_v47 = vsel %vm6595_vm7, %v4970_v54, %v1259_v57  ;;  %v5291_v57 = vld [vmem:[%s6343_s25 + $0x20] sm:$0x1]  ;;  %v5295_v54 = vld [vmem:[%s6343_s25 + $0x30] sm:$0xf] }
  0xb8   : > { %v4972_v11 = vrot.slane %v1172_v50, 9  ;;  %v3635_v50 = vshll.u32 %v5295_v54, 16  ;;  %v3603_v25 = vshll.u32 %v5291_v57, 16  ;;  %v3641_v36 = vshll.u32 %v5296_v15, 16 }
  0xb9   : > { %v7065_v60 = vsel %vm6595_vm7, %v4971_v41, %v1266_v16  ;;  %v7081_v41 = vsel %vm6595_vm7, %v1261_v31, %v1262_v28  ;;  %v1275_v31 = vrot.slane %v1273_v62, 4  ;;  %v3632_v28 = vshrl.u32 %v5295_v54, 16 }
  0xba   : > { %v7123_v35 = vrot.slane %v3641_v36, 5 }
  0xbc   : > { %5803 = vmatmul.mubr.msk.bf16.gmra.mrb[4].mxu0 %vm658_vm3, %v6190_v37  ;;  %v1268_v37 = vrot.slane %v1266_v16, 4  ;;  %v6247_v16 = vld [vmem:[%s6343_s25 + $0x68] sm:$0x1] }
  0xbd   : > { %5649 = vmatmul.mubr.msk.bf16.gmra.mrb[20].mxu1 %vm658_vm3, %v4943_v6  ;;  %5806 = vmatprep.mubr.msk.bf16.mxu0 %vm658_vm3, %v6192_v61  ;;  %v3589_v6 = vrot.slane %v3587_v8, 5  ;;  %v6194_v61 = vld [vmem:[%s6343_s25 + $0x54] sm:$0xff]   ;;  %v1276_v40 = vrot.slane %v6247_v16, 5  ;;  %v3617_v8 = vshll.u32 %v5293_v39, 16  ;;  %v3600_v16 = vor.u32 %v3599_v12, %v7075_v7 }
  0xbe   : > { %5652 = vmatprep.mubr.msk.bf16.mxu1 %vm658_vm3, %v4944_v9  ;;  %v3608_v9 = vshrl.u32 %v5292_v24, 16  ;;  %v7090_v44 = vsel %vm6595_vm7, %v1268_v37, %v1269_v55  ;;  %v1283_v24 = vrot.slane %v6249_v17, 5  ;;  %v3645_v39 = vshrl.u32 %v5296_v15, 16 }
  0xbf   : > { %v3590_v10 = vor.u32 %v3589_v6, %v3586_v43  ;;  %v7096_v37 = vrot.slane %v3617_v8, 5  ;;  %v3623_v55 = vrot.slane %v3621_v18, 4  ;;  %v8097_v43 = vcombine.low %v6700_v52, %v6711_v46  ;;  %v6250_v8 = vld [vmem:[%s6343_s25 + $0x7c] sm:$0xf]  ;;  %v7132_v18 = vld [vmem:[%s6343_s25 + $0x38] sm:$0x1] }
  0xc0   : > { %v3610_v38 = vrot.slane %v3608_v9, 4  ;;  %v7105_v17 = vsel %vm6595_vm7, %v4972_v11, %v1273_v62  ;;  %v7109_v57 = vsel %vm6595_vm7, %v1275_v31, %v1276_v40  ;;  %v3634_v6 = vrot.slane %v3632_v28, 4  ;;  %8099 = vst [vmem:[#allocation6_spill] sm:$0xff] %v7132_v18 }
  0xc1   : > { %v3637_v12 = vrot.slane %v3635_v50, 5  ;;  %v8098_v52 = vcombine.low %v6732_v33, %v6737_v56  ;;  %v3591_v46 = vrot.slane %v3590_v10, 4  ;;  %v3601_v54 = vrot.slane %v3600_v16, 4  ;;  %v6198_v33 = vld [vmem:[%s6343_s25 + $0x6c] sm:$0xff]   ;;  %v1175_v16 = vld [vmem:[%s6343_s25 + $0x84] sm:$0xe] }
  0xc2   : > { %v3627_v62 = vshll.u32 %v5294_v20, 16  ;;  %v7117_v11 = vsel %vm6595_vm7, %v4973_v5, %v1280_v30  ;;  %v7121_v40 = vsel %vm6595_vm7, %v1282_v48, %v1283_v24  ;;  %v3647_v9 = vrot.slane %v3645_v39, 4  ;;  %v6199_v48 = vld [vmem:[%s6343_s25 + $0x78] sm:$0xff]  }
  0xc3   : > { %v3614_v10 = vor.u32 %v3613_v27, %v3610_v38  ;;  %v3624_v20 = vor.u32 %v3623_v55, %v7096_v37  ;;  %v1287_v30 = vrot.slane %v6250_v8, 5  ;;  %v3638_v38 = vor.u32 %v3637_v12, %v3634_v6  ;;  %v5298_v5 = vld [vmem:[%s6343_s25 + $0x3c] sm:$0xf] }
  0xc4   : > { %5807 = vmatmul.mubr.msk.bf16.gmra.mrb[8].mxu0 %vm658_vm3, %v6194_v61  ;;  %v3605_v61 = vrot.slane %v3603_v25, 5  ;;  %v1174_v25 = vld [vmem:[%s6343_s25 + $0x78] sm:$0xe]  ;;  %v7148_v50 = vrot.slane %v3627_v62, 5  ;;  %v3648_v39 = vor.u32 %v3647_v9, %v7123_v35  ;;  %v3651_v55 = vshll.u32 %v7132_v18, 16 }
  0xc5   : > { %5653 = vmatmul.mubr.msk.bf16.gmra.mrb[24].mxu1 %vm658_vm3, %v8097_v43  ;;  %5810 = vmatprep.mubr.msk.bf16.mxu0 %vm658_vm3, %v6196_v21  ;;  %v3596_v21 = vsel %vm6369_vm4, %v3591_v46, %v7075_v7  ;;  %v4974_v24 = vrot.slane %v1174_v25, 9  ;;  %v6251_v43 = vld [vmem:[%s6343_s25 + $0x88] sm:$0xf]  ;;  %v7156_v7 = vld [vmem:[%s6343_s25 + $0x40] sm:$0xf]  ;;  %v3615_v12 = vrot.slane %v3614_v10, 4  ;;  %v8101_v62 = vcombine.low %v6752_v14, %v6761_v42 }
  0xc6   : > { %5656 = vmatprep.mubr.msk.bf16.mxu1 %vm658_vm3, %v8098_v52  ;;  %v3606_v31 = vsel %vm6369_vm4, %v3601_v54, %v3605_v61  ;;  %v1294_v6 = vrot.slane %v6251_v43, 5  ;;  %8100 = vst [vmem:[#allocation7_spill] sm:$0xff] %v7156_v7  ;;  %v3625_v52 = vrot.slane %v3624_v20, 4  ;;  %v1289_v46 = vrot.slane %v1287_v30, 4  ;;  %v6252_v54 = vld [vmem:[%s6343_s25 + $0x80] sm:$0x1] }
  0xc7   : > { %v1290_v61 = vrot.slane %v6252_v54, 5  ;;  %v3639_v9 = vrot.slane %v3638_v38, 4  ;;  %v4975_v25 = vrot.slane %v1175_v16, 9  ;;  %v3656_v8 = vshrl.u32 %v5298_v5, 16  ;;  %v6200_v10 = vld [vmem:[%s6343_s25 + $0x84] sm:$0xff]  }
  0xc8   : > { %v3659_v43 = vshll.u32 %v5298_v5, 16  ;;  %v7170_v20 = vcombine.low %v3596_v21, %v3606_v31  ;;  %v7174_v14 = vsel %vm707_vm0, %v6974_v26, 0  ;;  %v3669_v38 = vshrl.u32 %v7156_v7, 16  ;;  %v6201_v21 = vld [vmem:[%s6343_s25 + $0x90] sm:$0xff]   ;;  %v6257_v18 = vld [vmem:[%s6343_s25 + $0xa0] sm:$0xf] }
  0xc9   : > { %v3649_v16 = vrot.slane %v3648_v39, 4  ;;  %v3653_v5 = vrot.slane %v3651_v55, 5  ;;  %v1296_v54 = vrot.slane %v1294_v6, 4  ;;  %v3620_v31 = vsel %vm6369_vm4, %v3615_v12, %v7096_v37 }
  0xca   : > { %v3630_v26 = vsel %vm6369_vm4, %v3625_v52, %v7148_v50  ;;  %v7189_v39 = vsel %vm6595_vm7, %v4974_v24, %v1287_v30  ;;  %v7193_v55 = vsel %vm6595_vm7, %v1289_v46, %v1290_v61  ;;  %v3644_v37 = vsel %vm6369_vm4, %v3639_v9, %v7123_v35  ;;  %v5304_v30 = vld [vmem:[%s6343_s25 + $0x54] sm:$0xf]  ;;  %v7210_v24 = vld [vmem:[%s6343_s25 + $0x58] sm:$0xf]  ;;  %v7215_v61 = vld [vmem:[%s6343_s25 + $0x90] sm:$0xe] }
  0xcb   : > { %v7206_v12 = vsel %vm6595_vm7, %v4975_v25, %v1294_v6  ;;  %v3658_v50 = vrot.slane %v3656_v8, 4  ;;  %v3661_v52 = vrot.slane %v3659_v43, 5  ;;  %v3671_v46 = vrot.slane %v3669_v38, 4 }
  0xcc   : > { %5811 = vmatmul.mubr.msk.bf16.gmra.mrb[12].mxu0 %vm658_vm3, %v6198_v33  ;;  %v8102_v33 = vcombine.low %v6959_v0, %v6978_v23  ;;  %v6253_v0 = vld [vmem:[%s6343_s25 + $0x8c] sm:$0x1]  ;;  %v3654_v36 = vsel %vm6369_vm4, %v3649_v16, %v3653_v5  ;;  %v3704_v25 = vshrl.u32 %v5304_v30, 16  ;;  %v3707_v8 = vshll.u32 %v5304_v30, 16 }
  0xcd   : > { %5657 = vmatmul.mubr.msk.bf16.gmra.mrb[28].mxu1 %vm658_vm3, %v8101_v62  ;;  %5814 = vmatprep.mubr.msk.bf16.mxu0 %vm658_vm3, %v6199_v48  ;;  %v3665_v48 = vshll.u32 %v7156_v7, 16  ;;  %v1297_v23 = vrot.slane %v6253_v0, 5  ;;  %v5301_v62 = vld [vmem:[%s6343_s25 + $0x48] sm:$0xf]  ;;  %v7199_v0 = vld [vmem:[%s6343_s25 + $0x4c] sm:$0xf]  ;;  %v8104_v38 = vcombine.low %v6963_v29, %v6967_v53  ;;  %v7233_v16 = vcombine.low %v3620_v31, %v3630_v26 }
  0xce   : > { %5662 = vmatprep.mubr.msk.bf16.mxu1 %vm658_vm3, %v8102_v33  ;;  %v7196_v33 = vld [vmem:[%s6343_s25 + $0x44] sm:$0x1]  ;;  %v3680_v27 = vshrl.u32 %v5301_v62, 16  ;;  %v3683_v15 = vshll.u32 %v5301_v62, 16  ;;  %v3689_v6 = vshll.u32 %v7199_v0, 16  ;;  %v3693_v9 = vshrl.u32 %v7199_v0, 16 }
  0xcf   : > { %8103 = vst [vmem:[#allocation8_spill] sm:$0xff] %v7196_v33  ;;  %v7212_v28 = vrot.slane %v3665_v48, 5  ;;  %v7221_v35 = vsel %vm6595_vm7, %v1296_v54, %v1297_v23  ;;  %v3713_v43 = vshll.u32 %v7210_v24, 16  ;;  %v3717_v48 = vshrl.u32 %v7210_v24, 16  ;;  %v5307_v31 = vld [vmem:[%s6343_s25 + $0x60] sm:$0xf] }
  0xd0   : > { %v3675_v5 = vshll.u32 %v7196_v33, 16  ;;  %v4976_v54 = vrot.slane %v7215_v61, 9  ;;  %v8105_v23 = vcombine.low %v7004_v34, %v7020_v4  ;;  %v7244_v29 = vcombine.low %v3644_v37, %v3654_v36  ;;  %v6202_v26 = vld [vmem:[%s6343_s25 + $0x9c] sm:$0xff]   ;;  %v6203_v30 = vld [vmem:[%s6343_s25 + $0xa8] sm:$0xff]  }
  0xd1   : > { %v3662_v53 = vor.u32 %v3661_v52, %v3658_v50  ;;  %v3682_v62 = vrot.slane %v3680_v27, 4  ;;  %v7255_v34 = vrot.slane %v3689_v6, 5  ;;  %v3695_v4 = vrot.slane %v3693_v9, 4  ;;  %v6254_v36 = vld [vmem:[%s8073_s1 + $0x8] sm:$0x3] }
  0xd2   : > { %v3706_v27 = vrot.slane %v3704_v25, 4  ;;  %v3709_v37 = vrot.slane %v3707_v8, 5  ;;  %v7264_v50 = vrot.slane %v3713_v43, 5  ;;  %v3719_v52 = vrot.slane %v3717_v48, 4  ;;  %v6255_v6 = vld [vmem:[%s6343_s25 + $0x94] sm:$0xf] }
  0xd3   : > { %v7270_v9 = vld [vmem:[%s6343_s25 + $0x64] sm:$0xf]  ;;  %v3728_v61 = vshrl.u32 %v5307_v31, 16  ;;  %v7272_v22 = vrot.slane %v3662_v53, 4  ;;  %v1308_v25 = vrot.slane %v6257_v18, 5  ;;  %v3696_v43 = vor.u32 %v3695_v4, %v7255_v34 }
  0xd4   : > { %5815 = vmatmul.mubr.msk.bf16.gmra.mrb[16].mxu0 %vm658_vm3, %v6200_v10  ;;  %8106 = vst [vmem:[#allocation9_spill] sm:$0xff] %v7270_v9  ;;  %v3731_v10 = vshll.u32 %v5307_v31, 16  ;;  %v3710_v31 = vor.u32 %v3709_v37, %v3706_v27  ;;  %v3720_v53 = vor.u32 %v3719_v52, %v7264_v50  ;;  %v8107_v18 = vcombine.low %v7011_v19, %v7024_v58  ;;  %v6204_v37 = vld [vmem:[%s6343_s25 + $0xb4] sm:$0xff]  }
  0xd5   : > { %5663 = vmatmul.mubr.msk.bf16.vlgmr.msra.gmra.mrb[0].mxu1 %vm658_vm3, %v8104_v38  ;;  %5818 = vmatprep.mubr.msk.bf16.mxu0 %vm658_vm3, %v6201_v21  ;;  %v3685_v21 = vrot.slane %v3683_v15, 5  ;;  %v7253_v38 = vld [vmem:[%s6343_s25 + $0x50] sm:$0x1]  ;;  %v7262_v15 = vld [vmem:[%s6343_s25 + $0x5c] sm:$0x1]  ;;  %v8108_v27 = vcombine.low %v7029_v2, %v7033_v1  ;;  %v1310_v52 = vrot.slane %v1308_v25, 4 }
  0xd6   : > { %5695 = vmatpush3.bf16.msra.mxu1 %v7000_v49  ;;  %5666 = vmatprep.mubr.msk.bf16.mxu1 %vm658_vm3, %v8105_v23  ;;  %v3672_v49 = vor.u32 %v3671_v46, %v7212_v28  ;;  %v7266_v46 = vrot.slane %v3675_v5, 5  ;;  %v1301_v23 = vrot.slane %v6255_v6, 5  ;;  %v3699_v48 = vshll.u32 %v7253_v38, 16  ;;  %v1177_v5 = vld [vmem:[%s6343_s25 + $0x9c] sm:$0xe] }
  0xd7   : > { %6161 = vmatprep.subr.msk.bf16.mxu1 %vm707_vm0, %v6254_v36  ;;  %v6256_v36 = vld [vmem:[%s6343_s25 + $0x98] sm:$0x1]  ;;  %v3686_v7 = vor.u32 %v3685_v21, %v3682_v62  ;;  %v3723_v6 = vshll.u32 %v7262_v15, 16  ;;  %v3741_v62 = vshrl.u32 %v7270_v9, 16  ;;  %v3733_v4 = vrot.slane %v3731_v10, 5 }
  0xd8   : > { %v1304_v33 = vrot.slane %v6256_v36, 5  ;;  %v3673_v8 = vrot.slane %v3672_v49, 4  ;;  %v3737_v36 = vshll.u32 %v7270_v9, 16  ;;  %v7291_v21 = vsel %vm6595_vm7, %v4976_v54, %v1301_v23  ;;  %v7302_v2 = vld [vmem:[%s6343_s25 + $0x68] sm:$0x1] }
  0xd9   : > { %v3730_v49 = vrot.slane %v3728_v61, 4  ;;  %v3687_v19 = vrot.slane %v3686_v7, 4  ;;  %v4977_v58 = vrot.slane %v1177_v5, 9  ;;  %v3697_v3 = vrot.slane %v3696_v43, 4  ;;  %8109 = vst [vmem:[#allocation10_spill] sm:$0xff] %v7302_v2  ;;  %v6205_v5 = vld [vmem:[%s6343_s25 + $0xc0] sm:$0xff]  }
  0xda   : > { %v3701_v54 = vrot.slane %v3699_v48, 5  ;;  %v3725_v63 = vrot.slane %v3723_v6, 5  ;;  %v1315_v61 = vrot.slane %v6737_v56, 5  ;;  %v3711_v10 = vrot.slane %v3710_v31, 4  ;;  %v1179_v31 = vld [vmem:[%s6343_s25 + $0xb4] sm:$0xe] }
  0xdb   : > { %v3721_v51 = vrot.slane %v3720_v53, 4  ;;  %v7304_v1 = vrot.slane %v3737_v36, 5  ;;  %v3743_v7 = vrot.slane %v3741_v62, 4  ;;  %v3668_v43 = vsel %vm6369_vm4, %v7272_v22, %v7212_v28  ;;  %v6259_v62 = vld [vmem:[%s6343_s25 + $0xb0] sm:$0x1] }
  0xdc   : > { %5819 = vmatmul.mubr.msk.bf16.gmra.mrb[20].mxu0 %vm658_vm3, %v6202_v26  ;;  %v1303_v26 = vrot.slane %v1301_v23, 4  ;;  %v1178_v23 = vld [vmem:[%s6343_s25 + $0xa8] sm:$0xe]  ;;  %v3678_v48 = vsel %vm6369_vm4, %v3673_v8, %v7266_v46  ;;  %v3734_v6 = vor.u32 %v3733_v4, %v3730_v49  ;;  %v3692_v53 = vsel %vm6369_vm4, %v3687_v19, %v7255_v34  ;;  %v5310_v46 = vld [vmem:[%s6343_s25 + $0x6c] sm:$0xf] }
  0xdd   : > { %5667 = vmatmul.mubr.msk.bf16.gmra.mrb[4].mxu1 %vm658_vm3, %v8107_v18  ;;  %5822 = vmatprep.mubr.msk.bf16.mxu0 %vm658_vm3, %v6203_v30  ;;  %v6258_v18 = vld [vmem:[%s6343_s25 + $0xa4] sm:$0x1]  ;;  %v7324_v36 = vsel %vm6595_vm7, %v4977_v58, %v1308_v25  ;;  %v4978_v28 = vrot.slane %v1178_v23, 9  ;;  %v1317_v8 = vrot.slane %v1315_v61, 4  ;;  %v3747_v49 = vshll.u32 %v7302_v2, 16 }
  0xde   : > { %5670 = vmatprep.mubr.msk.bf16.mxu1 %vm658_vm3, %v8108_v27  ;;  %v1311_v30 = vrot.slane %v6258_v18, 5  ;;  %v7316_v56 = vsel %vm6595_vm7, %v1303_v26, %v1304_v33  ;;  %v3702_v33 = vsel %vm6369_vm4, %v3697_v3, %v3701_v54  ;;  %v1318_v26 = vrot.slane %v6259_v62, 5  ;;  %v5313_v18 = vld [vmem:[%s6343_s25 + $0x78] sm:$0xf]  ;;  %v7379_v54 = vld [vmem:[%s6343_s25 + $0xbc] sm:$0x1] }
  0xdf   : > { %v3716_v34 = vsel %vm6369_vm4, %v3711_v10, %v7264_v50  ;;  %v3726_v25 = vsel %vm6369_vm4, %v3721_v51, %v3725_v63  ;;  %v3744_v4 = vor.u32 %v3743_v7, %v7304_v1  ;;  %v4979_v27 = vrot.slane %v1179_v31, 9  ;;  %v7353_v51 = vld [vmem:[%s6343_s25 + $0x70] sm:$0xf]  ;;  %v7383_v10 = vld [vmem:[%s6343_s25 + $0x7c] sm:$0xf] }
  0xe0   : > { %v7328_v22 = vsel %vm6595_vm7, %v1310_v52, %v1311_v30  ;;  %v8111_v3 = vcombine.low %v7046_v45, %v7050_v59  ;;  %v7349_v19 = vrot.slane %v3734_v6, 4  ;;  %v1322_v50 = vrot.slane %v6761_v42, 5  ;;  %8112 = vst [vmem:[#allocation12_spill] sm:$0xff] %v7353_v51  ;;  %8114 = vst [vmem:[#allocation13_spill] sm:$0xff] %v7383_v10  ;;  %v5316_v7 = vld [vmem:[%s6343_s25 + $0x84] sm:$0xf] }
  0xe1   : > { %8110 = vst [vmem:[#allocation11_spill] sm:$0xff] %v7328_v22  ;;  %v3752_v63 = vshrl.u32 %v5310_v46, 16  ;;  %v8113_v45 = vcombine.low %v7054_v47, %v7081_v41  ;;  %v7361_v58 = vcombine.low %v3692_v53, %v3702_v33  ;;  %v7367_v42 = vsel %vm6595_vm7, %v4978_v28, %v1315_v61  ;;  %v6206_v61 = vld [vmem:[%s6343_s25 + $0xcc] sm:$0xff]   ;;  %v7395_v31 = vld [vmem:[%s6343_s25 + $0x88] sm:$0xf] }
  0xe2   : > { %v7370_v30 = vcombine.low %v3716_v34, %v3726_v25  ;;  %v7374_v47 = vsel %vm6595_vm7, %v1317_v8, %v1318_v26  ;;  %v7376_v41 = vrot.slane %v3747_v49, 5  ;;  %v3761_v6 = vshll.u32 %v7353_v51, 16  ;;  %8115 = vst [vmem:[#allocation14_spill] sm:$0xff] %v7395_v31  ;;  %v5319_v62 = vld [vmem:[%s6343_s25 + $0x90] sm:$0xf] }
  0xe3   : > { %v7401_v28 = vrot.slane %v1322_v50, 4  ;;  %v7403_v33 = vrot.slane %v3752_v63, 4  ;;  %v3765_v8 = vshrl.u32 %v7353_v51, 16  ;;  %v3776_v26 = vshrl.u32 %v5313_v18, 16  ;;  %v7410_v25 = vld [vmem:[%s6343_s25 + $0x94] sm:$0xf] }
  0xe4   : > { %5823 = vmatmul.mubr.msk.bf16.gmra.mrb[24].mxu0 %vm658_vm3, %v6204_v37  ;;  %v7347_v37 = vcombine.low %v3668_v43, %v3678_v48  ;;  %v7391_v43 = vsel %vm6595_vm7, %v4979_v27, %v1322_v50  ;;  %v3755_v48 = vshll.u32 %v5310_v46, 16  ;;  %v3779_v49 = vshll.u32 %v5313_v18, 16  ;;  %8116 = vst [vmem:[#allocation15_spill] sm:$0xff] %v7410_v25  ;;  %v7448_v2 = vld [vmem:[%s6343_s25 + $0x8c] sm:$0x1] }
  0xe5   : > { %5671 = vmatmul.mubr.msk.bf16.gmra.mrb[8].mxu1 %vm658_vm3, %v8111_v3  ;;  %5826 = vmatprep.mubr.msk.bf16.mxu0 %vm658_vm3, %v6205_v5  ;;  %v7387_v5 = vrot.slane %v3744_v4, 4  ;;  %v3785_v46 = vshll.u32 %v7383_v10, 16  ;;  %v3789_v34 = vshrl.u32 %v7383_v10, 16  ;;  %v3800_v4 = vshrl.u32 %v5316_v7, 16 }
  0xe6   : > { %5674 = vmatprep.mubr.msk.bf16.mxu1 %vm658_vm3, %v8113_v45  ;;  %v3803_v27 = vshll.u32 %v5316_v7, 16  ;;  %v3809_v3 = vshll.u32 %v7395_v31, 16  ;;  %v3813_v50 = vshrl.u32 %v7395_v31, 16  ;;  %v7420_v45 = vld [vmem:[%s6343_s25 + $0x74] sm:$0x1]  ;;  %v3757_v18 = vrot.slane %v3755_v48, 5 }
  0xe7   : > { %v3824_v52 = vshrl.u32 %v5319_v62, 16  ;;  %v3827_v53 = vshll.u32 %v5319_v62, 16  ;;  %v8117_v7 = vcombine.low %v7065_v60, %v7090_v44  ;;  %v3767_v59 = vrot.slane %v3765_v8, 4  ;;  %v5322_v48 = vld [vmem:[%s6343_s25 + $0x9c] sm:$0xf] }
  0xe8   : > { %v3833_v63 = vshll.u32 %v7410_v25, 16  ;;  %v3837_v23 = vshrl.u32 %v7410_v25, 16  ;;  %v8118_v62 = vcombine.low %v7105_v17, %v7109_v57  ;;  %v7438_v44 = vld [vmem:[%s6343_s25 + $0x80] sm:$0x1]  ;;  %v3778_v60 = vrot.slane %v3776_v26, 4 }
  0xe9   : > { %8119 = vst [vmem:[#allocation16_spill] sm:$0xff] %v7438_v44  ;;  %v3802_v31 = vrot.slane %v3800_v4, 4  ;;  %v3805_v8 = vrot.slane %v3803_v27, 5  ;;  %v7442_v10 = vrot.slane %v3809_v3, 5  ;;  %v3815_v51 = vrot.slane %v3813_v50, 4 }
  0xea   : > { %v7445_v25 = vld [vmem:[%s6343_s25 + $0xa0] sm:$0xf]  ;;  %v3826_v17 = vrot.slane %v3824_v52, 4  ;;  %v3829_v57 = vrot.slane %v3827_v53, 5  ;;  %v3851_v9 = vshll.u32 %v5322_v48, 16  ;;  %v3758_v26 = vor.u32 %v3757_v18, %v7403_v33 }
  0xeb   : > { %v3795_v27 = vshll.u32 %v7438_v44, 16  ;;  %v7457_v3 = vld [vmem:[%s6343_s25 + $0x98] sm:$0x1]  ;;  %v3857_v50 = vshll.u32 %v7445_v25, 16  ;;  %v3861_v52 = vshrl.u32 %v7445_v25, 16  ;;  %v3806_v22 = vor.u32 %v3805_v8, %v3802_v31 }
  0xec   : > { %5827 = vmatmul.mubr.msk.bf16.gmra.mrb[28].mxu0 %vm658_vm3, %v6206_v61  ;;  %v7428_v61 = vrot.slane %v3761_v6, 5  ;;  %v3791_v6 = vrot.slane %v3789_v34, 4  ;;  %v3839_v34 = vrot.slane %v3837_v23, 4  ;;  %v3819_v33 = vshll.u32 %v7448_v2, 16 }
  0xed   : > { %5675 = vmatmul.mubr.msk.bf16.gmra.mrb[12].mxu1 %vm658_vm3, %v8117_v7  ;;  %5832 = vmatprep.mubr.msk.bf16.mxu0 %vm658_vm3, %v7170_v20  ;;  %v3781_v7 = vrot.slane %v3779_v49, 5  ;;  %v7440_v20 = vrot.slane %v3785_v46, 5  ;;  %v3771_v49 = vshll.u32 %v7420_v45, 16  ;;  %v7452_v46 = vrot.slane %v3833_v63, 5 }
  0xee   : > { %5678 = vmatprep.mubr.msk.bf16.mxu1 %vm658_vm3, %v8118_v62  ;;  %v3848_v62 = vshrl.u32 %v5322_v48, 16  ;;  %v3768_v4 = vor.u32 %v3767_v59, %v7428_v61  ;;  %v3816_v23 = vor.u32 %v3815_v51, %v7442_v10  ;;  %v3830_v59 = vor.u32 %v3829_v57, %v3826_v17  ;;  %v7490_v57 = vld [vmem:[%s6343_s25 + $0xa4] sm:$0x1] }
  0xef   : > { %v3782_v53 = vor.u32 %v3781_v7, %v3778_v60  ;;  %v3792_v48 = vor.u32 %v3791_v6, %v7440_v20  ;;  %v3853_v18 = vrot.slane %v3851_v9, 5  ;;  %v8120_v44 = vcombine.low %v7117_v11, %v7121_v40 }
  0xf0   : > { %v3850_v63 = vrot.slane %v3848_v62, 4  ;;  %v8121_v31 = vrot.slane %v7379_v54, 5  ;;  %v3773_v51 = vrot.slane %v3771_v49, 5  ;;  %v3840_v60 = vor.u32 %v3839_v34, %v7452_v46  ;;  %v7493_v34 = vld [vmem:[%s6343_s25 + $0xac] sm:$0xf] }
  0xf1   : > { %v3843_v9 = vshll.u32 %v7457_v3, 16  ;;  %v8122_v11 = vcombine.low %v7189_v39, %v7193_v55  ;;  %v3759_v40 = vrot.slane %v3758_v26, 4  ;;  %v7486_v54 = vrot.slane %v3857_v50, 5 }
  0xf2   : > { %v3783_v7 = vrot.slane %v3782_v53, 4  ;;  %v3793_v6 = vrot.slane %v3792_v48, 4  ;;  %v3797_v8 = vrot.slane %v3795_v27, 5  ;;  %v3821_v17 = vrot.slane %v3819_v33, 5  ;;  %v7503_v48 = vld [vmem:[%s6343_s25 + $0xb0] sm:$0x1] }
  0xf3   : > { %v3807_v39 = vrot.slane %v3806_v22, 4  ;;  %v3817_v55 = vrot.slane %v3816_v23, 4  ;;  %v3831_v62 = vrot.slane %v3830_v59, 4  ;;  %v3854_v49 = vor.u32 %v3853_v18, %v3850_v63 }
  0xf4   : > { %5833 = vmatmul.mubr.msk.bf16.vlgmr.msra.gmra.mrb[0].mxu0 %vm658_vm3, %v7233_v16  ;;  %v7476_v16 = vsel %vm6595_vm7, %v7401_v28, %v8121_v31  ;;  %v3863_v28 = vrot.slane %v3861_v52, 4  ;;  %v3845_v26 = vrot.slane %v3843_v9, 5  ;;  %v3764_v52 = vsel %vm6369_vm4, %v3759_v40, %v7428_v61 }
  0xf5   : > { %5679 = vmatmul.mubr.msk.bf16.gmra.mrb[16].mxu1 %vm658_vm3, %v8120_v44  ;;  %5865 = vmatpush3.bf16.msra.mxu0 %v7174_v14  ;;  %v3769_v14 = vrot.slane %v3768_v4, 4  ;;  %v5325_v44 = vld [vmem:[%s6343_s25 + $0xa8] sm:$0xf]  ;;  %v3867_v22 = vshll.u32 %v7490_v57, 16  ;;  %v3788_v33 = vsel %vm6369_vm4, %v3783_v7, %v7440_v20  ;;  %v3798_v23 = vsel %vm6369_vm4, %v3793_v6, %v3797_v8 }
  0xf6   : > { %5682 = vmatprep.mubr.msk.bf16.mxu1 %vm658_vm3, %v8122_v11  ;;  %5836 = vmatprep.mubr.msk.bf16.mxu0 %vm658_vm3, %v7244_v29  ;;  %v3841_v29 = vrot.slane %v3840_v60, 4  ;;  %v3872_v4 = vshrl.u32 %v5325_v44, 16  ;;  %v3875_v50 = vshll.u32 %v5325_v44, 16  ;;  %v3864_v53 = vor.u32 %v3863_v28, %v7486_v54  ;;  %v5374_v11 = vld [vmem:[%s6343_s25 + $0x48] sm:$0xe] }
  0xf7   : > { %v3774_v27 = vsel %vm6369_vm4, %v3769_v14, %v3773_v51  ;;  %v3881_v59 = vshll.u32 %v7493_v34, 16  ;;  %v3885_v61 = vshrl.u32 %v7493_v34, 16  ;;  %v3812_v63 = vsel %vm6369_vm4, %v3807_v39, %v7442_v10  ;;  %v7568_v39 = vld [vmem:[%s6343_s25 + $0xb8] sm:$0xf] }
  0xf8   : > { %v3822_v18 = vsel %vm6369_vm4, %v3817_v55, %v3821_v17  ;;  %v3836_v20 = vsel %vm6369_vm4, %v3831_v62, %v7452_v46  ;;  %v3855_v31 = vrot.slane %v3854_v49, 4  ;;  %v8123_v51 = vcombine.low %v7206_v12, %v7221_v35 }
  0xf9   : > { %v3874_v10 = vrot.slane %v3872_v4, 4  ;;  %v3877_v60 = vrot.slane %v3875_v50, 5  ;;  %v3891_v9 = vshll.u32 %v7503_v48, 16  ;;  %v8124_v46 = vcombine.low %v7291_v21, %v7316_v56  ;;  %v5328_v21 = vld [vmem:[%s6343_s25 + $0xb4] sm:$0xf] }
  0xfa   : > { %v4995_v12 = vcombine.low %v7367_v42, %v7374_v47  ;;  %v8125_v35 = vsel %vm6369_vm4, %v7387_v5, %v7376_v41  ;;  %v3865_v14 = vrot.slane %v3864_v53, 4  ;;  %v3869_v28 = vrot.slane %v3867_v22, 5  ;;  %v5376_v4 = vld [vmem:[%s6343_s25 + $0x60] sm:$0xe]  ;;  %v5377_v53 = vld [vmem:[%s6343_s25 + $0x6c] sm:$0xe] }
  0xfb   : > { %v4996_v56 = vcombine.low %v7391_v43, %v7476_v16  ;;  %v7551_v44 = vcombine.low %v3764_v52, %v3774_v27  ;;  %v7553_v42 = vrot.slane %v3881_v59, 5  ;;  %v3887_v47 = vrot.slane %v3885_v61, 4  ;;  %v8134_v16 = vld [vmem:[#allocation4_spill] sm:$0xff] }
  0xfc   : > { %5837 = vmatmul.mubr.msk.bf16.gmra.mrb[4].mxu0 %vm658_vm3, %v7347_v37  ;;  %v3846_v37 = vsel %vm6369_vm4, %v3841_v29, %v3845_v26  ;;  %v7555_v41 = vcombine.low %v3788_v33, %v3798_v23  ;;  %v7557_v5 = vcombine.low %v3812_v63, %v3822_v18  ;;  %v3860_v6 = vsel %vm6369_vm4, %v3855_v31, %v7486_v54  ;;  %v8127_v23 = vld [vmem:[#allocation11_spill] sm:$0xff]  ;;  %v5331_v63 = vld [vmem:[%s6343_s25 + $0xc0] sm:$0xf]  ;;  %v8129_v18 = vld [vmem:[#allocation9_spill] sm:$0xff] }
  0xfd   : > { %5683 = vmatmul.mubr.msk.bf16.gmra.mrb[20].mxu1 %vm658_vm3, %v8123_v51  ;;  %5840 = vmatprep.mubr.msk.bf16.mxu0 %vm658_vm3, %v7361_v58  ;;  %v8126_v58 = vsel %vm6369_vm4, %v7349_v19, %v7304_v1  ;;  %v7559_v7 = vcombine.low %v3836_v20, %v3846_v37  ;;  %v5390_v1 = vrot.slane %v5374_v11, 9  ;;  %v5375_v19 = vld [vmem:[%s6343_s25 + $0x54] sm:$0xe]  ;;  %v3878_v8 = vor.u32 %v3877_v60, %v3874_v10  ;;  %v8130_v31 = vld [vmem:[#allocation10_spill] sm:$0xff] }
  0xfe   : > { %5686 = vmatprep.mubr.msk.bf16.mxu1 %vm658_vm3, %v8124_v46  ;;  %v5344_v40 = vcombine.low %v8126_v58, %v8125_v35  ;;  %v7565_v17 = vrot.slane %v3891_v9, 5  ;;  %v3896_v55 = vshrl.u32 %v5328_v21, 16  ;;  %v3870_v62 = vsel %vm6369_vm4, %v3865_v14, %v3869_v28  ;;  %v8131_v9 = vld [vmem:[#allocation12_spill] sm:$0xff]  ;;  %v7617_v35 = vld [vmem:[%s6343_s25 + $0xbc] sm:$0x1] }
  0xff   : > { %v3899_v49 = vshll.u32 %v5328_v21, 16  ;;  %v4355_v29 = vrot.slane %v7199_v0, 5  ;;  %v4358_v26 = vrot.slane %v7253_v38, 5  ;;  %v3888_v50 = vor.u32 %v3887_v47, %v7553_v42  ;;  %v7620_v58 = vld [vmem:[%s6343_s25 + $0xc4] sm:$0xf] }
 0x100   : > { %v5391_v52 = vrot.slane %v5375_v19, 9  ;;  %v4362_v54 = vrot.slane %v7210_v24, 5  ;;  %v4365_v27 = vrot.slane %v7262_v15, 5  ;;  %v3905_v22 = vshll.u32 %v7568_v39, 16  ;;  %v5378_v19 = vld [vmem:[%s6343_s25 + $0x78] sm:$0xe] }
 0x101   : > { %v3909_v33 = vshrl.u32 %v7568_v39, 16  ;;  %v7585_v0 = vsel %vm6595_vm7, %v5390_v1, %v4355_v29  ;;  %v4357_v38 = vrot.slane %v4355_v29, 4  ;;  %v8128_v59 = vcombine.low %v7324_v36, %v8127_v23  ;;  %v8132_v23 = vld [vmem:[#allocation13_spill] sm:$0xff] }
 0x102   : > { %v7592_v24 = vcombine.low %v3860_v6, %v3870_v62  ;;  %v7596_v15 = vsel %vm6595_vm7, %v5391_v52, %v4362_v54  ;;  %v5392_v61 = vrot.slane %v5376_v4, 9  ;;  %v4369_v20 = vrot.slane %v8129_v18, 5  ;;  %v6207_v6 = vld [vmem:[%s6343_s25 + $0xc] sm:$0xff]  }
 0x103   : > { %v7602_v36 = vsel %vm6595_vm7, %v4357_v38, %v4358_v26  ;;  %v4372_v51 = vrot.slane %v8130_v31, 5  ;;  %v5393_v37 = vrot.slane %v5377_v53, 9  ;;  %v4376_v11 = vrot.slane %v8131_v9, 5 }
 0x104   : > { %5841 = vmatmul.mubr.msk.bf16.gmra.mrb[8].mxu0 %vm658_vm3, %v7370_v30  ;;  %v4364_v30 = vrot.slane %v4362_v54, 4  ;;  %v5407_v10 = vcombine.low %v7585_v0, %v7602_v36  ;;  %v4379_v46 = vrot.slane %v7420_v45, 5  ;;  %v7626_v14 = vsel %vm6595_vm7, %v5392_v61, %v4369_v20 }
 0x105   : > { %5687 = vmatmul.mubr.msk.bf16.gmra.mrb[24].mxu1 %vm658_vm3, %v8128_v59  ;;  %5844 = vmatprep.mubr.msk.bf16.mxu0 %vm658_vm3, %v5344_v40  ;;  %v4371_v28 = vrot.slane %v4369_v20, 4  ;;  %v7628_v21 = vrot.slane %v3896_v55, 4  ;;  %v3920_v47 = vshrl.u32 %v5331_v63, 16  ;;  %v7632_v45 = vsel %vm6595_vm7, %v5393_v37, %v4376_v11  ;;  %v5105_v55 = vld [vmem:[%s6343_s25 + $0x78] sm:$0xf]  ;;  %v8133_v59 = vld [vmem:[#allocation16_spill] sm:$0xff] }
 0x106   : > { %5690 = vmatprep.mubr.msk.bf16.mxu1 %vm658_vm3, %v4995_v12  ;;  %v7610_v60 = vsel %vm6595_vm7, %v4364_v30, %v4365_v27  ;;  %v7614_v12 = vrot.slane %v3878_v8, 4  ;;  %v4378_v1 = vrot.slane %v4376_v11, 4  ;;  %v7636_v8 = vrot.slane %v3888_v50, 4 }
 0x107   : > { %v5408_v40 = vcombine.low %v7596_v15, %v7610_v60  ;;  %v7638_v62 = vrot.slane %v3899_v49, 5  ;;  %v3923_v29 = vshll.u32 %v5331_v63, 16  ;;  %v7642_v26 = vsel %vm6595_vm7, %v4371_v28, %v4372_v51  ;;  %v8136_v28 = vld [vmem:[#allocation14_spill] sm:$0xff] }
 0x108   : > { %v7645_v4 = vrot.slane %v3905_v22, 5  ;;  %v7647_v52 = vrot.slane %v3909_v33, 4  ;;  %v5409_v54 = vcombine.low %v7626_v14, %v7642_v26  ;;  %v7653_v27 = vsel %vm6595_vm7, %v4378_v1, %v4379_v46  ;;  %v5379_v33 = vld [vmem:[%s6343_s25 + $0x84] sm:$0xe]  ;;  %v6208_v1 = vld [vmem:[%s6343_s25 + $0x18] sm:$0xff]  }
 0x109   : > { %v3915_v49 = vshll.u32 %v7617_v35, 16  ;;  %v3929_v50 = vshll.u32 %v7620_v58, 16  ;;  %v5410_v53 = vcombine.low %v7632_v45, %v7653_v27  ;;  %v5394_v22 = vrot.slane %v5378_v19, 9  ;;  %v6270_v60 = vld [vmem:[%s6343_s25 + $0xa0] sm:$0xf] }
 0x10a   : > { %v3922_v38 = vrot.slane %v3920_v47, 4  ;;  %v4386_v30 = vrot.slane %v8133_v59, 5  ;;  %v2245_v61 = vshrl.u32 %v5105_v55, 16  ;;  %v3925_v63 = vrot.slane %v3923_v29, 5  ;;  %v5334_v29 = vld [vmem:[%s6343_s25 + $0xcc] sm:$0xf] }
 0x10b   : > { %v3933_v18 = vshrl.u32 %v7620_v58, 16  ;;  %v2248_v43 = vshll.u32 %v5105_v55, 16  ;;  %v5395_v37 = vrot.slane %v5379_v33, 9  ;;  %v3884_v9 = vsel %vm6369_vm4, %v7614_v12, %v7553_v42  ;;  %v7696_v55 = vld [vmem:[%s6343_s25 + $0xd0] sm:$0xf] }
 0x10c   : > { %5845 = vmatmul.mubr.msk.bf16.gmra.mrb[12].mxu0 %vm658_vm3, %v7551_v44  ;;  %v4383_v44 = vrot.slane %v8132_v23, 5  ;;  %v2247_v51 = vrot.slane %v2245_v61, 4  ;;  %v3902_v11 = vor.u32 %v7638_v62, %v7628_v21  ;;  %v4390_v47 = vrot.slane %v8136_v28, 5  ;;  %v6209_v21 = vld [vmem:[%s6343_s25 + $0x24] sm:$0xff]   ;;  %v6274_v27 = vld [vmem:[%s6343_s25 + $0xac] sm:$0xf] }
 0x10d   : > { %5691 = vmatmul.mubr.msk.bf16.gmra.mrb[28].mxu1 %vm658_vm3, %v4996_v56  ;;  %5848 = vmatprep.mubr.msk.bf16.mxu0 %vm658_vm3, %v7555_v41  ;;  %v8135_v56 = vld [vmem:[#allocation5_spill] sm:$0xff]  ;;  %v2250_v46 = vrot.slane %v2248_v43, 5  ;;  %v3894_v19 = vsel %vm6369_vm4, %v7636_v8, %v7565_v17  ;;  %v4393_v12 = vrot.slane %v7448_v2, 5  ;;  %v7704_v62 = vrot.slane %v3929_v50, 5  ;;  %v5380_v8 = vld [vmem:[%s6343_s25 + $0x90] sm:$0xe] }
 0x10e   : > { %5696 = vmatprep.mubr.msk.bf16.mxu1 %vm658_vm3, %v6207_v6  ;;  %v2267_v41 = vsel %vm6369_vm4, %v8135_v56, %v8134_v16  ;;  %v7678_v20 = vsel %vm6595_vm7, %v5394_v22, %v4383_v44  ;;  %v4385_v31 = vrot.slane %v4383_v44, 4  ;;  %v3912_v6 = vor.u32 %v7647_v52, %v7645_v4  ;;  %v7710_v52 = vld [vmem:[%s6343_s25 + $0xc8] sm:$0x1]  ;;  %v8138_v16 = vld [vmem:[#allocation2_spill] sm:$0xff] }
 0x10f   : > { %v3935_v22 = vrot.slane %v3933_v18, 4  ;;  %v2251_v17 = vor.u32 %v2250_v46, %v2247_v51  ;;  %v3917_v23 = vrot.slane %v3915_v49, 5  ;;  %v3926_v44 = vor.u32 %v3925_v63, %v3922_v38  ;;  %v8139_v51 = vld [vmem:[#allocation3_spill] sm:$0xff] }
 0x110   : > { %v7700_v42 = vsel %vm6595_vm7, %v4385_v31, %v4386_v30  ;;  %v7714_v59 = vsel %vm6595_vm7, %v5395_v37, %v4390_v47  ;;  %v4392_v30 = vrot.slane %v4390_v47, 4  ;;  %v3944_v2 = vshrl.u32 %v5334_v29, 16 }
 0x111   : > { %v5411_v33 = vcombine.low %v7678_v20, %v7700_v42  ;;  %v3947_v50 = vshll.u32 %v5334_v29, 16  ;;  %v3953_v61 = vshll.u32 %v7696_v55, 16  ;;  %v2252_v18 = vrot.slane %v2251_v17, 4  ;;  %v6210_v29 = vld [vmem:[%s6343_s25 + $0x30] sm:$0xff]  }
 0x112   : > { %v3957_v49 = vshrl.u32 %v7696_v55, 16  ;;  %v7725_v38 = vsel %vm6595_vm7, %v4392_v30, %v4393_v12  ;;  %v5396_v63 = vrot.slane %v5380_v8, 9  ;;  %v3936_v56 = vor.u32 %v3935_v22, %v7704_v62 }
 0x113   : > { %v3939_v31 = vshll.u32 %v7710_v52, 16  ;;  %v5412_v37 = vcombine.low %v7714_v59, %v7725_v38  ;;  %v5350_v46 = vcombine.low %v3884_v9, %v3894_v19  ;;  %v3903_v28 = vrot.slane %v3902_v11, 4  ;;  %v5381_v11 = vld [vmem:[%s6343_s25 + $0x9c] sm:$0xe] }
 0x114   : > { %5849 = vmatmul.mubr.msk.bf16.gmra.mrb[16].mxu0 %vm658_vm3, %v7557_v5  ;;  %v8137_v5 = vld [vmem:[#allocation15_spill] sm:$0xff]  ;;  %v3913_v47 = vrot.slane %v3912_v6, 4  ;;  %v3927_v12 = vrot.slane %v3926_v44, 4  ;;  %v4400_v8 = vrot.slane %v7457_v3, 5  ;;  %v3946_v30 = vrot.slane %v3944_v2, 4  ;;  %v6211_v19 = vld [vmem:[%s6343_s25 + $0x3c] sm:$0xff]  }
 0x115   : > { %5697 = vmatmul.mubr.msk.bf16.vlgmr.msra.gmra.mrb[0].mxu1 %vm658_vm3, %v6208_v1  ;;  %5852 = vmatprep.mubr.msk.bf16.mxu0 %vm658_vm3, %v7559_v7  ;;  %v4397_v43 = vrot.slane %v8137_v5, 5  ;;  %v2257_v7 = vsel %vm6369_vm4, %v2252_v18, %v8139_v51  ;;  %v3949_v18 = vrot.slane %v3947_v50, 5  ;;  %v7748_v5 = vrot.slane %v3953_v61, 5 }
 0x116   : > { %5899 = vmatpush3.bf16.msra.mxu1 %v8138_v16  ;;  %5700 = vmatprep.mubr.msk.bf16.mxu1 %vm658_vm3, %v6209_v21  ;;  %v7737_v1 = vcombine.low %v2257_v7, %v2267_v41  ;;  %v7741_v21 = vld [vmem:[%s6343_s25 + $0xd4] sm:$0x1]  ;;  %v3959_v9 = vrot.slane %v3957_v49, 4  ;;  %v3937_v41 = vrot.slane %v3936_v56, 4  ;;  %v3941_v6 = vrot.slane %v3939_v31, 5 }
 0x117   : > { %v7745_v22 = vsel %vm6595_vm7, %v5396_v63, %v4397_v43  ;;  %v4399_v17 = vrot.slane %v4397_v43, 4  ;;  %v3908_v63 = vsel %vm6369_vm4, %v3903_v28, %v7645_v4  ;;  %v3918_v2 = vsel %vm6369_vm4, %v3913_v47, %v3917_v23  ;;  %v6261_v16 = vld [vmem:[%s6343_s25 + $0x1c] sm:$0xf]  ;;  %v5382_v28 = vld [vmem:[%s6343_s25 + $0xa8] sm:$0xe] }
 0x118   : > { %v3963_v50 = vshll.u32 %v7741_v21, 16  ;;  %v5397_v61 = vrot.slane %v5381_v11, 9  ;;  %v4404_v49 = vrot.slane %v7445_v25, 5  ;;  %v3932_v4 = vsel %vm6369_vm4, %v3927_v12, %v7704_v62  ;;  %v5370_v62 = vld [vmem:[%s6343_s25 + $0x18] sm:$0xe]  ;;  %v6212_v47 = vld [vmem:[%s6343_s25 + $0x48] sm:$0xff]  }
 0x119   : > { %v7754_v44 = vsel %vm6595_vm7, %v4399_v17, %v4400_v8  ;;  %v3960_v43 = vor.u32 %v3959_v9, %v7748_v5  ;;  %v4407_v23 = vrot.slane %v7490_v57, 5  ;;  %v3942_v25 = vsel %vm6369_vm4, %v3937_v41, %v3941_v6  ;;  %v6262_v11 = vld [vmem:[%s6343_s25 + $0x20] sm:$0x1] }
 0x11a   : > { %v5413_v3 = vcombine.low %v7745_v22, %v7754_v44  ;;  %v4327_v56 = vrot.slane %v6261_v16, 5  ;;  %v7780_v31 = vsel %vm6595_vm7, %v5397_v61, %v4404_v49  ;;  %v4406_v51 = vrot.slane %v4404_v49, 4  ;;  %v5383_v49 = vld [vmem:[%s6343_s25 + $0xb4] sm:$0xe] }
 0x11b   : > { %v5351_v7 = vcombine.low %v3908_v63, %v3918_v2  ;;  %v3961_v17 = vrot.slane %v3960_v43, 4  ;;  %v5398_v41 = vrot.slane %v5382_v28, 9  ;;  %v4411_v6 = vrot.slane %v7493_v34, 5  ;;  %v5371_v2 = vld [vmem:[%s6343_s25 + $0x24] sm:$0xe] }
 0x11c   : > { %5853 = vmatmul.mubr.msk.bf16.gmra.mrb[20].mxu0 %vm658_vm3, %v7592_v24  ;;  %v3950_v24 = vor.u32 %v3949_v18, %v3946_v30  ;;  %v7785_v57 = vsel %vm6595_vm7, %v4406_v51, %v4407_v23  ;;  %v6213_v30 = vld [vmem:[%s6343_s25 + $0x54] sm:$0xff]   ;;  %v5386_v18 = vrot.slane %v5370_v62, 9  ;;  %v4329_v9 = vrot.slane %v4327_v56, 4  ;;  %v6265_v28 = vld [vmem:[%s6343_s25 + $0x2c] sm:$0x1] }
 0x11d   : > { %5701 = vmatmul.mubr.msk.bf16.gmra.mrb[4].mxu1 %vm658_vm3, %v6210_v29  ;;  %5856 = vmatprep.mubr.msk.bf16.mxu0 %vm658_vm3, %v5350_v46  ;;  %v3965_v46 = vrot.slane %v3963_v50, 5  ;;  %v5352_v29 = vcombine.low %v3932_v4, %v3942_v25  ;;  %v5414_v8 = vcombine.low %v7780_v31, %v7785_v57  ;;  %v4414_v63 = vrot.slane %v7503_v48, 5  ;;  %v6263_v50 = vld [vmem:[%s6343_s25 + $0x28] sm:$0xf]  ;;  %v5372_v25 = vld [vmem:[%s6343_s25 + $0x30] sm:$0xe] }
 0x11e   : > { %5704 = vmatprep.mubr.msk.bf16.mxu1 %vm658_vm3, %v6211_v19  ;;  %v3951_v12 = vrot.slane %v3950_v24, 4  ;;  %v4330_v19 = vrot.slane %v6262_v11, 5  ;;  %v4334_v61 = vrot.slane %v6263_v50, 5  ;;  %v7808_v48 = vsel %vm6595_vm7, %v5398_v41, %v4411_v6  ;;  %v6215_v11 = vld [vmem:[%s6343_s25 + $0x6c] sm:$0xff]   ;;  %v8140_v41 = vld [vmem:[#allocation6_spill] sm:$0xff] }
 0x11f   : > { %v3966_v34 = vsel %vm6369_vm4, %v3961_v17, %v3965_v46  ;;  %v4413_v24 = vrot.slane %v4411_v6, 4  ;;  %v4328_v43 = vsel %vm6595_vm7, %v5386_v18, %v4327_v56  ;;  %v5387_v51 = vrot.slane %v5371_v2, 9  ;;  %v5384_v50 = vld [vmem:[%s6343_s25 + $0xc0] sm:$0xe]  ;;  %v6279_v31 = vld [vmem:[%s6343_s25 + $0xc8] sm:$0x1] }
 0x120   : > { %v3956_v4 = vsel %vm6369_vm4, %v3951_v12, %v7748_v5  ;;  %v4331_v23 = vsel %vm6595_vm7, %v4329_v9, %v4330_v19  ;;  %v6264_v5 = vld [vmem:[%s6343_s25 + $0x34] sm:$0xf]  ;;  %v6214_v12 = vld [vmem:[%s6343_s25 + $0x60] sm:$0xff]   ;;  %v5388_v18 = vrot.slane %v5372_v25, 9  ;;  %v4421_v9 = vrot.slane %v7617_v35, 5 }
 0x121   : > { %v4341_v16 = vrot.slane %v6264_v5, 5  ;;  %v7819_v62 = vsel %vm6595_vm7, %v4413_v24, %v4414_v63  ;;  %v5353_v46 = vcombine.low %v3956_v4, %v3966_v34  ;;  %v5403_v17 = vcombine.low %v4328_v43, %v4331_v23  ;;  %v5373_v24 = vld [vmem:[%s6343_s25 + $0x3c] sm:$0xe] }
 0x122   : > { %v5415_v56 = vcombine.low %v7808_v48, %v7819_v62  ;;  %v4344_v6 = vrot.slane %v8140_v41, 5  ;;  %v4335_v35 = vsel %vm6595_vm7, %v5387_v51, %v4334_v61  ;;  %v5400_v5 = vrot.slane %v5384_v50, 9 }
 0x123   : > { %v4343_v19 = vrot.slane %v4341_v16, 4  ;;  %v4342_v23 = vsel %vm6595_vm7, %v5388_v18, %v4341_v16  ;;  %v4428_v51 = vrot.slane %v7710_v52, 5  ;;  %v2408_v57 = vshll.u32 %v6279_v31, 16 }
 0x124   : > { %5857 = vmatmul.mubr.msk.bf16.gmra.mrb[24].mxu0 %vm658_vm3, %v5351_v7  ;;  %v5399_v7 = vrot.slane %v5383_v49, 9 }
 0x125   : > { %5705 = vmatmul.mubr.msk.bf16.gmra.mrb[8].mxu1 %vm658_vm3, %v6212_v47  ;;  %5860 = vmatprep.mubr.msk.bf16.mxu0 %vm658_vm3, %v5352_v29  ;;  %v4337_v47 = vrot.slane %v6265_v28, 5  ;;  %v4418_v29 = vrot.slane %v7568_v39, 5  ;;  %v8141_v39 = vld [vmem:[#allocation7_spill] sm:$0xff]  ;;  %v4345_v25 = vsel %vm6595_vm7, %v4343_v19, %v4344_v6  ;;  %v5389_v28 = vrot.slane %v5373_v24, 9 }
 0x126   : > { %5708 = vmatprep.mubr.msk.bf16.mxu1 %vm658_vm3, %v6213_v30  ;;  %v4336_v30 = vrot.slane %v4334_v61, 4  ;;  %v4348_v49 = vrot.slane %v8141_v39, 5  ;;  %v4425_v61 = vrot.slane %v7620_v58, 5  ;;  %v6266_v39 = vld [vmem:[%s6343_s25 + $0x70] sm:$0xf]  ;;  %v4432_v24 = vrot.slane %v7696_v55, 5 }
 0x127   : > { %v7831_v63 = vsel %vm6595_vm7, %v5399_v7, %v4418_v29  ;;  %v4420_v2 = vrot.slane %v4418_v29, 4  ;;  %v5102_v7 = vld [vmem:[%s6343_s25 + $0x6c] sm:$0xf]  ;;  %v8142_v29 = vld [vmem:[#allocation8_spill] sm:$0xff] }
 0x128   : > { %v4338_v34 = vsel %vm6595_vm7, %v4336_v30, %v4337_v47  ;;  %v4350_v47 = vrot.slane %v4348_v49, 4  ;;  %v6216_v30 = vld [vmem:[%s6343_s25 + $0x78] sm:$0xff]   ;;  %v7862_v16 = vsel %vm6595_vm7, %v5400_v5, %v4425_v61  ;;  %v4427_v18 = vrot.slane %v4425_v61, 4 }
 0x129   : > { %v7838_v4 = vsel %vm6595_vm7, %v4420_v2, %v4421_v9  ;;  %v5405_v9 = vcombine.low %v4342_v23, %v4345_v25  ;;  %v2221_v19 = vshrl.u32 %v5102_v7, 16  ;;  %v2224_v41 = vshll.u32 %v5102_v7, 16 }
 0x12a   : > { %v5416_v43 = vcombine.low %v7831_v63, %v7838_v4  ;;  %v7867_v58 = vsel %vm6595_vm7, %v4427_v18, %v4428_v51  ;;  %v4349_v6 = vsel %vm6595_vm7, %v5389_v28, %v4348_v49  ;;  %v4435_v49 = vrot.slane %v7741_v21, 5  ;;  %v6218_v51 = vld [vmem:[%s6343_s25 + $0x90] sm:$0xff]   ;;  %v6219_v21 = vld [vmem:[%s6343_s25 + $0x9c] sm:$0xff]  }
 0x12b   : > { %v5417_v50 = vcombine.low %v7862_v16, %v7867_v58  ;;  %v2223_v23 = vrot.slane %v2221_v19, 4  ;;  %v2226_v25 = vrot.slane %v2224_v41, 5  ;;  %v4434_v7 = vrot.slane %v4432_v24, 4 }
 0x12c   : > { %5861 = vmatmul.mubr.msk.bf16.gmra.mrb[28].mxu0 %vm658_vm3, %v5353_v46  ;;  %v5404_v46 = vcombine.low %v4335_v35, %v4338_v34  ;;  %v2230_v35 = vshll.u32 %v6266_v39, 16  ;;  %v2234_v34 = vshrl.u32 %v6266_v39, 16 }
 0x12d   : > { %5709 = vmatmul.mubr.msk.bf16.gmra.mrb[12].mxu1 %vm658_vm3, %v6214_v12  ;;  %5866 = vmatprep.mubr.msk.bf16.mxu0 %vm658_vm3, %v5403_v17  ;;  %v4351_v12 = vrot.slane %v8142_v29, 5  ;;  %v5385_v17 = vld [vmem:[%s6343_s25 + $0xcc] sm:$0xe]  ;;  %v7889_v55 = vsel %vm6595_vm7, %v4434_v7, %v4435_v49 }
 0x12e   : > { %5712 = vmatprep.mubr.msk.bf16.mxu1 %vm658_vm3, %v6215_v11  ;;  %v6217_v11 = vld [vmem:[%s6343_s25 + $0x84] sm:$0xff]   ;;  %v5401_v52 = vrot.slane %v5385_v17, 9  ;;  %v2236_v28 = vrot.slane %v2234_v34, 4  ;;  %v6267_v17 = vld [vmem:[%s6343_s25 + $0x74] sm:$0x1] }
 0x12f   : > { %v4352_v2 = vsel %vm6595_vm7, %v4350_v47, %v4351_v12  ;;  %v5108_v47 = vld [vmem:[%s6343_s25 + $0x84] sm:$0xf]  ;;  %v2227_v12 = vor.u32 %v2226_v25, %v2223_v23  ;;  %v6221_v34 = vld [vmem:[%s6343_s25 + $0xb4] sm:$0xff]  }
 0x130   : > { %v7884_v5 = vsel %vm6595_vm7, %v5401_v52, %v4432_v24  ;;  %v5406_v61 = vcombine.low %v4349_v6, %v4352_v2  ;;  %v2272_v18 = vshll.u32 %v5108_v47, 16  ;;  %v5111_v6 = vld [vmem:[%s6343_s25 + $0x90] sm:$0xf]  ;;  %v6220_v2 = vld [vmem:[%s6343_s25 + $0xa8] sm:$0xff]  }
 0x131   : > { %v5418_v29 = vcombine.low %v7884_v5, %v7889_v55  ;;  %v2228_v52 = vrot.slane %v2227_v12, 4  ;;  %v2293_v23 = vshrl.u32 %v5111_v6, 16  ;;  %v2296_v25 = vshll.u32 %v5111_v6, 16 }
 0x132   : > { %v2326_v12 = vshll.u32 %v6270_v60, 16 }
 0x133   : > { %v2298_v14 = vrot.slane %v2296_v25, 5  ;;  %v6273_v25 = vld [vmem:[%s6343_s25 + $0xa4] sm:$0x1] }
 0x134   : > { %5867 = vmatmul.mubr.msk.bf16.vlgmr.msra.gmra.mrb[0].mxu0 %vm658_vm3, %v5404_v46  ;;  %v2232_v46 = vrot.slane %v2230_v35, 5  ;;  %v5114_v35 = vld [vmem:[%s6343_s25 + $0x9c] sm:$0xf]  ;;  %v7931_v6 = vrot.slane %v2326_v12, 5 }
 0x135   : > { %5713 = vmatmul.mubr.msk.bf16.gmra.mrb[16].mxu1 %vm658_vm3, %v6216_v30  ;;  %5870 = vmatprep.mubr.msk.bf16.mxu0 %vm658_vm3, %v5405_v9  ;;  %v2240_v30 = vshll.u32 %v6267_v17, 16  ;;  %v2269_v9 = vshrl.u32 %v5108_v47, 16  ;;  %v2320_v47 = vshll.u32 %v5114_v35, 16  ;;  %v6271_v17 = vld [vmem:[%s6343_s25 + $0x8c] sm:$0x1] }
 0x136   : > { %5716 = vmatprep.mubr.msk.bf16.mxu1 %vm658_vm3, %v6217_v11  ;;  %v2237_v13 = vor.u32 %v2236_v28, %v2232_v46  ;;  %v6268_v11 = vld [vmem:[%s6343_s25 + $0x88] sm:$0xf]  ;;  %v2233_v7 = vsel %vm6369_vm4, %v2228_v52, %v2232_v46 }
 0x137   : > { %v2278_v19 = vshll.u32 %v6268_v11, 16  ;;  %v2282_v41 = vshrl.u32 %v6268_v11, 16  ;;  %v2242_v0 = vrot.slane %v2240_v30, 5  ;;  %v2271_v36 = vrot.slane %v2269_v9, 4 }
 0x138   : > { %v2238_v39 = vrot.slane %v2237_v13, 4  ;;  %v2288_v30 = vshll.u32 %v6271_v17, 16  ;;  %v2295_v9 = vrot.slane %v2293_v23, 4  ;;  %v2322_v11 = vrot.slane %v2320_v47, 5 }
 0x139   : > { %v7908_v24 = vrot.slane %v2278_v19, 5  ;;  %v2284_v49 = vrot.slane %v2282_v41, 4  ;;  %v6222_v19 = vld [vmem:[%s6343_s25 + $0xc0] sm:$0xff]  }
 0x13a   : > { %v2243_v46 = vsel %vm6369_vm4, %v2238_v39, %v2242_v0  ;;  %v5117_v39 = vld [vmem:[%s6343_s25 + $0xa8] sm:$0xf] }
 0x13b   : > { %v2285_v13 = vor.u32 %v2284_v49, %v7908_v24  ;;  %v5135_v41 = vcombine.low %v2233_v7, %v2243_v46  ;;  %v2336_v7 = vshll.u32 %v6273_v25, 16  ;;  %v2344_v45 = vshll.u32 %v5117_v39, 16 }
 0x13c   : > { %5871 = vmatmul.mubr.msk.bf16.gmra.mrb[4].mxu0 %vm658_vm3, %v5406_v61  ;;  %v6269_v61 = vld [vmem:[%s6343_s25 + $0x94] sm:$0xf] }
 0x13d   : > { %5717 = vmatmul.mubr.msk.bf16.gmra.mrb[20].mxu1 %vm658_vm3, %v6218_v51  ;;  %5874 = vmatprep.mubr.msk.bf16.mxu0 %vm658_vm3, %v5407_v10  ;;  %v2274_v10 = vrot.slane %v2272_v18, 5  ;;  %v2302_v51 = vshll.u32 %v6269_v61, 16  ;;  %v2306_v28 = vshrl.u32 %v6269_v61, 16  ;;  %v2286_v0 = vrot.slane %v2285_v13, 4 }
 0x13e   : > { %5720 = vmatprep.mubr.msk.bf16.mxu1 %vm658_vm3, %v6219_v21  ;;  %v2317_v21 = vshrl.u32 %v5114_v35, 16  ;;  %v6272_v35 = vld [vmem:[%s6343_s25 + $0x98] sm:$0x1]  ;;  %v2341_v61 = vshrl.u32 %v5117_v39, 16  ;;  %v5123_v39 = vld [vmem:[%s6343_s25 + $0xc0] sm:$0xf] }
 0x13f   : > { %v2275_v15 = vor.u32 %v2274_v10, %v2271_v36  ;;  %v7928_v26 = vrot.slane %v2302_v51, 5  ;;  %v2290_v36 = vrot.slane %v2288_v30, 5  ;;  %v2299_v10 = vor.u32 %v2298_v14, %v2295_v9  ;;  %v5120_v51 = vld [vmem:[%s6343_s25 + $0xb4] sm:$0xf] }
 0x140   : > { %v2319_v18 = vrot.slane %v2317_v21, 4  ;;  %v2354_v21 = vshrl.u32 %v6274_v27, 16  ;;  %v2365_v20 = vshrl.u32 %v5120_v51, 16  ;;  %v2368_v42 = vshll.u32 %v5120_v51, 16 }
 0x141   : > { %v2276_v52 = vrot.slane %v2275_v15, 4  ;;  %v2291_v46 = vsel %vm6369_vm4, %v2286_v0, %v2290_v36  ;;  %v2300_v15 = vrot.slane %v2299_v10, 4  ;;  %v2338_v30 = vrot.slane %v2336_v7, 5 }
 0x142   : > { %v2323_v23 = vor.u32 %v2322_v11, %v2319_v18  ;;  %v2343_v9 = vrot.slane %v2341_v61, 4  ;;  %v2356_v11 = vrot.slane %v2354_v21, 4  ;;  %v6278_v61 = vld [vmem:[%s6343_s25 + $0xbc] sm:$0x1] }
 0x143   : > { %v2281_v47 = vsel %vm6369_vm4, %v2276_v52, %v7908_v24  ;;  %v2305_v0 = vsel %vm6369_vm4, %v2300_v15, %v7928_v26  ;;  %v2384_v22 = vshll.u32 %v6278_v61, 16 }
 0x144   : > { %5875 = vmatmul.mubr.msk.bf16.gmra.mrb[8].mxu0 %vm658_vm3, %v5408_v40  ;;  %v2330_v40 = vshrl.u32 %v6270_v60, 16  ;;  %v2324_v17 = vrot.slane %v2323_v23, 4  ;;  %v5137_v24 = vcombine.low %v2281_v47, %v2291_v46 }
 0x145   : > { %5721 = vmatmul.mubr.msk.bf16.gmra.mrb[24].mxu1 %vm658_vm3, %v6220_v2  ;;  %5878 = vmatprep.mubr.msk.bf16.mxu0 %vm658_vm3, %v5409_v54  ;;  %v2308_v54 = vrot.slane %v2306_v28, 4 }
 0x146   : > { %5724 = vmatprep.mubr.msk.bf16.mxu1 %vm658_vm3, %v6221_v34  ;;  %v2332_v2 = vrot.slane %v2330_v40, 4  ;;  %v2312_v34 = vshll.u32 %v6272_v35, 16  ;;  %v2329_v10 = vsel %vm6369_vm4, %v2324_v17, %v7931_v6  ;;  %v2410_v17 = vrot.slane %v2408_v57, 5 }
 0x147   : > { %v2309_v49 = vor.u32 %v2308_v54, %v7928_v26  ;;  %v2346_v54 = vrot.slane %v2344_v45, 5  ;;  %v6276_v26 = vld [vmem:[%s6343_s25 + $0xb0] sm:$0x1] }
 0x148   : > { %v2333_v28 = vor.u32 %v2332_v2, %v7931_v6  ;;  %v2314_v60 = vrot.slane %v2312_v34, 5  ;;  %v2360_v35 = vshll.u32 %v6276_v26, 16  ;;  %v2389_v34 = vshrl.u32 %v5123_v39, 16 }
 0x149   : > { %v2310_v13 = vrot.slane %v2309_v49, 4  ;;  %v2347_v38 = vor.u32 %v2346_v54, %v2343_v9  ;;  %v2392_v6 = vshll.u32 %v5123_v39, 16  ;;  %v6277_v49 = vld [vmem:[%s6343_s25 + $0xc4] sm:$0xf] }
 0x14a   : > { %v2334_v14 = vrot.slane %v2333_v28, 4  ;;  %v2398_v23 = vshll.u32 %v6277_v49, 16  ;;  %v2402_v25 = vshrl.u32 %v6277_v49, 16  ;;  %v2362_v45 = vrot.slane %v2360_v35, 5 }
 0x14b   : > { %v2315_v36 = vsel %vm6369_vm4, %v2310_v13, %v2314_v60  ;;  %v2348_v51 = vrot.slane %v2347_v38, 4  ;;  %v2386_v60 = vrot.slane %v2384_v22, 5 }
 0x14c   : > { %5879 = vmatmul.mubr.msk.bf16.gmra.mrb[12].mxu0 %vm658_vm3, %v5410_v53  ;;  %v2350_v53 = vshll.u32 %v6274_v27, 16  ;;  %v2339_v59 = vsel %vm6369_vm4, %v2334_v14, %v2338_v30  ;;  %v5138_v44 = vcombine.low %v2305_v0, %v2315_v36  ;;  %v2391_v27 = vrot.slane %v2389_v34, 4  ;;  %v8022_v0 = vld [vmem:[%s8074_s2] ss:$0 sm:$0xff] }
 0x14d   : > { %5725 = vmatmul.mubr.msk.bf16.gmra.mrb[28].mxu1 %vm658_vm3, %v6222_v19  ;;  %5882 = vmatprep.mubr.msk.bf16.mxu0 %vm658_vm3, %v5411_v33  ;;  %v6275_v33 = vld [vmem:[%s6343_s25 + $0xb8] sm:$0xf]  ;;  %v2367_v19 = vrot.slane %v2365_v20, 4  ;;  %v2400_v21 = vrot.slane %v2398_v23, 5  ;;  %v2404_v47 = vrot.slane %v2402_v25, 4 }
 0x14e   : > { %5746 = vmatprep.mubr.msk.bf16.mxu1 %vm658_vm3, %v5135_v41  ;;  %v2374_v12 = vshll.u32 %v6275_v33, 16  ;;  %v2378_v40 = vshrl.u32 %v6275_v33, 16  ;;  %v2352_v18 = vrot.slane %v2350_v53, 5  ;;  %v2370_v41 = vrot.slane %v2368_v42, 5 }
 0x14f   : > { %v2394_v53 = vrot.slane %v2392_v6, 5 }
 0x150   : > { %v2376_v52 = vrot.slane %v2374_v12, 5  ;;  %v2380_v2 = vrot.slane %v2378_v40, 4  ;;  %v2353_v20 = vsel %vm6369_vm4, %v2348_v51, %v2352_v18  ;;  %v2405_v12 = vor.u32 %v2404_v47, %v2400_v21 }
 0x151   : > { %v2395_v33 = vor.u32 %v2394_v53, %v2391_v27 }
 0x152   : > { %v2381_v7 = vor.u32 %v2380_v2, %v2376_v52  ;;  %v2406_v13 = vrot.slane %v2405_v12, 4 }
 0x153   : > { %v2396_v40 = vrot.slane %v2395_v33, 4 }
 0x154   : > { %5883 = vmatmul.mubr.msk.bf16.gmra.mrb[16].mxu0 %vm658_vm3, %v5412_v37  ;;  %v2357_v37 = vor.u32 %v2356_v11, %v2352_v18  ;;  %v2382_v15 = vrot.slane %v2381_v7, 4  ;;  %v2411_v9 = vsel %vm6369_vm4, %v2406_v13, %v2410_v17 }
 0x155   : > { %5747 = vmatmul.mubr.msk.bf16.vlgmr.msra.gmra.mrb[16].mxu1 %vm658_vm3, %v7737_v1  ;;  %5886 = vmatprep.mubr.msk.bf16.mxu0 %vm658_vm3, %v5413_v3  ;;  %v2371_v1 = vor.u32 %v2370_v41, %v2367_v19  ;;  %v5139_v3 = vcombine.low %v2329_v10, %v2339_v59  ;;  %v2401_v30 = vsel %vm6369_vm4, %v2396_v40, %v2400_v21 }
 0x156   : > { %5750 = vmatprep.mubr.msk.bf16.mxu1 %vm658_vm3, %v5137_v24  ;;  %v2358_v28 = vrot.slane %v2357_v37, 4  ;;  %v2387_v48 = vsel %vm6369_vm4, %v2382_v15, %v2386_v60  ;;  %v5142_v14 = vcombine.low %v2401_v30, %v2411_v9 }
 0x157   : > { %v2372_v46 = vrot.slane %v2371_v1, 4 }
 0x158   : > { %v2363_v42 = vsel %vm6369_vm4, %v2358_v28, %v2362_v45 }
 0x159   : > { %v5140_v62 = vcombine.low %v2353_v20, %v2363_v42 }
 0x15c   : > { %5887 = vmatmul.mubr.msk.bf16.gmra.mrb[20].mxu0 %vm658_vm3, %v5414_v8  ;;  %v2377_v8 = vsel %vm6369_vm4, %v2372_v46, %v2376_v52 }
 0x15d   : > { %5751 = vmatmul.mubr.msk.bf16.gmra.mrb[20].mxu1 %vm658_vm3, %v5138_v44  ;;  %5890 = vmatprep.mubr.msk.bf16.mxu0 %vm658_vm3, %v5415_v56  ;;  %v5141_v56 = vcombine.low %v2377_v8, %v2387_v48 }
 0x15e   : > { %5754 = vmatprep.mubr.msk.bf16.mxu1 %vm658_vm3, %v5139_v3 }
 0x164   : > { %5891 = vmatmul.mubr.msk.bf16.gmra.mrb[24].mxu0 %vm658_vm3, %v5416_v43 }
 0x165   : > { %5755 = vmatmul.mubr.msk.bf16.gmra.mrb[24].mxu1 %vm658_vm3, %v5140_v62  ;;  %5894 = vmatprep.mubr.msk.bf16.mxu0 %vm658_vm3, %v5417_v50 }
 0x166   : > { %5758 = vmatprep.mubr.msk.bf16.mxu1 %vm658_vm3, %v5141_v56 }
 0x16c   : > { %5895 = vmatmul.mubr.msk.bf16.gmra.mrb[28].mxu0 %vm658_vm3, %v5418_v29 }
 0x16d   : > { %5759 = vmatmul.mubr.msk.bf16.gmra.mrb[28].mxu1 %vm658_vm3, %v5142_v14 }
 0x1e8   : > { %v5698_v63 = vpop.f32.mrb[0].mxu1 }
 0x1e9   : > { %v1821_v4 = vpop.f32.mrb[1].mxu1 }
 0x1ea   : > { %v5699_v43 = vpop.f32.mrb[2].mxu1 }
 0x1eb   : > { %v1824_v16 = vpop.f32.mrb[3].mxu1 }
 0x1f0   : > { %v5702_v58 = vpop.f32.mrb[4].mxu1 }
 0x1f1   : > { %v1837_v50 = vpop.f32.mrb[5].mxu1 }
 0x1f2   : > { %v5703_v54 = vpop.f32.mrb[6].mxu1 }
 0x1f3   : > { %v1840_v18 = vpop.f32.mrb[7].mxu1 }
 0x1f8   : > { %v5706_v11 = vpop.f32.mrb[8].mxu1 }
 0x1f9   : > { %v1853_v24 = vpop.f32.mrb[9].mxu1 }
 0x1fa   : > { %v5707_v32 = vpop.f32.mrb[10].mxu1 }
 0x1fb   : > { %v1856_v19 = vpop.f32.mrb[11].mxu1 }
 0x200   : > { %v5710_v41 = vpop.f32.mrb[12].mxu1 }
 0x201   : > { %v1869_v52 = vpop.f32.mrb[13].mxu1 }
 0x202   : > { %v5711_v2 = vpop.f32.mrb[14].mxu1 }
 0x203   : > { %v1872_v5 = vpop.f32.mrb[15].mxu1 }
 0x207   : > { %v5868_v55 = vpop.f32.mrb[0].mxu0 }
 0x208   : > { %v5900_v29 = vadd.f32 %v5868_v55, %v5698_v63  ;;  %v4572_v39 = vpop.f32.mrb[1].mxu0 }
 0x209   : > { %v5901_v36 = vadd.f32 %v4572_v39, %v1821_v4  ;;  %v5869_v10 = vpop.f32.mrb[2].mxu0 }
 0x20a   : > { %v5902_v59 = vadd.f32 %v5869_v10, %v5699_v43  ;;  %v4575_v38 = vpop.f32.mrb[3].mxu0  ;;  %v4740_v22 = vadd.f32 %v5900_v29, %v8022_v0 }
 0x20b   : > { %v5903_v37 = vadd.f32 %v4575_v38, %v1824_v16  ;;  %v4738_v26 = vadd.f32 %v5901_v36, %v8022_v0 }
 0x20c   : > { %v4741_v3 = vadd.f32 %v5902_v59, %v8022_v0 }
 0x20d   : > { %4770 = vxpose.xlu0.b32.start [1/16] (narrow) %v4738_v26, 8  ;;  %v4739_v34 = vadd.f32 %v5903_v37, %v8022_v0 }
 0x20f   : > { %v5872_v35 = vpop.f32.mrb[4].mxu0 }
 0x210   : > { %v5904_v6 = vadd.f32 %v5872_v35, %v5702_v58  ;;  %v4588_v49 = vpop.f32.mrb[5].mxu0 }
 0x211   : > { %v5905_v23 = vadd.f32 %v4588_v49, %v1837_v50  ;;  %v5873_v25 = vpop.f32.mrb[6].mxu0  ;;  %4771 = vxpose.xlu0.b32.cont [2/16] (narrow) %v4739_v34, 8 }
 0x212   : > { %v5906_v1 = vadd.f32 %v5873_v25, %v5703_v54  ;;  %v4591_v7 = vpop.f32.mrb[7].mxu0  ;;  %v4744_v48 = vadd.f32 %v5904_v6, %v8022_v0 }
 0x213   : > { %v5907_v61 = vadd.f32 %v4591_v7, %v1840_v18  ;;  %v4742_v46 = vadd.f32 %v5905_v23, %v8022_v0 }
 0x214   : > { %v4745_v56 = vadd.f32 %v5906_v1, %v8022_v0 }
 0x215   : > { %4772 = vxpose.xlu0.b32.cont [3/16] (narrow) %v4740_v22, 8  ;;  %v4743_v60 = vadd.f32 %v5907_v61, %v8022_v0 }
 0x217   : > { %v5876_v44 = vpop.f32.mrb[8].mxu0 }
 0x218   : > { %v5908_v51 = vadd.f32 %v5876_v44, %v5706_v11  ;;  %v4604_v28 = vpop.f32.mrb[9].mxu0 }
 0x219   : > { %v5909_v45 = vadd.f32 %v4604_v28, %v1853_v24  ;;  %v5877_v27 = vpop.f32.mrb[10].mxu0  ;;  %4773 = vxpose.xlu0.b32.cont [4/16] (narrow) %v4741_v3, 8 }
 0x21a   : > { %v5910_v53 = vadd.f32 %v5877_v27, %v5707_v32  ;;  %v4607_v21 = vpop.f32.mrb[11].mxu0  ;;  %v4748_v10 = vadd.f32 %v5908_v51, %v8022_v0 }
 0x21b   : > { %v5911_v47 = vadd.f32 %v4607_v21, %v1856_v19  ;;  %v4746_v58 = vadd.f32 %v5909_v45, %v8022_v0 }
 0x21c   : > { %v4749_v26 = vadd.f32 %v5910_v53, %v8022_v0 }
 0x21d   : > { %4774 = vxpose.xlu0.b32.cont [5/16] (narrow) %v4742_v46, 8  ;;  %v4747_v11 = vadd.f32 %v5911_v47, %v8022_v0 }
 0x21f   : > { %v5880_v15 = vpop.f32.mrb[12].mxu0 }
 0x220   : > { %v8030_v20 = vadd.f32 %v5880_v15, %v5710_v41  ;;  %v4620_v42 = vpop.f32.mrb[13].mxu0 }
 0x221   : > { %v5913_v33 = vadd.f32 %v4620_v42, %v1869_v52  ;;  %v5881_v12 = vpop.f32.mrb[14].mxu0  ;;  %4775 = vxpose.xlu0.b32.cont [6/16] (narrow) %v4743_v60, 8 }
 0x222   : > { %v8032_v31 = vadd.f32 %v5881_v12, %v5711_v2  ;;  %v4623_v57 = vpop.f32.mrb[15].mxu0 }
 0x223   : > { %v8034_v8 = vadd.f32 %v4623_v57, %v1872_v5  ;;  %v4750_v3 = vadd.f32 %v5913_v33, %v8022_v0 }
 0x225   : > { %4776 = vxpose.xlu0.b32.cont [7/16] (narrow) %v4744_v48, 8  ;;  %v4751_v46 = vadd.f32 %v8034_v8, %v8022_v0 }
 0x227   : > { %v5884_v62 = vpop.f32.mrb[16].mxu0 }
 0x228   : > { %v5748_v40 = vpop.f32.mrb[16].mxu1  ;;  %v4636_v13 = vpop.f32.mrb[17].mxu0 }
 0x229   : > { %v5916_v17 = vadd.f32 %v5884_v62, %v5748_v40  ;;  %v2611_v30 = vpop.f32.mrb[17].mxu1  ;;  %v5885_v9 = vpop.f32.mrb[18].mxu0  ;;  %4777 = vxpose.xlu0.b32.cont [8/16] (narrow) %v4745_v56, 8 }
 0x22a   : > { %v5917_v14 = vadd.f32 %v4636_v13, %v2611_v30  ;;  %v5749_v63 = vpop.f32.mrb[18].mxu1  ;;  %v4639_v4 = vpop.f32.mrb[19].mxu0 }
 0x22b   : > { %v5918_v43 = vadd.f32 %v5885_v9, %v5749_v63  ;;  %v2614_v16 = vpop.f32.mrb[19].mxu1  ;;  %v4756_v38 = vadd.f32 %v5916_v17, %v8022_v0  ;;  %v4752_v17 = vadd.f32 %v8030_v20, %v8022_v0 }
 0x22c   : > { %v5919_v50 = vadd.f32 %v4639_v4, %v2614_v16  ;;  %v4754_v54 = vadd.f32 %v5917_v14, %v8022_v0 }
 0x22d   : > { %4778 = vxpose.xlu0.b32.cont [9/16] (narrow) %v4746_v58, 8  ;;  %v4757_v6 = vadd.f32 %v5918_v43, %v8022_v0  ;;  %v4753_v43 = vadd.f32 %v8032_v31, %v8022_v0 }
 0x22e   : > { %4802 = vxpose.xlu1.b32.start [1/16] (narrow) %v4754_v54, 8  ;;  %v4755_v19 = vadd.f32 %v5919_v50, %v8022_v0 }
 0x22f   : > { %v5888_v18 = vpop.f32.mrb[20].mxu0 }
 0x230   : > { %v5752_v24 = vpop.f32.mrb[20].mxu1  ;;  %v4652_v32 = vpop.f32.mrb[21].mxu0 }
 0x231   : > { %v5920_v41 = vadd.f32 %v5888_v18, %v5752_v24  ;;  %v2627_v52 = vpop.f32.mrb[21].mxu1  ;;  %v5889_v2 = vpop.f32.mrb[22].mxu0  ;;  %4779 = vxpose.xlu0.b32.cont [10/16] (narrow) %v4747_v11, 8 }
 0x232   : > { %v5921_v5 = vadd.f32 %v4652_v32, %v2627_v52  ;;  %4803 = vxpose.xlu1.b32.cont [2/16] (narrow) %v4755_v19, 8  ;;  %v5753_v55 = vpop.f32.mrb[22].mxu1  ;;  %v4655_v29 = vpop.f32.mrb[23].mxu0 }
 0x233   : > { %v5922_v39 = vadd.f32 %v5889_v2, %v5753_v55  ;;  %v2630_v36 = vpop.f32.mrb[23].mxu1  ;;  %v4760_v9 = vadd.f32 %v5920_v41, %v8022_v0 }
 0x234   : > { %v5923_v59 = vadd.f32 %v4655_v29, %v2630_v36  ;;  %v4758_v45 = vadd.f32 %v5921_v5, %v8022_v0 }
 0x235   : > { %4780 = vxpose.xlu0.b32.cont [11/16] (narrow) %v4748_v10, 8  ;;  %v4761_v16 = vadd.f32 %v5922_v39, %v8022_v0 }
 0x236   : > { %4804 = vxpose.xlu1.b32.cont [3/16] (narrow) %v4756_v38, 8  ;;  %v4759_v42 = vadd.f32 %v5923_v59, %v8022_v0 }
 0x237   : > { %v5892_v37 = vpop.f32.mrb[24].mxu0 }
 0x238   : > { %v5756_v35 = vpop.f32.mrb[24].mxu1  ;;  %v4668_v34 = vpop.f32.mrb[25].mxu0 }
 0x239   : > { %v5924_v49 = vadd.f32 %v5892_v37, %v5756_v35  ;;  %v2643_v23 = vpop.f32.mrb[25].mxu1  ;;  %v5893_v25 = vpop.f32.mrb[26].mxu0  ;;  %4781 = vxpose.xlu0.b32.cont [12/16] (narrow) %v4749_v26, 8 }
 0x23a   : > { %v5925_v1 = vadd.f32 %v4668_v34, %v2643_v23  ;;  %4805 = vxpose.xlu1.b32.cont [4/16] (narrow) %v4757_v6, 8  ;;  %v5757_v7 = vpop.f32.mrb[26].mxu1  ;;  %v4671_v61 = vpop.f32.mrb[27].mxu0 }
 0x23b   : > { %v5926_v22 = vadd.f32 %v5893_v25, %v5757_v7  ;;  %v2646_v44 = vpop.f32.mrb[27].mxu1  ;;  %v4764_v51 = vadd.f32 %v5924_v49, %v8022_v0 }
 0x23c   : > { %v5927_v28 = vadd.f32 %v4671_v61, %v2646_v44  ;;  %v4762_v27 = vadd.f32 %v5925_v1, %v8022_v0 }
 0x23d   : > { %4782 = vxpose.xlu0.b32.cont [13/16] (narrow) %v4750_v3, 8  ;;  %v4765_v53 = vadd.f32 %v5926_v22, %v8022_v0 }
 0x23e   : > { %4806 = vxpose.xlu1.b32.cont [5/16] (narrow) %v4758_v45, 8  ;;  %v4763_v21 = vadd.f32 %v5927_v28, %v8022_v0 }
 0x23f   : > { %v5896_v47 = vpop.f32.mrb[28].mxu0 }
 0x240   : > { %v5760_v15 = vpop.f32.mrb[28].mxu1  ;;  %v4684_v60 = vpop.f32.mrb[29].mxu0 }
 0x241   : > { %v5928_v33 = vadd.f32 %v5896_v47, %v5760_v15  ;;  %v2659_v12 = vpop.f32.mrb[29].mxu1  ;;  %v5897_v57 = vpop.f32.mrb[30].mxu0  ;;  %4783 = vxpose.xlu0.b32.cont [14/16] (narrow) %v4751_v46, 8 }
 0x242   : > { %v5929_v48 = vadd.f32 %v4684_v60, %v2659_v12  ;;  %4807 = vxpose.xlu1.b32.cont [6/16] (narrow) %v4759_v42, 8  ;;  %v5761_v62 = vpop.f32.mrb[30].mxu1  ;;  %v4687_v56 = vpop.f32.mrb[31].mxu0 }
 0x243   : > { %v5930_v40 = vadd.f32 %v5897_v57, %v5761_v62  ;;  %v2662_v13 = vpop.f32.mrb[31].mxu1  ;;  %v4768_v30 = vadd.f32 %v5928_v33, %v8022_v0 }
 0x244   : > { %v5931_v8 = vadd.f32 %v4687_v56, %v2662_v13  ;;  %v4766_v14 = vadd.f32 %v5929_v48, %v8022_v0 }
 0x245   : > { %4784 = vxpose.xlu0.b32.cont [15/16] (narrow) %v4752_v17, 8  ;;  %v4769_v63 = vadd.f32 %v5930_v40, %v8022_v0 }
 0x246   : > { %4808 = vxpose.xlu1.b32.cont [7/16] (narrow) %v4760_v9, 8  ;;  %v4767_v4 = vadd.f32 %v5931_v8, %v8022_v0 }
 0x249   : > { %4785 = vxpose.xlu0.b32.end [16/16] (narrow) %v4753_v43, 8 }
 0x24a   : > { %4809 = vxpose.xlu1.b32.cont [8/16] (narrow) %v4761_v16, 8 }
 0x24e   : > { %4810 = vxpose.xlu1.b32.cont [9/16] (narrow) %v4762_v27, 8 }
 0x252   : > { %4811 = vxpose.xlu1.b32.cont [10/16] (narrow) %v4763_v21, 8 }
 0x256   : > { %4812 = vxpose.xlu1.b32.cont [11/16] (narrow) %v4764_v51, 8 }
 0x25a   : > { %4813 = vxpose.xlu1.b32.cont [12/16] (narrow) %v4765_v53, 8 }
 0x25e   : > { %4814 = vxpose.xlu1.b32.cont [13/16] (narrow) %v4766_v14, 8 }
 0x262   : > { %4815 = vxpose.xlu1.b32.cont [14/16] (narrow) %v4767_v4, 8 }
 0x266   : > { %4816 = vxpose.xlu1.b32.cont [15/16] (narrow) %v4768_v30, 8 }
 0x26a   : > { %4817 = vxpose.xlu1.b32.end [16/16] (narrow) %v4769_v63, 8 }
 0x28d   : > { %v4786_v20 = vpop.trf.xlu0 }
 0x28e   : > { %4834 = vst [vmem:[%s170_s20] sm:$0xff] %v4786_v20 }
 0x2ae   : > { %v4818_v31 = vpop.trf.xlu1 }
 0x2af   : > { %4835 = vst [vmem:[%s170_s20 + $0x8] sm:$0xff] %v4818_v31 }
 0x2b0 PF: > { %s13_s12 = sadd.s32 1, %s6286_s12  }
 0x2b1   : > { %p10_p4 = scmp.ge.s32.totalorder %s13_s12, 4  }
 0x2b3   :  { %12 = sbr.rel (!%p10_p4) target bundleno = 1 (0x1), region = 72 }

</bundles_post_ra>
